<compile_context>
chip_gen: v5e
topology: v5e:2x2
jax: 0.10.0
libtpu: 0.0.40
codegen_flags: <defaults>
</compile_context>

<pallas_src>
import itertools
import math

import numpy as np
import jax
import jax.numpy as jnp
from jax.experimental import pallas as pl
from jax.experimental.pallas import tpu as pltpu

NODE_DIM = 30
EDGE_DIM = NODE_DIM * NODE_DIM
BN_EPS = 1e-5
# BatchNorm1d in eval mode with running_mean=0, running_var=1, weight=1, bias=0:
#   y = (x - 0) / sqrt(1 + eps) * 1 + 0
BN_SCALE = 1.0 / math.sqrt(1.0 + BN_EPS)

OPTICAL_NODES = [20, 21, 22, 23, 24, 25, 26, 27, 28, 29]
OPTICAL_EDGES = [(i, j) for i, j in itertools.product(OPTICAL_NODES, OPTICAL_NODES) if i <= j]
LOG_NODES = [20, 21, 22, 23, 24, 25, 26, 27, 28, 29, 14, 15]
LOG_EDGES = [(i, j) for i, j in itertools.product(LOG_NODES, LOG_NODES) if i <= j]


def _round_up(n, m):
    return ((n + m - 1) // m) * m


# --------------------------------------------------------------------------
# Trace-time parameter folding (pure weight preprocessing, runs once)
# --------------------------------------------------------------------------
def _edge_scatter(edge_list, total):
    s = np.zeros((len(edge_list), total), np.float32)
    for idx, (i, j) in enumerate(edge_list):
        s[idx, i * NODE_DIM + j] = 1.0
    return s


def _node_scatter(node_list, num_features, total):
    s = np.zeros((len(node_list), total), np.float32)
    for idx, n in enumerate(node_list):
        base = EDGE_DIM + n * num_features
        s[idx, base:base + num_features] = 1.0
    return s


def _symmetrize_dec(w, b):
    # Fold (E + E^T)/2 into the first EDGE_DIM output columns of the decoder.
    idx = np.arange(EDGE_DIM)
    perm = (idx % NODE_DIM) * NODE_DIM + (idx // NODE_DIM)
    w_e, w_n = w[:, :EDGE_DIM], w[:, EDGE_DIM:]
    b_e, b_n = b[:, :EDGE_DIM], b[:, EDGE_DIM:]
    w_sym = (w_e + w_e[:, perm]) * 0.5
    b_sym = (b_e + b_e[:, perm]) * 0.5
    return jnp.concatenate([w_sym, w_n], axis=1), jnp.concatenate([b_sym, b_n], axis=1)


def _fold_att(att_p, scat):
    scat = jnp.asarray(scat)
    return {"w_q": att_p["w_q"], "b_q": att_p["b_q"],
            "w_k": att_p["w_k"], "b_k": att_p["b_k"],
            "w_v": att_p["w_v"] @ scat, "b_v": att_p["b_v"] @ scat}


def fold_bae_params(p):
    nf = p["num_features"]
    total = EDGE_DIM + NODE_DIM * nf
    vae = dict(p["vae"])
    vae["w_dec2"], vae["b_dec2"] = _symmetrize_dec(vae["w_dec2"], vae["b_dec2"])
    return {
        "num_features": nf,
        "vae": vae,
        "optical_node": _fold_att(p["optical_node"], _node_scatter(OPTICAL_NODES, nf, total)),
        "optical_edge": _fold_att(p["optical_edge"], _edge_scatter(OPTICAL_EDGES, total)),
        "log_node": _fold_att(p["log_node"], _node_scatter(LOG_NODES, nf, total)),
        "log_edge": _fold_att(p["log_edge"], _edge_scatter(LOG_EDGES, total)),
    }


# --------------------------------------------------------------------------
# The single fused kernel
# --------------------------------------------------------------------------
def bae_kernel(x_ref, opt_ref, log_ref,
               we, be, wmu, bmu, wlv, blv, wd1, bd1, wd2, bd2,
               on_wq, on_bq, on_wk, on_bk, on_wv, on_bv,
               oe_wq, oe_bq, oe_wk, oe_bk, oe_wv, oe_bv,
               ln_wq, ln_bq, ln_wk, ln_bk, ln_wv, ln_bv,
               le_wq, le_bq, le_wk, le_bk, le_wv, le_bv,
               slab_ref):
    f32 = jnp.float32
    x = x_ref[...]

    # ---- VAE encoder: Linear -> ReLU -> BatchNorm1d(eval) -> Dropout(eval=id)
    h1 = jnp.maximum(jnp.dot(x, we[...], preferred_element_type=f32) + be[...], 0.0) * BN_SCALE
    mu = jnp.dot(h1, wmu[...], preferred_element_type=f32) + bmu[...]
    lv = jnp.dot(h1, wlv[...], preferred_element_type=f32) + blv[...]
    z = mu  # reparameterize() in eval mode returns mu

    # ---- VAE decoder (edge symmetrization already folded into wd2/bd2)
    h2 = jnp.maximum(jnp.dot(z, wd1[...], preferred_element_type=f32) + bd1[...], 0.0) * BN_SCALE
    dec = jnp.dot(h2, wd2[...], preferred_element_type=f32) + bd2[...]   # (B_pad, 1020)

    # ---- BaseAttention with a size-1 "sequence" axis (eval mode):
    #      softmax over size-1 axis == 1; isinf scores are zeroed; NaN scores
    #      propagate exactly as in the torch masked_fill/softmax path.
    def att(inp, wq, bq, wk, bk, wv, bv):
        scale = float(wq.shape[1]) ** 0.5
        q = jnp.dot(inp, wq[...], preferred_element_type=f32) + bq[...]
        k = jnp.dot(inp, wk[...], preferred_element_type=f32) + bk[...]
        v = jnp.dot(inp, wv[...], preferred_element_type=f32) + bv[...]   # scatter folded into wv
        s = jnp.sum(q * k, axis=-1, keepdims=True) * (1.0 / scale)        # (B_pad, 1)
        s = jnp.where(jnp.isinf(s), 0.0, s)                               # masked_fill_(isinf, 0)
        w = jnp.where(jnp.isnan(s), s, 1.0)                               # softmax(size-1) * mask
        return w * v

    opt = opt_ref[...]
    lm = jnp.mean(log_ref[...], axis=1)                                   # log.mean(1)

    acc = dec
    acc = acc + att(opt, on_wq, on_bq, on_wk, on_bk, on_wv, on_bv)
    acc = acc + att(opt, oe_wq, oe_bq, oe_wk, oe_bk, oe_wv, oe_bv)
    acc = acc + att(lm, ln_wq, ln_bq, ln_wk, ln_bk, ln_wv, ln_bv)
    acc = acc + att(lm, le_wq, le_bq, le_wk, le_bk, le_wv, le_bv)

    # ---- pack everything into one output slab (sliced once outside)
    dec_width = wd2.shape[1]
    latent = wmu.shape[1]
    mu_off = _round_up(dec_width, 128)
    slab_ref[:, :dec_width] = acc
    slab_ref[:, mu_off:mu_off + latent] = mu
    slab_ref[:, mu_off + latent:mu_off + 2 * latent] = lv


# --------------------------------------------------------------------------
# Wrapper: one pad, one pallas_call, one set of output slices
# --------------------------------------------------------------------------
def bae_forward(folded, x, optical, log):
    b = x.shape[0]
    pad_b = _round_up(max(b, 8), 8)

    def pad(a):
        if pad_b == b:
            return a
        return jnp.pad(a, [(0, pad_b - b)] + [(0, 0)] * (a.ndim - 1))

    v = folded["vae"]
    nf = folded["num_features"]
    dec_width = v["w_dec2"].shape[1]
    latent = v["w_mu"].shape[1]
    mu_off = _round_up(dec_width, 128)
    slab_w = _round_up(mu_off + 2 * latent, 128)

    args = (pad(x), pad(optical), pad(log),
            v["w_enc"], v["b_enc"], v["w_mu"], v["b_mu"], v["w_lv"], v["b_lv"],
            v["w_dec1"], v["b_dec1"], v["w_dec2"], v["b_dec2"])
    for key in ("optical_node", "optical_edge", "log_node", "log_edge"):
        a = folded[key]
        args += (a["w_q"], a["b_q"], a["w_k"], a["b_k"], a["w_v"], a["b_v"])

    slab = pl.pallas_call(
        bae_kernel,
        out_shape=jax.ShapeDtypeStruct((pad_b, slab_w), jnp.float32),
        in_specs=[pl.BlockSpec(memory_space=pltpu.MemorySpace.VMEM) for _ in args],
        out_specs=pl.BlockSpec(memory_space=pltpu.MemorySpace.VMEM),
    )(*args)

    edge_repr = slab[:b, :EDGE_DIM].reshape(b, NODE_DIM, NODE_DIM)
    node_repr = slab[:b, EDGE_DIM:EDGE_DIM + NODE_DIM * nf].reshape(b, NODE_DIM, nf)
    mu = slab[:b, mu_off:mu_off + latent]
    logvar = slab[:b, mu_off + latent:mu_off + 2 * latent]
    # TODO(synk): check_nan() is referenced but not defined in the source module; skipped.
    return edge_repr, node_repr, mu, logvar


# --------------------------------------------------------------------------
# Deterministic parameter construction (raw, un-folded)
# --------------------------------------------------------------------------
def init_linear(key, in_dim, out_dim, scale=0.05):
    kw, kb = jax.random.split(key)
    w = scale * jax.random.normal(kw, (in_dim, out_dim), jnp.float32)
    b = scale * jax.random.normal(kb, (1, out_dim), jnp.float32)
    return w, b


def make_attention_params(key, in_dim, out_dim, hidden_dim):
    kq, kk, kv = jax.random.split(key, 3)
    wq, bq = init_linear(kq, in_dim, hidden_dim)
    wk, bk = init_linear(kk, in_dim, hidden_dim)
    wv, bv = init_linear(kv, in_dim, out_dim)
    return {"w_q": wq, "b_q": bq, "w_k": wk, "b_k": bk, "w_v": wv, "b_v": bv}


def make_bae_params(key, input_dim, hidden_size, latent_dim, num_features):
    log_dim = 9
    output_size = EDGE_DIM + NODE_DIM * num_features
    ks = jax.random.split(key, 9)
    w_enc, b_enc = init_linear(ks[0], input_dim, hidden_size)
    w_mu, b_mu = init_linear(ks[1], hidden_size, latent_dim)
    w_lv, b_lv = init_linear(ks[2], hidden_size, latent_dim)
    w_dec1, b_dec1 = init_linear(ks[3], latent_dim, hidden_size)
    w_dec2, b_dec2 = init_linear(ks[4], hidden_size, output_size)
    return {
        "num_features": num_features,
        "vae": {"w_enc": w_enc, "b_enc": b_enc, "w_mu": w_mu, "b_mu": b_mu,
                "w_lv": w_lv, "b_lv": b_lv, "w_dec1": w_dec1, "b_dec1": b_dec1,
                "w_dec2": w_dec2, "b_dec2": b_dec2},
        # OpticalNode/EdgeAttention: in_dim = input_dim, hidden_dim = 512
        "optical_node": make_attention_params(ks[5], input_dim, len(OPTICAL_NODES), 512),
        "optical_edge": make_attention_params(ks[6], input_dim, len(OPTICAL_EDGES), 512),
        # LogNode/EdgeAttention: in_dim = 9, hidden_dim = 64 (BaseAttention default)
        "log_node": make_attention_params(ks[7], log_dim, len(LOG_NODES), 64),
        "log_edge": make_attention_params(ks[8], log_dim, len(LOG_EDGES), 64),
    }


# --------------------------------------------------------------------------
# float64 numpy reference of the original (un-folded) torch forward, for checking
# --------------------------------------------------------------------------
def _reference_forward(p, x, optical, log):
    def lin(a, w, b):
        return a @ np.asarray(w, np.float64) + np.asarray(b, np.float64)

    x = np.asarray(x, np.float64)
    optical = np.asarray(optical, np.float64)
    log = np.asarray(log, np.float64)
    v = p["vae"]
    h1 = np.maximum(lin(x, v["w_enc"], v["b_enc"]), 0.0) * BN_SCALE
    mu = lin(h1, v["w_mu"], v["b_mu"])
    logvar = lin(h1, v["w_lv"], v["b_lv"])
    h2 = np.maximum(lin(mu, v["w_dec1"], v["b_dec1"]), 0.0) * BN_SCALE
    out = lin(h2, v["w_dec2"], v["b_dec2"])
    nf = p["num_features"]
    edge = out[:, :EDGE_DIM].reshape(-1, NODE_DIM, NODE_DIM)
    edge = (edge + edge.transpose(0, 2, 1)) / 2
    node = out[:, EDGE_DIM:].reshape(-1, NODE_DIM, nf).copy()
    edge = (edge + edge.transpose(0, 2, 1)) / 2

    def att(inp, ap):
        q = lin(inp, ap["w_q"], ap["b_q"])
        k = lin(inp, ap["w_k"], ap["b_k"])
        vv = lin(inp, ap["w_v"], ap["b_v"])
        s = (q * k).sum(-1, keepdims=True) / (ap["w_q"].shape[1] ** 0.5)
        s = np.where(np.isinf(s), 0.0, s)
        w = np.where(np.isnan(s), s, 1.0)
        return w * vv

    aon, aoe = att(optical, p["optical_node"]), att(optical, p["optical_edge"])
    for idx, n in enumerate(OPTICAL_NODES):
        node[:, n, :] += aon[:, idx:idx + 1]
    for idx, (i, j) in enumerate(OPTICAL_EDGES):
        edge[:, i, j] += aoe[:, idx]
    lm = log.mean(1)
    aln, ale = att(lm, p["log_node"]), att(lm, p["log_edge"])
    for idx, n in enumerate(LOG_NODES):
        node[:, n, :] += aln[:, idx:idx + 1]
    for idx, (i, j) in enumerate(LOG_EDGES):
        edge[:, i, j] += ale[:, idx]
    return edge, node, mu, logvar


if __name__ == "__main__":
    B = 2
    INPUT_DIM = 64      # args-like: input_dim
    HIDDEN = 32         # args.bae_hidden_size
    LATENT = 16         # args.bae_latent_size
    NUM_FEATURES = 4    # args.num_features
    T = 8               # log sequence length
    LOG_DIM = 9

    root = jax.random.PRNGKey(0)
    kparams, kx, kopt, klog = jax.random.split(root, 4)
    raw_params = make_bae_params(kparams, INPUT_DIM, HIDDEN, LATENT, NUM_FEATURES)
    params = fold_bae_params(raw_params)     # one-time weight preprocessing

    x = jax.random.normal(kx, (B, INPUT_DIM), jnp.float32)
    optical = jax.random.normal(kopt, (B, INPUT_DIM), jnp.float32)
    log = jax.random.normal(klog, (B, T, LOG_DIM), jnp.float32)

    edge_repr, node_repr, mu, logvar = bae_forward(params, x, optical, log)
    jax.block_until_ready((edge_repr, node_repr, mu, logvar))

    assert edge_repr.shape == (B, NODE_DIM, NODE_DIM)
    assert node_repr.shape == (B, NODE_DIM, NUM_FEATURES)
    assert mu.shape == (B, LATENT) and logvar.shape == (B, LATENT)

    # correctness check against a float64 reference of the original forward
    ref_e, ref_n, ref_mu, ref_lv = _reference_forward(raw_params, x, optical, log)
    np.testing.assert_allclose(np.asarray(edge_repr), ref_e, rtol=1e-3, atol=1e-3)
    np.testing.assert_allclose(np.asarray(node_repr), ref_n, rtol=1e-3, atol=1e-3)
    np.testing.assert_allclose(np.asarray(mu), ref_mu, rtol=1e-3, atol=1e-3)
    np.testing.assert_allclose(np.asarray(logvar), ref_lv, rtol=1e-3, atol=1e-3)

    print("KERNEL_OK")
</pallas_src>

<mosaic_0001>
module attributes {stable_mosaic.version = 11 : i64} {
  func.func @bae_kernel(%arg0: memref<8x64xf32, #tpu.memory_space<vmem>>, %arg1: memref<8x64xf32, #tpu.memory_space<vmem>>, %arg2: memref<8x8x9xf32, #tpu.memory_space<vmem>>, %arg3: memref<64x32xf32, #tpu.memory_space<vmem>>, %arg4: memref<1x32xf32, #tpu.memory_space<vmem>>, %arg5: memref<32x16xf32, #tpu.memory_space<vmem>>, %arg6: memref<1x16xf32, #tpu.memory_space<vmem>>, %arg7: memref<32x16xf32, #tpu.memory_space<vmem>>, %arg8: memref<1x16xf32, #tpu.memory_space<vmem>>, %arg9: memref<16x32xf32, #tpu.memory_space<vmem>>, %arg10: memref<1x32xf32, #tpu.memory_space<vmem>>, %arg11: memref<32x1020xf32, #tpu.memory_space<vmem>>, %arg12: memref<1x1020xf32, #tpu.memory_space<vmem>>, %arg13: memref<64x512xf32, #tpu.memory_space<vmem>>, %arg14: memref<1x512xf32, #tpu.memory_space<vmem>>, %arg15: memref<64x512xf32, #tpu.memory_space<vmem>>, %arg16: memref<1x512xf32, #tpu.memory_space<vmem>>, %arg17: memref<64x1020xf32, #tpu.memory_space<vmem>>, %arg18: memref<1x1020xf32, #tpu.memory_space<vmem>>, %arg19: memref<64x512xf32, #tpu.memory_space<vmem>>, %arg20: memref<1x512xf32, #tpu.memory_space<vmem>>, %arg21: memref<64x512xf32, #tpu.memory_space<vmem>>, %arg22: memref<1x512xf32, #tpu.memory_space<vmem>>, %arg23: memref<64x1020xf32, #tpu.memory_space<vmem>>, %arg24: memref<1x1020xf32, #tpu.memory_space<vmem>>, %arg25: memref<9x64xf32, #tpu.memory_space<vmem>>, %arg26: memref<1x64xf32, #tpu.memory_space<vmem>>, %arg27: memref<9x64xf32, #tpu.memory_space<vmem>>, %arg28: memref<1x64xf32, #tpu.memory_space<vmem>>, %arg29: memref<9x1020xf32, #tpu.memory_space<vmem>>, %arg30: memref<1x1020xf32, #tpu.memory_space<vmem>>, %arg31: memref<9x64xf32, #tpu.memory_space<vmem>>, %arg32: memref<1x64xf32, #tpu.memory_space<vmem>>, %arg33: memref<9x64xf32, #tpu.memory_space<vmem>>, %arg34: memref<1x64xf32, #tpu.memory_space<vmem>>, %arg35: memref<9x1020xf32, #tpu.memory_space<vmem>>, %arg36: memref<1x1020xf32, #tpu.memory_space<vmem>>, %arg37: memref<8x1152xf32, #tpu.memory_space<vmem>>) attributes {dimension_semantics = [], scalar_prefetch = 0 : i64, scratch_operands = 0 : i64, tpu.core_type = #tpu.core_type<tc>} {
    %c0 = arith.constant 0 : index
    %c0_0 = arith.constant 0 : index
    %0 = vector.load %arg0[%c0, %c0_0] : memref<8x64xf32, #tpu.memory_space<vmem>>, vector<8x64xf32>
    %c0_1 = arith.constant 0 : index
    %c0_2 = arith.constant 0 : index
    %1 = vector.load %arg3[%c0_1, %c0_2] : memref<64x32xf32, #tpu.memory_space<vmem>>, vector<64x32xf32>
    %cst = arith.constant dense<0.000000e+00> : vector<8x32xf32>
    %2 = tpu.matmul %0, %1, %cst {dimension_numbers = #tpu.dot_dimension_numbers<[1], [0], [0], [1], [0, 0, 1, 1], [], []>} : vector<8x64xf32>, vector<64x32xf32>, vector<8x32xf32> -> vector<8x32xf32>
    %c0_3 = arith.constant 0 : index
    %c0_4 = arith.constant 0 : index
    %3 = vector.load %arg4[%c0_3, %c0_4] : memref<1x32xf32, #tpu.memory_space<vmem>>, vector<1x32xf32>
    %4 = vector.broadcast %3 : vector<1x32xf32> to vector<8x32xf32>
    %5 = arith.addf %2, %4 : vector<8x32xf32>
    %cst_5 = arith.constant 0.000000e+00 : f32
    %6 = vector.broadcast %cst_5 : f32 to vector<8x32xf32>
    %7 = arith.maximumf %5, %6 : vector<8x32xf32>
    %cst_6 = arith.constant 0.999994993 : f32
    %8 = vector.broadcast %cst_6 : f32 to vector<8x32xf32>
    %9 = arith.mulf %7, %8 : vector<8x32xf32>
    %c0_7 = arith.constant 0 : index
    %c0_8 = arith.constant 0 : index
    %10 = vector.load %arg5[%c0_7, %c0_8] : memref<32x16xf32, #tpu.memory_space<vmem>>, vector<32x16xf32>
    %cst_9 = arith.constant dense<0.000000e+00> : vector<8x16xf32>
    %11 = tpu.matmul %9, %10, %cst_9 {dimension_numbers = #tpu.dot_dimension_numbers<[1], [0], [0], [1], [0, 0, 1, 1], [], []>} : vector<8x32xf32>, vector<32x16xf32>, vector<8x16xf32> -> vector<8x16xf32>
    %c0_10 = arith.constant 0 : index
    %c0_11 = arith.constant 0 : index
    %12 = vector.load %arg6[%c0_10, %c0_11] : memref<1x16xf32, #tpu.memory_space<vmem>>, vector<1x16xf32>
    %13 = vector.broadcast %12 : vector<1x16xf32> to vector<8x16xf32>
    %14 = arith.addf %11, %13 : vector<8x16xf32>
    %c0_12 = arith.constant 0 : index
    %c0_13 = arith.constant 0 : index
    %15 = vector.load %arg7[%c0_12, %c0_13] : memref<32x16xf32, #tpu.memory_space<vmem>>, vector<32x16xf32>
    %cst_14 = arith.constant dense<0.000000e+00> : vector<8x16xf32>
    %16 = tpu.matmul %9, %15, %cst_14 {dimension_numbers = #tpu.dot_dimension_numbers<[1], [0], [0], [1], [0, 0, 1, 1], [], []>} : vector<8x32xf32>, vector<32x16xf32>, vector<8x16xf32> -> vector<8x16xf32>
    %c0_15 = arith.constant 0 : index
    %c0_16 = arith.constant 0 : index
    %17 = vector.load %arg8[%c0_15, %c0_16] : memref<1x16xf32, #tpu.memory_space<vmem>>, vector<1x16xf32>
    %18 = vector.broadcast %17 : vector<1x16xf32> to vector<8x16xf32>
    %19 = arith.addf %16, %18 : vector<8x16xf32>
    %c0_17 = arith.constant 0 : index
    %c0_18 = arith.constant 0 : index
    %20 = vector.load %arg9[%c0_17, %c0_18] : memref<16x32xf32, #tpu.memory_space<vmem>>, vector<16x32xf32>
    %cst_19 = arith.constant dense<0.000000e+00> : vector<8x32xf32>
    %21 = tpu.matmul %14, %20, %cst_19 {dimension_numbers = #tpu.dot_dimension_numbers<[1], [0], [0], [1], [0, 0, 1, 1], [], []>} : vector<8x16xf32>, vector<16x32xf32>, vector<8x32xf32> -> vector<8x32xf32>
    %c0_20 = arith.constant 0 : index
    %c0_21 = arith.constant 0 : index
    %22 = vector.load %arg10[%c0_20, %c0_21] : memref<1x32xf32, #tpu.memory_space<vmem>>, vector<1x32xf32>
    %23 = vector.broadcast %22 : vector<1x32xf32> to vector<8x32xf32>
    %24 = arith.addf %21, %23 : vector<8x32xf32>
    %cst_22 = arith.constant 0.000000e+00 : f32
    %25 = vector.broadcast %cst_22 : f32 to vector<8x32xf32>
    %26 = arith.maximumf %24, %25 : vector<8x32xf32>
    %cst_23 = arith.constant 0.999994993 : f32
    %27 = vector.broadcast %cst_23 : f32 to vector<8x32xf32>
    %28 = arith.mulf %26, %27 : vector<8x32xf32>
    %c0_24 = arith.constant 0 : index
    %c0_25 = arith.constant 0 : index
    %29 = vector.load %arg11[%c0_24, %c0_25] : memref<32x1020xf32, #tpu.memory_space<vmem>>, vector<32x1020xf32>
    %cst_26 = arith.constant dense<0.000000e+00> : vector<8x1020xf32>
    %30 = tpu.matmul %28, %29, %cst_26 {dimension_numbers = #tpu.dot_dimension_numbers<[1], [0], [0], [1], [0, 0, 1, 1], [], []>} : vector<8x32xf32>, vector<32x1020xf32>, vector<8x1020xf32> -> vector<8x1020xf32>
    %c0_27 = arith.constant 0 : index
    %c0_28 = arith.constant 0 : index
    %31 = vector.load %arg12[%c0_27, %c0_28] : memref<1x1020xf32, #tpu.memory_space<vmem>>, vector<1x1020xf32>
    %32 = vector.broadcast %31 : vector<1x1020xf32> to vector<8x1020xf32>
    %33 = arith.addf %30, %32 : vector<8x1020xf32>
    %c0_29 = arith.constant 0 : index
    %c0_30 = arith.constant 0 : index
    %34 = vector.load %arg1[%c0_29, %c0_30] : memref<8x64xf32, #tpu.memory_space<vmem>>, vector<8x64xf32>
    %c0_31 = arith.constant 0 : index
    %c0_32 = arith.constant 0 : index
    %c0_33 = arith.constant 0 : index
    %35 = vector.load %arg2[%c0_31, %c0_32, %c0_33] : memref<8x8x9xf32, #tpu.memory_space<vmem>>, vector<8x8x9xf32>
    %cst_34 = arith.constant dense<0.000000e+00> : vector<8x9xf32>
    %36 = vector.multi_reduction <add>, %35, %cst_34 [1] : vector<8x8x9xf32> to vector<8x9xf32>
    %cst_35 = arith.constant 8.000000e+00 : f32
    %37 = vector.broadcast %cst_35 : f32 to vector<8x9xf32>
    %38 = arith.divf %36, %37 : vector<8x9xf32>
    %c0_36 = arith.constant 0 : index
    %c0_37 = arith.constant 0 : index
    %39 = vector.load %arg13[%c0_36, %c0_37] : memref<64x512xf32, #tpu.memory_space<vmem>>, vector<64x512xf32>
    %cst_38 = arith.constant dense<0.000000e+00> : vector<8x512xf32>
    %40 = tpu.matmul %34, %39, %cst_38 {dimension_numbers = #tpu.dot_dimension_numbers<[1], [0], [0], [1], [0, 0, 1, 1], [], []>} : vector<8x64xf32>, vector<64x512xf32>, vector<8x512xf32> -> vector<8x512xf32>
    %c0_39 = arith.constant 0 : index
    %c0_40 = arith.constant 0 : index
    %41 = vector.load %arg14[%c0_39, %c0_40] : memref<1x512xf32, #tpu.memory_space<vmem>>, vector<1x512xf32>
    %42 = vector.broadcast %41 : vector<1x512xf32> to vector<8x512xf32>
    %43 = arith.addf %40, %42 : vector<8x512xf32>
    %c0_41 = arith.constant 0 : index
    %c0_42 = arith.constant 0 : index
    %44 = vector.load %arg15[%c0_41, %c0_42] : memref<64x512xf32, #tpu.memory_space<vmem>>, vector<64x512xf32>
    %cst_43 = arith.constant dense<0.000000e+00> : vector<8x512xf32>
    %45 = tpu.matmul %34, %44, %cst_43 {dimension_numbers = #tpu.dot_dimension_numbers<[1], [0], [0], [1], [0, 0, 1, 1], [], []>} : vector<8x64xf32>, vector<64x512xf32>, vector<8x512xf32> -> vector<8x512xf32>
    %c0_44 = arith.constant 0 : index
    %c0_45 = arith.constant 0 : index
    %46 = vector.load %arg16[%c0_44, %c0_45] : memref<1x512xf32, #tpu.memory_space<vmem>>, vector<1x512xf32>
    %47 = vector.broadcast %46 : vector<1x512xf32> to vector<8x512xf32>
    %48 = arith.addf %45, %47 : vector<8x512xf32>
    %c0_46 = arith.constant 0 : index
    %c0_47 = arith.constant 0 : index
    %49 = vector.load %arg17[%c0_46, %c0_47] : memref<64x1020xf32, #tpu.memory_space<vmem>>, vector<64x1020xf32>
    %cst_48 = arith.constant dense<0.000000e+00> : vector<8x1020xf32>
    %50 = tpu.matmul %34, %49, %cst_48 {dimension_numbers = #tpu.dot_dimension_numbers<[1], [0], [0], [1], [0, 0, 1, 1], [], []>} : vector<8x64xf32>, vector<64x1020xf32>, vector<8x1020xf32> -> vector<8x1020xf32>
    %c0_49 = arith.constant 0 : index
    %c0_50 = arith.constant 0 : index
    %51 = vector.load %arg18[%c0_49, %c0_50] : memref<1x1020xf32, #tpu.memory_space<vmem>>, vector<1x1020xf32>
    %52 = vector.broadcast %51 : vector<1x1020xf32> to vector<8x1020xf32>
    %53 = arith.addf %50, %52 : vector<8x1020xf32>
    %54 = arith.mulf %43, %48 : vector<8x512xf32>
    %cst_51 = arith.constant dense<0.000000e+00> : vector<8xf32>
    %55 = vector.multi_reduction <add>, %54, %cst_51 [1] : vector<8x512xf32> to vector<8xf32>
    %56 = vector.shape_cast %55 : vector<8xf32> to vector<8x1xf32>
    %cst_52 = arith.constant 0.0441941731 : f32
    %57 = vector.broadcast %cst_52 : f32 to vector<8x1xf32>
    %58 = arith.mulf %56, %57 : vector<8x1xf32>
    %59 = math.absf %58 : vector<8x1xf32>
    %cst_53 = arith.constant 0x7F800000 : f32
    %60 = vector.broadcast %cst_53 : f32 to vector<8x1xf32>
    %61 = arith.cmpf oeq, %59, %60 : vector<8x1xf32>
    %cst_54 = arith.constant 0.000000e+00 : f32
    %62 = vector.broadcast %cst_54 : f32 to vector<8x1xf32>
    %63 = arith.select %61, %62, %58 : vector<8x1xi1>, vector<8x1xf32>
    %64 = arith.cmpf one, %63, %63 : vector<8x1xf32>
    %cst_55 = arith.constant 1.000000e+00 : f32
    %65 = vector.broadcast %cst_55 : f32 to vector<8x1xf32>
    %66 = arith.select %64, %63, %65 : vector<8x1xi1>, vector<8x1xf32>
    %67 = vector.broadcast %66 : vector<8x1xf32> to vector<8x1020xf32>
    %68 = arith.mulf %67, %53 : vector<8x1020xf32>
    %69 = arith.addf %33, %68 : vector<8x1020xf32>
    %c0_56 = arith.constant 0 : index
    %c0_57 = arith.constant 0 : index
    %70 = vector.load %arg19[%c0_56, %c0_57] : memref<64x512xf32, #tpu.memory_space<vmem>>, vector<64x512xf32>
    %cst_58 = arith.constant dense<0.000000e+00> : vector<8x512xf32>
    %71 = tpu.matmul %34, %70, %cst_58 {dimension_numbers = #tpu.dot_dimension_numbers<[1], [0], [0], [1], [0, 0, 1, 1], [], []>} : vector<8x64xf32>, vector<64x512xf32>, vector<8x512xf32> -> vector<8x512xf32>
    %c0_59 = arith.constant 0 : index
    %c0_60 = arith.constant 0 : index
    %72 = vector.load %arg20[%c0_59, %c0_60] : memref<1x512xf32, #tpu.memory_space<vmem>>, vector<1x512xf32>
    %73 = vector.broadcast %72 : vector<1x512xf32> to vector<8x512xf32>
    %74 = arith.addf %71, %73 : vector<8x512xf32>
    %c0_61 = arith.constant 0 : index
    %c0_62 = arith.constant 0 : index
    %75 = vector.load %arg21[%c0_61, %c0_62] : memref<64x512xf32, #tpu.memory_space<vmem>>, vector<64x512xf32>
    %cst_63 = arith.constant dense<0.000000e+00> : vector<8x512xf32>
    %76 = tpu.matmul %34, %75, %cst_63 {dimension_numbers = #tpu.dot_dimension_numbers<[1], [0], [0], [1], [0, 0, 1, 1], [], []>} : vector<8x64xf32>, vector<64x512xf32>, vector<8x512xf32> -> vector<8x512xf32>
    %c0_64 = arith.constant 0 : index
    %c0_65 = arith.constant 0 : index
    %77 = vector.load %arg22[%c0_64, %c0_65] : memref<1x512xf32, #tpu.memory_space<vmem>>, vector<1x512xf32>
    %78 = vector.broadcast %77 : vector<1x512xf32> to vector<8x512xf32>
    %79 = arith.addf %76, %78 : vector<8x512xf32>
    %c0_66 = arith.constant 0 : index
    %c0_67 = arith.constant 0 : index
    %80 = vector.load %arg23[%c0_66, %c0_67] : memref<64x1020xf32, #tpu.memory_space<vmem>>, vector<64x1020xf32>
    %cst_68 = arith.constant dense<0.000000e+00> : vector<8x1020xf32>
    %81 = tpu.matmul %34, %80, %cst_68 {dimension_numbers = #tpu.dot_dimension_numbers<[1], [0], [0], [1], [0, 0, 1, 1], [], []>} : vector<8x64xf32>, vector<64x1020xf32>, vector<8x1020xf32> -> vector<8x1020xf32>
    %c0_69 = arith.constant 0 : index
    %c0_70 = arith.constant 0 : index
    %82 = vector.load %arg24[%c0_69, %c0_70] : memref<1x1020xf32, #tpu.memory_space<vmem>>, vector<1x1020xf32>
    %83 = vector.broadcast %82 : vector<1x1020xf32> to vector<8x1020xf32>
    %84 = arith.addf %81, %83 : vector<8x1020xf32>
    %85 = arith.mulf %74, %79 : vector<8x512xf32>
    %cst_71 = arith.constant dense<0.000000e+00> : vector<8xf32>
    %86 = vector.multi_reduction <add>, %85, %cst_71 [1] : vector<8x512xf32> to vector<8xf32>
    %87 = vector.shape_cast %86 : vector<8xf32> to vector<8x1xf32>
    %cst_72 = arith.constant 0.0441941731 : f32
    %88 = vector.broadcast %cst_72 : f32 to vector<8x1xf32>
    %89 = arith.mulf %87, %88 : vector<8x1xf32>
    %90 = math.absf %89 : vector<8x1xf32>
    %cst_73 = arith.constant 0x7F800000 : f32
    %91 = vector.broadcast %cst_73 : f32 to vector<8x1xf32>
    %92 = arith.cmpf oeq, %90, %91 : vector<8x1xf32>
    %cst_74 = arith.constant 0.000000e+00 : f32
    %93 = vector.broadcast %cst_74 : f32 to vector<8x1xf32>
    %94 = arith.select %92, %93, %89 : vector<8x1xi1>, vector<8x1xf32>
    %95 = arith.cmpf one, %94, %94 : vector<8x1xf32>
    %cst_75 = arith.constant 1.000000e+00 : f32
    %96 = vector.broadcast %cst_75 : f32 to vector<8x1xf32>
    %97 = arith.select %95, %94, %96 : vector<8x1xi1>, vector<8x1xf32>
    %98 = vector.broadcast %97 : vector<8x1xf32> to vector<8x1020xf32>
    %99 = arith.mulf %98, %84 : vector<8x1020xf32>
    %100 = arith.addf %69, %99 : vector<8x1020xf32>
    %c0_76 = arith.constant 0 : index
    %c0_77 = arith.constant 0 : index
    %101 = vector.load %arg25[%c0_76, %c0_77] : memref<9x64xf32, #tpu.memory_space<vmem>>, vector<9x64xf32>
    %cst_78 = arith.constant dense<0.000000e+00> : vector<8x64xf32>
    %102 = tpu.matmul %38, %101, %cst_78 {dimension_numbers = #tpu.dot_dimension_numbers<[1], [0], [0], [1], [0, 0, 1, 1], [], []>} : vector<8x9xf32>, vector<9x64xf32>, vector<8x64xf32> -> vector<8x64xf32>
    %c0_79 = arith.constant 0 : index
    %c0_80 = arith.constant 0 : index
    %103 = vector.load %arg26[%c0_79, %c0_80] : memref<1x64xf32, #tpu.memory_space<vmem>>, vector<1x64xf32>
    %104 = vector.broadcast %103 : vector<1x64xf32> to vector<8x64xf32>
    %105 = arith.addf %102, %104 : vector<8x64xf32>
    %c0_81 = arith.constant 0 : index
    %c0_82 = arith.constant 0 : index
    %106 = vector.load %arg27[%c0_81, %c0_82] : memref<9x64xf32, #tpu.memory_space<vmem>>, vector<9x64xf32>
    %cst_83 = arith.constant dense<0.000000e+00> : vector<8x64xf32>
    %107 = tpu.matmul %38, %106, %cst_83 {dimension_numbers = #tpu.dot_dimension_numbers<[1], [0], [0], [1], [0, 0, 1, 1], [], []>} : vector<8x9xf32>, vector<9x64xf32>, vector<8x64xf32> -> vector<8x64xf32>
    %c0_84 = arith.constant 0 : index
    %c0_85 = arith.constant 0 : index
    %108 = vector.load %arg28[%c0_84, %c0_85] : memref<1x64xf32, #tpu.memory_space<vmem>>, vector<1x64xf32>
    %109 = vector.broadcast %108 : vector<1x64xf32> to vector<8x64xf32>
    %110 = arith.addf %107, %109 : vector<8x64xf32>
    %c0_86 = arith.constant 0 : index
    %c0_87 = arith.constant 0 : index
    %111 = vector.load %arg29[%c0_86, %c0_87] : memref<9x1020xf32, #tpu.memory_space<vmem>>, vector<9x1020xf32>
    %cst_88 = arith.constant dense<0.000000e+00> : vector<8x1020xf32>
    %112 = tpu.matmul %38, %111, %cst_88 {dimension_numbers = #tpu.dot_dimension_numbers<[1], [0], [0], [1], [0, 0, 1, 1], [], []>} : vector<8x9xf32>, vector<9x1020xf32>, vector<8x1020xf32> -> vector<8x1020xf32>
    %c0_89 = arith.constant 0 : index
    %c0_90 = arith.constant 0 : index
    %113 = vector.load %arg30[%c0_89, %c0_90] : memref<1x1020xf32, #tpu.memory_space<vmem>>, vector<1x1020xf32>
    %114 = vector.broadcast %113 : vector<1x1020xf32> to vector<8x1020xf32>
    %115 = arith.addf %112, %114 : vector<8x1020xf32>
    %116 = arith.mulf %105, %110 : vector<8x64xf32>
    %cst_91 = arith.constant dense<0.000000e+00> : vector<8xf32>
    %117 = vector.multi_reduction <add>, %116, %cst_91 [1] : vector<8x64xf32> to vector<8xf32>
    %118 = vector.shape_cast %117 : vector<8xf32> to vector<8x1xf32>
    %cst_92 = arith.constant 1.250000e-01 : f32
    %119 = vector.broadcast %cst_92 : f32 to vector<8x1xf32>
    %120 = arith.mulf %118, %119 : vector<8x1xf32>
    %121 = math.absf %120 : vector<8x1xf32>
    %cst_93 = arith.constant 0x7F800000 : f32
    %122 = vector.broadcast %cst_93 : f32 to vector<8x1xf32>
    %123 = arith.cmpf oeq, %121, %122 : vector<8x1xf32>
    %cst_94 = arith.constant 0.000000e+00 : f32
    %124 = vector.broadcast %cst_94 : f32 to vector<8x1xf32>
    %125 = arith.select %123, %124, %120 : vector<8x1xi1>, vector<8x1xf32>
    %126 = arith.cmpf one, %125, %125 : vector<8x1xf32>
    %cst_95 = arith.constant 1.000000e+00 : f32
    %127 = vector.broadcast %cst_95 : f32 to vector<8x1xf32>
    %128 = arith.select %126, %125, %127 : vector<8x1xi1>, vector<8x1xf32>
    %129 = vector.broadcast %128 : vector<8x1xf32> to vector<8x1020xf32>
    %130 = arith.mulf %129, %115 : vector<8x1020xf32>
    %131 = arith.addf %100, %130 : vector<8x1020xf32>
    %c0_96 = arith.constant 0 : index
    %c0_97 = arith.constant 0 : index
    %132 = vector.load %arg31[%c0_96, %c0_97] : memref<9x64xf32, #tpu.memory_space<vmem>>, vector<9x64xf32>
    %cst_98 = arith.constant dense<0.000000e+00> : vector<8x64xf32>
    %133 = tpu.matmul %38, %132, %cst_98 {dimension_numbers = #tpu.dot_dimension_numbers<[1], [0], [0], [1], [0, 0, 1, 1], [], []>} : vector<8x9xf32>, vector<9x64xf32>, vector<8x64xf32> -> vector<8x64xf32>
    %c0_99 = arith.constant 0 : index
    %c0_100 = arith.constant 0 : index
    %134 = vector.load %arg32[%c0_99, %c0_100] : memref<1x64xf32, #tpu.memory_space<vmem>>, vector<1x64xf32>
    %135 = vector.broadcast %134 : vector<1x64xf32> to vector<8x64xf32>
    %136 = arith.addf %133, %135 : vector<8x64xf32>
    %c0_101 = arith.constant 0 : index
    %c0_102 = arith.constant 0 : index
    %137 = vector.load %arg33[%c0_101, %c0_102] : memref<9x64xf32, #tpu.memory_space<vmem>>, vector<9x64xf32>
    %cst_103 = arith.constant dense<0.000000e+00> : vector<8x64xf32>
    %138 = tpu.matmul %38, %137, %cst_103 {dimension_numbers = #tpu.dot_dimension_numbers<[1], [0], [0], [1], [0, 0, 1, 1], [], []>} : vector<8x9xf32>, vector<9x64xf32>, vector<8x64xf32> -> vector<8x64xf32>
    %c0_104 = arith.constant 0 : index
    %c0_105 = arith.constant 0 : index
    %139 = vector.load %arg34[%c0_104, %c0_105] : memref<1x64xf32, #tpu.memory_space<vmem>>, vector<1x64xf32>
    %140 = vector.broadcast %139 : vector<1x64xf32> to vector<8x64xf32>
    %141 = arith.addf %138, %140 : vector<8x64xf32>
    %c0_106 = arith.constant 0 : index
    %c0_107 = arith.constant 0 : index
    %142 = vector.load %arg35[%c0_106, %c0_107] : memref<9x1020xf32, #tpu.memory_space<vmem>>, vector<9x1020xf32>
    %cst_108 = arith.constant dense<0.000000e+00> : vector<8x1020xf32>
    %143 = tpu.matmul %38, %142, %cst_108 {dimension_numbers = #tpu.dot_dimension_numbers<[1], [0], [0], [1], [0, 0, 1, 1], [], []>} : vector<8x9xf32>, vector<9x1020xf32>, vector<8x1020xf32> -> vector<8x1020xf32>
    %c0_109 = arith.constant 0 : index
    %c0_110 = arith.constant 0 : index
    %144 = vector.load %arg36[%c0_109, %c0_110] : memref<1x1020xf32, #tpu.memory_space<vmem>>, vector<1x1020xf32>
    %145 = vector.broadcast %144 : vector<1x1020xf32> to vector<8x1020xf32>
    %146 = arith.addf %143, %145 : vector<8x1020xf32>
    %147 = arith.mulf %136, %141 : vector<8x64xf32>
    %cst_111 = arith.constant dense<0.000000e+00> : vector<8xf32>
    %148 = vector.multi_reduction <add>, %147, %cst_111 [1] : vector<8x64xf32> to vector<8xf32>
    %149 = vector.shape_cast %148 : vector<8xf32> to vector<8x1xf32>
    %cst_112 = arith.constant 1.250000e-01 : f32
    %150 = vector.broadcast %cst_112 : f32 to vector<8x1xf32>
    %151 = arith.mulf %149, %150 : vector<8x1xf32>
    %152 = math.absf %151 : vector<8x1xf32>
    %cst_113 = arith.constant 0x7F800000 : f32
    %153 = vector.broadcast %cst_113 : f32 to vector<8x1xf32>
    %154 = arith.cmpf oeq, %152, %153 : vector<8x1xf32>
    %cst_114 = arith.constant 0.000000e+00 : f32
    %155 = vector.broadcast %cst_114 : f32 to vector<8x1xf32>
    %156 = arith.select %154, %155, %151 : vector<8x1xi1>, vector<8x1xf32>
    %157 = arith.cmpf one, %156, %156 : vector<8x1xf32>
    %cst_115 = arith.constant 1.000000e+00 : f32
    %158 = vector.broadcast %cst_115 : f32 to vector<8x1xf32>
    %159 = arith.select %157, %156, %158 : vector<8x1xi1>, vector<8x1xf32>
    %160 = vector.broadcast %159 : vector<8x1xf32> to vector<8x1020xf32>
    %161 = arith.mulf %160, %146 : vector<8x1020xf32>
    %162 = arith.addf %131, %161 : vector<8x1020xf32>
    %c0_116 = arith.constant 0 : index
    %c0_117 = arith.constant 0 : index
    %163 = vector.load %arg37[%c0_116, %c0_117] : memref<8x1152xf32, #tpu.memory_space<vmem>>, vector<8x1020xf32>
    tpu.vector_store %arg37[%c0_116, %c0_117], %162 {strides = array<i32>} : memref<8x1152xf32, #tpu.memory_space<vmem>>, vector<8x1020xf32>,
    %c0_118 = arith.constant 0 : index
    %c1024 = arith.constant 1024 : index
    %164 = vector.load %arg37[%c0_118, %c1024] : memref<8x1152xf32, #tpu.memory_space<vmem>>, vector<8x16xf32>
    tpu.vector_store %arg37[%c0_118, %c1024], %14 {strides = array<i32>} : memref<8x1152xf32, #tpu.memory_space<vmem>>, vector<8x16xf32>,
    %c0_119 = arith.constant 0 : index
    %c1040 = arith.constant 1040 : index
    %165 = vector.load %arg37[%c0_119, %c1040] : memref<8x1152xf32, #tpu.memory_space<vmem>>, vector<8x16xf32>
    tpu.vector_store %arg37[%c0_119, %c1040], %19 {strides = array<i32>} : memref<8x1152xf32, #tpu.memory_space<vmem>>, vector<8x16xf32>,
    return
  }
}

</mosaic_0001>

<bundles_post_ra>
// kernel: tpu_custom_call.1
= control target key start
LH: loop header
LB: loop body
LE: loop exit
PB: predicated region body
PF: predicated region fallthrough
CT: control target
= control target key end

     0   :  { %s3382_s6 = smov 1   ;;  %s3383_s10 = smov 2   ;;  %s4099_s0 = inlined_call_operand.smem [shape: u32[38], index: -1, kind: input, shape index: {}] }
   0x1   :  { %s3456_s5 = sld [smem:[%s4099_s0]]   ;;  %s3384_s14 = smov 3  }
   0x2   :  { %s3461_s9 = sld [smem:[%s4099_s0 + %s3382_s6]]   ;;  %s3385_s18 = smov 4  }
   0x3   :  { %s3466_s13 = sld [smem:[%s4099_s0 + %s3383_s10]]   ;;  %s3386_s22 = smov 5  }
   0x4   :  { %s3471_s17 = sld [smem:[%s4099_s0 + %s3384_s14]]   ;;  %s3387_s26 = smov 6  }
   0x5   :  { %s3476_s21 = sld [smem:[%s4099_s0 + %s3385_s18]]   ;;  %s3388_s30 = smov 7  }
   0x6   :  { %s3481_s25 = sld [smem:[%s4099_s0 + %s3386_s22]]   ;;  %s3389_s4 = smov 8  }
   0x7   :  { %s3486_s29 = sld [smem:[%s4099_s0 + %s3387_s26]]   ;;  %s3390_s10 = smov 9  }
   0x8   :  { %s3491_s3 = sld [smem:[%s4099_s0 + %s3388_s30]]   ;;  %s3391_s15 = smov 10  }
   0x9   :  { %4115 = sst [smem:[#allocation51_spill]] %s3466_s13  ;;  %s3392_s20 = smov 11  }
   0xa   :  { %4116 = sst [smem:[#allocation52_spill]] %s3471_s17  ;;  %s3393_s26 = smov 12  }
   0xb   :  { %s3496_s8 = sld [smem:[%s4099_s0 + %s3389_s4]]   ;;  %s3394_s1 = smov 13  }
   0xc   :  { %4117 = sst [smem:[#allocation53_spill]] %s3481_s25  ;;  %s3395_s7 = smov 14  }
   0xd   :  { %s3501_s14 = sld [smem:[%s4099_s0 + %s3390_s10]]   ;;  %s3397_s22 = smov 16  }
   0xe   :  { %4118 = sst [smem:[#allocation54_spill]] %s3491_s3  ;;  %s3398_s28 = smov 17  }
   0xf   :  { %s3506_s19 = sld [smem:[%s4099_s0 + %s3391_s15]]   ;;  %s3396_s15 = smov 15  }
  0x10   :  { %s3511_s24 = sld [smem:[%s4099_s0 + %s3392_s20]]  }
  0x11   :  { %s3516_s30 = sld [smem:[%s4099_s0 + %s3393_s26]]  }
  0x12   :  { %s3521_s6 = sld [smem:[%s4099_s0 + %s3394_s1]]  }
  0x13   :  { %4119 = sst [smem:[#allocation55_spill]] %s3501_s14 }
  0x14   :  { %s3526_s12 = sld [smem:[%s4099_s0 + %s3395_s7]]   ;;  %s3399_s7 = smov 18  }
  0x15   :  { %s3531_s20 = sld [smem:[%s4099_s0 + %s3396_s15]]   ;;  %s3400_s15 = smov 19  }
  0x16   :  { %s3536_s27 = sld [smem:[%s4099_s0 + %s3397_s22]]   ;;  %s3401_s22 = smov 20  }
  0x17   :  { %4120 = sst [smem:[#allocation56_spill]] %s3516_s30 }
  0x18   :  { %s3541_s4 = sld [smem:[%s4099_s0 + %s3398_s28]]   ;;  %s3402_s28 = smov 21  }
  0x19   :  { %s3546_s30 = sld [smem:[%s4099_s0 + %s3399_s7]]   ;;  %s3403_s7 = smov 22  }
  0x1a   :  { %4121 = sst [smem:[#allocation57_spill]] %s3526_s12 }
  0x1b   :  { %s3551_s13 = sld [smem:[%s4099_s0 + %s3400_s15]]   ;;  %s3404_s15 = smov 23  }
  0x1c   :  { %4122 = sst [smem:[#allocation58_spill]] %s3536_s27 }
  0x1d   :  { %s3556_s14 = sld [smem:[%s4099_s0 + %s3401_s22]]   ;;  %s3405_s22 = smov 24  }
  0x1e   :  { %s3561_s3 = sld [smem:[%s4099_s0 + %s3402_s28]]   ;;  %s3406_s28 = smov 25  }
  0x1f   :  { %4123 = sst [smem:[#allocation59_spill]] %s3546_s30 }
  0x20   :  { %s3566_s30 = sld [smem:[%s4099_s0 + %s3403_s7]]   ;;  %s3407_s7 = smov 26  }
  0x21   :  { %4124 = sst [smem:[#allocation60_spill]] %s3551_s13 }
  0x22   :  { %s3571_s25 = sld [smem:[%s4099_s0 + %s3404_s15]]   ;;  %s3408_s15 = smov 27  }
  0x23   :  { %s3576_s17 = sld [smem:[%s4099_s0 + %s3405_s22]]   ;;  %s3409_s22 = smov 28  }
  0x24   :  { %4125 = sst [smem:[#allocation61_spill]] %s3561_s3 }
  0x25   :  { %s3581_s3 = sld [smem:[%s4099_s0 + %s3406_s28]]   ;;  %s3410_s28 = smov 29  }
  0x26   :  { %s3586_s13 = sld [smem:[%s4099_s0 + %s3407_s7]]   ;;  %s3411_s7 = smov 30  }
  0x27   :  { %s3596_s27 = sld [smem:[%s4099_s0 + %s3409_s22]]   ;;  %s3413_s22 = smov 32  }
  0x28   :  { %4126 = sst [smem:[#allocation62_spill]] %s3571_s25 }
  0x29   :  { %s3591_s25 = sld [smem:[%s4099_s0 + %s3408_s15]]   ;;  %s3412_s15 = smov 31  }
  0x2b   :  { %4127 = sst [smem:[#allocation63_spill]] %s3581_s3 }
  0x2c   :  { %4128 = sst [smem:[#allocation64_spill]] %s3586_s13 }
  0x2d   :  { %4130 = sst [smem:[#allocation66_spill]] %s3596_s27 }
  0x2e   :  { %s3601_s3 = sld [smem:[%s4099_s0 + %s3410_s28]]   ;;  %s3414_s28 = smov 33  }
  0x2f   :  { %4129 = sst [smem:[#allocation65_spill]] %s3591_s25 }
  0x30   :  { %s3606_s13 = sld [smem:[%s4099_s0 + %s3411_s7]]   ;;  %s3415_s7 = smov 34  }
  0x31   :  { %s3611_s25 = sld [smem:[%s4099_s0 + %s3412_s15]]   ;;  %s3416_s15 = smov 35  }
  0x32   :  { %s3616_s27 = sld [smem:[%s4099_s0 + %s3413_s22]]   ;;  %s3417_s22 = smov 36  }
  0x33   :  { %s3621_s12 = sld [smem:[%s4099_s0 + %s3414_s28]]   ;;  %s3418_s28 = smov 37  }
  0x36   :  { %4131 = sst [smem:[#allocation67_spill]] %s3606_s13 }
  0x37   :  { %4132 = sst [smem:[#allocation68_spill]] %s3611_s25 }
  0x38   :  { %4133 = sst [smem:[#allocation69_spill]] %s3616_s27 }
  0x39   :  { %4134 = sst [smem:[#allocation70_spill]] %s3621_s12 }
  0x3a   :  { %s3626_s13 = sld [smem:[%s4099_s0 + %s3415_s7]]  }
  0x3b   :  { %s3631_s25 = sld [smem:[%s4099_s0 + %s3416_s15]]  }
  0x3c   :  { %s3636_s27 = sld [smem:[%s4099_s0 + %s3417_s22]]  }
  0x3d   :  { %s3641_s12 = sld [smem:[%s4099_s0 + %s3418_s28]]  }
  0x3e   :  { %80 = vsyncpa [#allocation3], 0 }
  0x3f   :  { %81 = vsyncpa [#allocation6], 0 }
  0x40   :  { %82 = vsyncpa [#allocation9], 0 }
  0x41   :  { %83 = vsyncpa [#allocation12], 0 }
  0x42   :  { %84 = vsyncpa [#allocation15], 0 }
  0x43   :  { %85 = vsyncpa [#allocation18], 0 }
  0x44   :  { %86 = vsyncpa [#allocation21], 0 }
  0x45   :  { %87 = vsyncpa [#allocation24], 0 }
  0x46   :  { %88 = vsyncpa [#allocation27], 0 }
  0x47   :  { %89 = vsyncpa [#allocation30], 0 }
  0x48   :  { %90 = vsyncpa [#allocation33], 0 }
  0x49   :  { %91 = vsyncpa [#allocation36], 0  ;;  %s109_s7 = sshll.u32 %s3461_s9, 4  ;;  %s110_s7 = int_to_ptr.hbm [resolvable:$true] %s109_s7 }
  0x4a   :  { %92 = vsyncpa [#allocation4], 0  ;;  %s3419_s0 = smov [#allocation5]   ;;  %s137_s11 = sshll.u32 %s3486_s29, 4  ;;  %s138_s11 = int_to_ptr.hbm [resolvable:$true] %s137_s11 }
  0x4b   :  { %s111_s10 = sshll.u32 %s3419_s0, 4  ;;  %s2804_s15 = sshra.s32 %s110_s7, 4  ;;  %s112_s10 = int_to_ptr.vmem [resolvable:$true] %s111_s10  ;;  %s2805_s15 = int_to_ptr.hbm [resolvable:$true] %s2804_s15 }
  0x4c   :  { %s2806_s16 = scalar_lea.hbm %s2805_s15, 8  ;;  %s2808_s18 = scalar_lea.hbm %s3461_s9, 8 }
  0x4d   :  { %p2807_p0 = scmp.ne.s32.totalorder %s2805_s15, %s2806_s16  ;;  %p2809_p1 = scmp.lt.s32.totalorder %s2805_s15, %s3461_s9 }
  0x4e   :  { %p2810_p2 = scmp.lt.s32.totalorder %s2808_s18, %s2806_s16 }
  0x50   :  { %p2811_p3 = por %p2810_p2, %p2809_p1 }
  0x52   :  { %p2812_p4 = pnand %p2811_p3, %p2807_p0 }
  0x54   :  { %2815 = shalt.err (!%p2812_p4)
}
  0x55   :  { %114 = dma.hbm_to_vmem [thread:$0]  %s110_s7, 128, %s112_s10, [#allocation6]  }
  0x56   :  { %s3420_s22 = smov [#allocation8]   ;;  %s163_s26 = sshll.u32 %s3506_s19, 4  ;;  %s164_s26 = int_to_ptr.hbm [resolvable:$true] %s163_s26 }
  0x57   :  { %s139_s23 = sshll.u32 %s3420_s22, 4  ;;  %s2828_s28 = sshra.s32 %s138_s11, 4  ;;  %s140_s23 = int_to_ptr.vmem [resolvable:$true] %s139_s23  ;;  %s2829_s28 = int_to_ptr.hbm [resolvable:$true] %s2828_s28 }
  0x58   :  { %s2830_s1 = scalar_lea.hbm %s2829_s28, 1  ;;  %s2832_s2 = scalar_lea.hbm %s3486_s29, 1 }
  0x59   :  { %p2831_p5 = scmp.ne.s32.totalorder %s2829_s28, %s2830_s1  ;;  %p2833_p6 = scmp.lt.s32.totalorder %s2829_s28, %s3486_s29 }
  0x5a   :  { %p2834_p7 = scmp.lt.s32.totalorder %s2832_s2, %s2830_s1 }
  0x5c   :  { %p2835_p8 = por %p2834_p7, %p2833_p6 }
  0x5e   :  { %p2836_p9 = pnand %p2835_p8, %p2831_p5 }
  0x60   :  { %2839 = shalt.err (!%p2836_p9)
}
  0x61   :  { %142 = dma.hbm_to_vmem [thread:$0]  %s138_s11, 16, %s140_s23, [#allocation9]  }
  0x62   :  { %s188_s9 = sshll.u32 %s3521_s6, 4  ;;  %s3421_s7 = smov [#allocation11]   ;;  %s3651_s9 = int_to_ptr.hbm [resolvable:$true] %s188_s9 }
  0x63   :  { %s165_s0 = sshll.u32 %s3421_s7, 4  ;;  %s2852_s10 = sshra.s32 %s164_s26, 4  ;;  %s166_s0 = int_to_ptr.vmem [resolvable:$true] %s165_s0  ;;  %s2853_s10 = int_to_ptr.hbm [resolvable:$true] %s2852_s10 }
  0x64   :  { %s2854_s15 = scalar_lea.hbm %s2853_s10, 1  ;;  %s2856_s16 = scalar_lea.hbm %s3506_s19, 1 }
  0x65   :  { %p2855_p10 = scmp.ne.s32.totalorder %s2853_s10, %s2854_s15  ;;  %p2857_p11 = scmp.lt.s32.totalorder %s2853_s10, %s3506_s19 }
  0x66   :  { %p2858_p12 = scmp.lt.s32.totalorder %s2856_s16, %s2854_s15 }
  0x68   :  { %p2859_p13 = por %p2858_p12, %p2857_p11 }
  0x6a   :  { %p2860_p0 = pnand %p2859_p13, %p2855_p10 }
  0x6c   :  { %2863 = shalt.err (!%p2860_p0)
}
  0x6d   :  { %168 = dma.hbm_to_vmem [thread:$0]  %s164_s26, 16, %s166_s0, [#allocation12]  }
  0x6e   :  { %s3422_s29 = smov [#allocation14]   ;;  %s2876_s18 = sshra.s32 %s3651_s9, 4  ;;  %s2877_s18 = int_to_ptr.hbm [resolvable:$true] %s2876_s18 }
  0x6f   :  { %s190_s11 = sshll.u32 %s3422_s29, 4  ;;  %s2878_s22 = scalar_lea.hbm %s2877_s18, 256  ;;  %s191_s11 = int_to_ptr.vmem [resolvable:$true] %s190_s11 }
  0x70   :  { %p2879_p1 = scmp.ne.s32.totalorder %s2877_s18, %s2878_s22  ;;  %s2880_s23 = scalar_lea.hbm %s3521_s6, 256 }
  0x71   :  { %p2881_p2 = scmp.lt.s32.totalorder %s2877_s18, %s3521_s6  ;;  %p2882_p3 = scmp.lt.s32.totalorder %s2880_s23, %s2878_s22 }
  0x73   :  { %p2883_p4 = por %p2882_p3, %p2881_p2 }
  0x75   :  { %p2884_p5 = pnand %p2883_p4, %p2879_p1 }
  0x77   :  { %2887 = shalt.err (!%p2884_p5)
}
  0x78   :  { %s3423_s19 = smov 512   ;;  %s3424_s26 = smov 32  }
  0x79   :  { %196 = dma.hbm_to_vmem [thread:$0]  %s3651_s9, 4096, %s191_s11, [#allocation15], %s3423_s19, %s3423_s19, %s3424_s26  }
  0x7a   :  { %s212_s28 = sshll.u32 %s3531_s20, 4  ;;  %s3425_s1 = smov [#allocation17]   ;;  %s213_s28 = int_to_ptr.hbm [resolvable:$true] %s212_s28 }
  0x7b   :  { %s214_s2 = sshll.u32 %s3425_s1, 4  ;;  %s2900_s6 = sshra.s32 %s213_s28, 4  ;;  %s215_s2 = int_to_ptr.vmem [resolvable:$true] %s214_s2  ;;  %s2901_s6 = int_to_ptr.hbm [resolvable:$true] %s2900_s6 }
  0x7c   :  { %s2902_s7 = scalar_lea.hbm %s2901_s6, 256  ;;  %s2904_s0 = scalar_lea.hbm %s3531_s20, 256 }
  0x7d   :  { %p2903_p6 = scmp.ne.s32.totalorder %s2901_s6, %s2902_s7  ;;  %p2905_p7 = scmp.lt.s32.totalorder %s2901_s6, %s3531_s20 }
  0x7e   :  { %p2906_p8 = scmp.lt.s32.totalorder %s2904_s0, %s2902_s7 }
  0x80   :  { %p2907_p9 = por %p2906_p8, %p2905_p7 }
  0x82   :  { %p2908_p10 = pnand %p2907_p9, %p2903_p6 }
  0x84   :  { %2911 = shalt.err (!%p2908_p10)
}
  0x85   :  { %220 = dma.hbm_to_vmem [thread:$0]  %s213_s28, 4096, %s215_s2, [#allocation18], %s3423_s19, %s3423_s19, %s3424_s26  }
  0x86   :  { %s236_s9 = sshll.u32 %s3541_s4, 4  ;;  %s3426_s10 = smov [#allocation20]   ;;  %s237_s9 = int_to_ptr.hbm [resolvable:$true] %s236_s9 }
  0x87   :  { %s238_s15 = sshll.u32 %s3426_s10, 4  ;;  %s265_s16 = sshll.u32 %s3556_s14, 4  ;;  %s239_s15 = int_to_ptr.vmem [resolvable:$true] %s238_s15  ;;  %s3670_s16 = int_to_ptr.hbm [resolvable:$true] %s265_s16 }
  0x88   :  { %s2924_s20 = sshra.s32 %s237_s9, 4  ;;  %s2928_s11 = scalar_lea.hbm %s3541_s4, 512  ;;  %s2925_s20 = int_to_ptr.hbm [resolvable:$true] %s2924_s20 }
  0x89   :  { %s2926_s29 = scalar_lea.hbm %s2925_s20, 512  ;;  %p2929_p12 = scmp.lt.s32.totalorder %s2925_s20, %s3541_s4 }
  0x8a   :  { %p2927_p11 = scmp.ne.s32.totalorder %s2925_s20, %s2926_s29  ;;  %p2930_p13 = scmp.lt.s32.totalorder %s2928_s11, %s2926_s29 }
  0x8c   :  { %p2931_p0 = por %p2930_p13, %p2929_p12 }
  0x8e   :  { %p2932_p1 = pnand %p2931_p0, %p2927_p11 }
  0x90   :  { %2935 = shalt.err (!%p2932_p1)
}
  0x91   :  { %s3427_s18 = smov 1024   ;;  %s3428_s22 = smov 64  }
  0x92   :  { %244 = dma.hbm_to_vmem [thread:$0]  %s237_s9, 8192, %s239_s15, [#allocation21], %s3427_s18, %s3427_s18, %s3428_s22  }
  0x93   :  { %s289_s23 = sshll.u32 %s3566_s30, 4  ;;  %s3429_s28 = smov [#allocation23]   ;;  %s290_s23 = int_to_ptr.hbm [resolvable:$true] %s289_s23 }
  0x94   :  { %s267_s1 = sshll.u32 %s3429_s28, 4  ;;  %s2948_s4 = sshra.s32 %s3670_s16, 4  ;;  %s268_s1 = int_to_ptr.vmem [resolvable:$true] %s267_s1  ;;  %s2949_s4 = int_to_ptr.hbm [resolvable:$true] %s2948_s4 }
  0x95   :  { %s2950_s2 = scalar_lea.hbm %s2949_s4, 4  ;;  %s2952_s6 = scalar_lea.hbm %s3556_s14, 4 }
  0x96   :  { %p2951_p2 = scmp.ne.s32.totalorder %s2949_s4, %s2950_s2  ;;  %p2953_p3 = scmp.lt.s32.totalorder %s2949_s4, %s3556_s14 }
  0x97   :  { %p2954_p4 = scmp.lt.s32.totalorder %s2952_s6, %s2950_s2 }
  0x99   :  { %p2955_p5 = por %p2954_p4, %p2953_p3 }
  0x9b   :  { %p2956_p6 = pnand %p2955_p5, %p2951_p2 }
  0x9d   :  { %2959 = shalt.err (!%p2956_p6)
}
  0x9e   :  { %270 = dma.hbm_to_vmem [thread:$0]  %s3670_s16, 64, %s268_s1, [#allocation24]  }
  0x9f   :  { %s3430_s7 = smov [#allocation26]   ;;  %s313_s9 = sshll.u32 %s3576_s17, 4  ;;  %s314_s9 = int_to_ptr.hbm [resolvable:$true] %s313_s9 }
  0xa0   :  { %s291_s0 = sshll.u32 %s3430_s7, 4  ;;  %s2972_s10 = sshra.s32 %s290_s23, 4  ;;  %s292_s0 = int_to_ptr.vmem [resolvable:$true] %s291_s0  ;;  %s2973_s10 = int_to_ptr.hbm [resolvable:$true] %s2972_s10 }
  0xa1   :  { %s2974_s15 = scalar_lea.hbm %s2973_s10, 4  ;;  %s2976_s20 = scalar_lea.hbm %s3566_s30, 4 }
  0xa2   :  { %p2975_p7 = scmp.ne.s32.totalorder %s2973_s10, %s2974_s15  ;;  %p2977_p8 = scmp.lt.s32.totalorder %s2973_s10, %s3566_s30 }
  0xa3   :  { %p2978_p9 = scmp.lt.s32.totalorder %s2976_s20, %s2974_s15 }
  0xa5   :  { %p2979_p10 = por %p2978_p9, %p2977_p8 }
  0xa7   :  { %p2980_p11 = pnand %p2979_p10, %p2975_p7 }
  0xa9   :  { %2983 = shalt.err (!%p2980_p11)
}
  0xaa   :  { %294 = dma.hbm_to_vmem [thread:$0]  %s290_s23, 64, %s292_s0, [#allocation27]  }
  0xab   :  { %s340_s14 = sshll.u32 %s3601_s3, 4  ;;  %s3431_s16 = smov [#allocation29]   ;;  %s3686_s14 = int_to_ptr.hbm [resolvable:$true] %s340_s14 }
  0xac   :  { %s315_s29 = sshll.u32 %s3431_s16, 4  ;;  %s2996_s11 = sshra.s32 %s314_s9, 4  ;;  %s316_s29 = int_to_ptr.vmem [resolvable:$true] %s315_s29  ;;  %s2997_s11 = int_to_ptr.hbm [resolvable:$true] %s2996_s11 }
  0xad   :  { %s2998_s28 = scalar_lea.hbm %s2997_s11, 8  ;;  %s3000_s1 = scalar_lea.hbm %s3576_s17, 8 }
  0xae   :  { %p2999_p12 = scmp.ne.s32.totalorder %s2997_s11, %s2998_s28  ;;  %p3001_p13 = scmp.lt.s32.totalorder %s2997_s11, %s3576_s17 }
  0xaf   :  { %p3002_p0 = scmp.lt.s32.totalorder %s3000_s1, %s2998_s28 }
  0xb1   :  { %p3003_p1 = por %p3002_p0, %p3001_p13 }
  0xb3   :  { %p3004_p2 = pnand %p3003_p1, %p2999_p12 }
  0xb5   :  { %3007 = shalt.err (!%p3004_p2)
}
  0xb6   :  { %318 = dma.hbm_to_vmem [thread:$0]  %s314_s9, 128, %s316_s29, [#allocation30]  }
  0xb7   :  { %s3432_s30 = smov [#allocation32]   ;;  %s98_s4 = sshll.u32 %s3456_s5, 4  ;;  %s99_s4 = int_to_ptr.hbm [resolvable:$true] %s98_s4 }
  0xb8   :  { %s342_s23 = sshll.u32 %s3432_s30, 4  ;;  %s3020_s2 = sshra.s32 %s3686_s14, 4  ;;  %s343_s23 = int_to_ptr.vmem [resolvable:$true] %s342_s23  ;;  %s3021_s2 = int_to_ptr.hbm [resolvable:$true] %s3020_s2 }
  0xb9   :  { %s3022_s6 = scalar_lea.hbm %s3021_s2, 128  ;;  %s3024_s7 = scalar_lea.hbm %s3601_s3, 128 }
  0xba   :  { %p3023_p3 = scmp.ne.s32.totalorder %s3021_s2, %s3022_s6  ;;  %p3025_p4 = scmp.lt.s32.totalorder %s3021_s2, %s3601_s3 }
  0xbb   :  { %p3026_p5 = scmp.lt.s32.totalorder %s3024_s7, %s3022_s6 }
  0xbd   :  { %p3027_p6 = por %p3026_p5, %p3025_p4 }
  0xbf   :  { %p3028_p7 = pnand %p3027_p6, %p3023_p3 }
  0xc1   :  { %3031 = shalt.err (!%p3028_p7)
}
  0xc2   :  { %348 = dma.hbm_to_vmem [thread:$0]  %s3686_s14, 2048, %s343_s23, [#allocation33], %s3427_s18, %s3427_s18, %s3428_s22  }
  0xc3   :  { %s124_s17 = sshll.u32 %s3476_s21, 4  ;;  %s3433_s0 = smov [#allocation2]   ;;  %s125_s17 = int_to_ptr.hbm [resolvable:$true] %s124_s17 }
  0xc4   :  { %s100_s9 = sshll.u32 %s3433_s0, 4  ;;  %s3044_s10 = sshra.s32 %s99_s4, 4  ;;  %s101_s9 = int_to_ptr.vmem [resolvable:$true] %s100_s9  ;;  %s3045_s10 = int_to_ptr.hbm [resolvable:$true] %s3044_s10 }
  0xc5   :  { %s3046_s3 = scalar_lea.hbm %s3045_s10, 8  ;;  %s3048_s15 = scalar_lea.hbm %s3456_s5, 8 }
  0xc6   :  { %p3047_p8 = scmp.ne.s32.totalorder %s3045_s10, %s3046_s3  ;;  %p3049_p9 = scmp.lt.s32.totalorder %s3045_s10, %s3456_s5 }
  0xc7   :  { %p3050_p10 = scmp.lt.s32.totalorder %s3048_s15, %s3046_s3 }
  0xc9   :  { %p3051_p11 = por %p3050_p10, %p3049_p9 }
  0xcb   :  { %p3052_p12 = pnand %p3051_p11, %p3047_p8 }
  0xcd   :  { %3055 = shalt.err (!%p3052_p12)
}
  0xce   :  { %103 = dma.hbm_to_vmem [thread:$0]  %s99_s4, 128, %s101_s9, [#allocation3]  }
  0xcf   :  { %s3434_s20 = smov [#allocation7]   ;;  %s150_s16 = sshll.u32 %s3496_s8, 4  ;;  %s151_s16 = int_to_ptr.hbm [resolvable:$true] %s150_s16 }
  0xd0   :  { %s126_s14 = sshll.u32 %s3434_s20, 4  ;;  %s3068_s29 = sshra.s32 %s125_s17, 4  ;;  %s127_s14 = int_to_ptr.vmem [resolvable:$true] %s126_s14  ;;  %s3069_s29 = int_to_ptr.hbm [resolvable:$true] %s3068_s29 }
  0xd1   :  { %s3070_s11 = scalar_lea.hbm %s3069_s29, 1  ;;  %s3072_s28 = scalar_lea.hbm %s3476_s21, 1 }
  0xd2   :  { %p3071_p13 = scmp.ne.s32.totalorder %s3069_s29, %s3070_s11  ;;  %p3073_p0 = scmp.lt.s32.totalorder %s3069_s29, %s3476_s21 }
  0xd3   :  { %p3074_p1 = scmp.lt.s32.totalorder %s3072_s28, %s3070_s11 }
  0xd5   :  { %p3075_p2 = por %p3074_p1, %p3073_p0 }
  0xd7   :  { %p3076_p3 = pnand %p3075_p2, %p3071_p13 }
  0xd9   :  { %3079 = shalt.err (!%p3076_p3)
}
  0xda   :  { %129 = dma.hbm_to_vmem [thread:$0]  %s125_s17, 16, %s127_s14, [#allocation6]  }
  0xdb   :  { %s173_s5 = sshll.u32 %s3511_s24, 4  ;;  %s3435_s1 = smov [#allocation10]   ;;  %s3705_s5 = int_to_ptr.hbm [resolvable:$true] %s173_s5 }
  0xdc   :  { %s152_s30 = sshll.u32 %s3435_s1, 4  ;;  %s3092_s23 = sshra.s32 %s151_s16, 4  ;;  %s153_s30 = int_to_ptr.vmem [resolvable:$true] %s152_s30  ;;  %s3093_s23 = int_to_ptr.hbm [resolvable:$true] %s3092_s23 }
  0xdd   :  { %s3094_s4 = scalar_lea.hbm %s3093_s23, 1  ;;  %s3096_s2 = scalar_lea.hbm %s3496_s8, 1 }
  0xde   :  { %p3095_p4 = scmp.ne.s32.totalorder %s3093_s23, %s3094_s4  ;;  %p3097_p5 = scmp.lt.s32.totalorder %s3093_s23, %s3496_s8 }
  0xdf   :  { %p3098_p6 = scmp.lt.s32.totalorder %s3096_s2, %s3094_s4 }
  0xe1   :  { %p3099_p7 = por %p3098_p6, %p3097_p5 }
  0xe3   :  { %p3100_p8 = pnand %p3099_p7, %p3095_p4 }
  0xe5   :  { %3103 = shalt.err (!%p3100_p8)
}
  0xe6   :  { %155 = dma.hbm_to_vmem [thread:$0]  %s151_s16, 16, %s153_s30, [#allocation9]  }
  0xe7   :  { %s4135_s21 = sld [smem:[#allocation57_spill]]  ;;  %s3436_s6 = smov [#allocation13]  }
  0xe8   :  { %s175_s7 = sshll.u32 %s3436_s6, 4  ;;  %s3116_s0 = sshra.s32 %s3705_s5, 4  ;;  %s176_s7 = int_to_ptr.vmem [resolvable:$true] %s175_s7  ;;  %s3117_s0 = int_to_ptr.hbm [resolvable:$true] %s3116_s0 }
  0xe9   :  { %s3118_s9 = scalar_lea.hbm %s3117_s0, 256  ;;  %s3120_s10 = scalar_lea.hbm %s3511_s24, 256 }
  0xea   :  { %p3119_p9 = scmp.ne.s32.totalorder %s3117_s0, %s3118_s9  ;;  %p3121_p10 = scmp.lt.s32.totalorder %s3117_s0, %s3511_s24 }
  0xeb   :  { %p3122_p11 = scmp.lt.s32.totalorder %s3120_s10, %s3118_s9 }
  0xed   :  { %s202_s17 = sshll.u32 %s4135_s21, 4  ;;  %p3123_p12 = por %p3122_p11, %p3121_p10  ;;  %s203_s17 = int_to_ptr.hbm [resolvable:$true] %s202_s17 }
  0xef   :  { %p3124_p13 = pnand %p3123_p12, %p3119_p9 }
  0xf1   :  { %3127 = shalt.err (!%p3124_p13)
}
  0xf2   :  { %s4136_s8 = sld [smem:[#allocation58_spill]]  ;;  %s3437_s15 = smov [#allocation16]  }
  0xf3   :  { %181 = dma.hbm_to_vmem [thread:$0]  %s3705_s5, 4096, %s176_s7, [#allocation12], %s3427_s18, %s3427_s18, %s3428_s22  }
  0xf4   :  { %s204_s20 = sshll.u32 %s3437_s15, 4  ;;  %s3140_s14 = sshra.s32 %s203_s17, 4  ;;  %s205_s20 = int_to_ptr.vmem [resolvable:$true] %s204_s20  ;;  %s3141_s14 = int_to_ptr.hbm [resolvable:$true] %s3140_s14 }
  0xf5   :  { %s3142_s24 = scalar_lea.hbm %s3141_s14, 4  ;;  %s3144_s16 = scalar_lea.hbm %s4135_s21, 4 }
  0xf6   :  { %p3143_p0 = scmp.ne.s32.totalorder %s3141_s14, %s3142_s24  ;;  %p3145_p1 = scmp.lt.s32.totalorder %s3141_s14, %s4135_s21 }
  0xf7   :  { %p3146_p2 = scmp.lt.s32.totalorder %s3144_s16, %s3142_s24 }
  0xf8   :  { %s226_s3 = sshll.u32 %s4136_s8, 4  ;;  %s227_s3 = int_to_ptr.hbm [resolvable:$true] %s226_s3 }
  0xf9   :  { %p3147_p3 = por %p3146_p2, %p3145_p1 }
  0xfb   :  { %p3148_p4 = pnand %p3147_p3, %p3143_p0 }
  0xfd   :  { %3151 = shalt.err (!%p3148_p4)
}
  0xfe   :  { %207 = dma.hbm_to_vmem [thread:$0]  %s203_s17, 64, %s205_s20, [#allocation15]  }
  0xff   :  { %s4137_s29 = sld [smem:[#allocation60_spill]]  ;;  %s3438_s11 = smov [#allocation19]  }
 0x100   :  { %s228_s28 = sshll.u32 %s3438_s11, 4  ;;  %s3164_s1 = sshra.s32 %s227_s3, 4  ;;  %s229_s28 = int_to_ptr.vmem [resolvable:$true] %s228_s28  ;;  %s3165_s1 = int_to_ptr.hbm [resolvable:$true] %s3164_s1 }
 0x101   :  { %s3166_s30 = scalar_lea.hbm %s3165_s1, 4  ;;  %s3168_s23 = scalar_lea.hbm %s4136_s8, 4 }
 0x102   :  { %p3167_p5 = scmp.ne.s32.totalorder %s3165_s1, %s3166_s30  ;;  %p3169_p6 = scmp.lt.s32.totalorder %s3165_s1, %s4136_s8 }
 0x103   :  { %p3170_p7 = scmp.lt.s32.totalorder %s3168_s23, %s3166_s30 }
 0x105   :  { %s251_s5 = sshll.u32 %s4137_s29, 4  ;;  %p3171_p8 = por %p3170_p7, %p3169_p6  ;;  %s3721_s5 = int_to_ptr.hbm [resolvable:$true] %s251_s5 }
 0x107   :  { %p3172_p9 = pnand %p3171_p8, %p3167_p5 }
 0x109   :  { %3175 = shalt.err (!%p3172_p9)
}
 0x10a   :  { %231 = dma.hbm_to_vmem [thread:$0]  %s227_s3, 64, %s229_s28, [#allocation18]  }
 0x10b   :  { %s4138_s4 = sld [smem:[#allocation61_spill]]  ;;  %s3439_s21 = smov [#allocation22]  }
 0x10c   :  { %s253_s6 = sshll.u32 %s3439_s21, 4  ;;  %s3188_s7 = sshra.s32 %s3721_s5, 4  ;;  %s254_s6 = int_to_ptr.vmem [resolvable:$true] %s253_s6  ;;  %s3189_s7 = int_to_ptr.hbm [resolvable:$true] %s3188_s7 }
 0x10d   :  { %s3190_s17 = scalar_lea.hbm %s3189_s7, 256  ;;  %s3192_s0 = scalar_lea.hbm %s4137_s29, 256 }
 0x10e   :  { %p3191_p10 = scmp.ne.s32.totalorder %s3189_s7, %s3190_s17  ;;  %p3193_p11 = scmp.lt.s32.totalorder %s3189_s7, %s4137_s29 }
 0x10f   :  { %p3194_p12 = scmp.lt.s32.totalorder %s3192_s0, %s3190_s17 }
 0x111   :  { %s275_s2 = sshll.u32 %s4138_s4, 4  ;;  %p3195_p13 = por %p3194_p12, %p3193_p11  ;;  %s3726_s2 = int_to_ptr.hbm [resolvable:$true] %s275_s2 }
 0x113   :  { %p3196_p0 = pnand %p3195_p13, %p3191_p10 }
 0x115   :  { %3199 = shalt.err (!%p3196_p0)
}
 0x116   :  { %s4139_s9 = sld [smem:[#allocation62_spill]]  ;;  %s3440_s10 = smov [#allocation25]  }
 0x117   :  { %259 = dma.hbm_to_vmem [thread:$0]  %s3721_s5, 4096, %s254_s6, [#allocation21], %s3423_s19, %s3423_s19, %s3424_s26  }
 0x118   :  { %s277_s8 = sshll.u32 %s3440_s10, 4  ;;  %s3212_s15 = sshra.s32 %s3726_s2, 4  ;;  %s278_s8 = int_to_ptr.vmem [resolvable:$true] %s277_s8  ;;  %s3213_s15 = int_to_ptr.hbm [resolvable:$true] %s3212_s15 }
 0x119   :  { %s3214_s20 = scalar_lea.hbm %s3213_s15, 256  ;;  %s3216_s14 = scalar_lea.hbm %s4138_s4, 256 }
 0x11a   :  { %p3215_p1 = scmp.ne.s32.totalorder %s3213_s15, %s3214_s20  ;;  %p3217_p2 = scmp.lt.s32.totalorder %s3213_s15, %s4138_s4 }
 0x11b   :  { %p3218_p3 = scmp.lt.s32.totalorder %s3216_s14, %s3214_s20 }
 0x11c   :  { %s299_s3 = sshll.u32 %s4139_s9, 4  ;;  %s3736_s3 = int_to_ptr.hbm [resolvable:$true] %s299_s3 }
 0x11d   :  { %p3219_p4 = por %p3218_p3, %p3217_p2 }
 0x11f   :  { %p3220_p5 = pnand %p3219_p4, %p3215_p1 }
 0x121   :  { %3223 = shalt.err (!%p3220_p5)
}
 0x122   :  { %s4140_s24 = sld [smem:[#allocation66_spill]]  ;;  %s3441_s29 = smov [#allocation28]  }
 0x123   :  { %283 = dma.hbm_to_vmem [thread:$0]  %s3726_s2, 4096, %s278_s8, [#allocation24], %s3423_s19, %s3423_s19, %s3424_s26  }
 0x124   :  { %s301_s11 = sshll.u32 %s3441_s29, 4  ;;  %s3236_s28 = sshra.s32 %s3736_s3, 4  ;;  %s302_s11 = int_to_ptr.vmem [resolvable:$true] %s301_s11  ;;  %s3237_s28 = int_to_ptr.hbm [resolvable:$true] %s3236_s28 }
 0x125   :  { %s3238_s5 = scalar_lea.hbm %s3237_s28, 512  ;;  %s3240_s1 = scalar_lea.hbm %s4139_s9, 512 }
 0x126   :  { %p3239_p6 = scmp.ne.s32.totalorder %s3237_s28, %s3238_s5  ;;  %p3241_p7 = scmp.lt.s32.totalorder %s3237_s28, %s4139_s9 }
 0x127   :  { %p3242_p8 = scmp.lt.s32.totalorder %s3240_s1, %s3238_s5 }
 0x128   :  { %s330_s16 = sshll.u32 %s4140_s24, 4  ;;  %s331_s16 = int_to_ptr.hbm [resolvable:$true] %s330_s16 }
 0x129   :  { %p3243_p9 = por %p3242_p8, %p3241_p7 }
 0x12b   :  { %p3244_p10 = pnand %p3243_p9, %p3239_p6 }
 0x12d   :  { %3247 = shalt.err (!%p3244_p10)
}
 0x12e   :  { %307 = dma.hbm_to_vmem [thread:$0]  %s3736_s3, 8192, %s302_s11, [#allocation27], %s3427_s18, %s3427_s18, %s3428_s22  }
 0x12f   :  { %s3442_s19 = smov [#allocation31]   ;;  %s362_s30 = sshll.u32 %s3626_s13, 4  ;;  %s363_s30 = int_to_ptr.hbm [resolvable:$true] %s362_s30 }
 0x130   :  { %s332_s26 = sshll.u32 %s3442_s19, 4  ;;  %s3260_s23 = sshra.s32 %s331_s16, 4  ;;  %s333_s26 = int_to_ptr.vmem [resolvable:$true] %s332_s26  ;;  %s3261_s23 = int_to_ptr.hbm [resolvable:$true] %s3260_s23 }
 0x131   :  { %s3262_s4 = scalar_lea.hbm %s3261_s23, 1  ;;  %s3264_s2 = scalar_lea.hbm %s4140_s24, 1 }
 0x132   :  { %p3263_p11 = scmp.ne.s32.totalorder %s3261_s23, %s3262_s4  ;;  %p3265_p12 = scmp.lt.s32.totalorder %s3261_s23, %s4140_s24 }
 0x133   :  { %p3266_p13 = scmp.lt.s32.totalorder %s3264_s2, %s3262_s4 }
 0x135   :  { %p3267_p0 = por %p3266_p13, %p3265_p12 }
 0x137   :  { %p3268_p1 = pnand %p3267_p0, %p3263_p11 }
 0x139   :  { %3271 = shalt.err (!%p3268_p1)
}
 0x13a   :  { %335 = dma.hbm_to_vmem [thread:$0]  %s331_s16, 16, %s333_s26, [#allocation30]  }
 0x13b   :  { %s372_s21 = sshll.u32 %s3631_s25, 4  ;;  %s3443_s6 = smov [#allocation34]   ;;  %s3757_s21 = int_to_ptr.hbm [resolvable:$true] %s372_s21 }
 0x13c   :  { %s364_s7 = sshll.u32 %s3443_s6, 4  ;;  %s3284_s17 = sshra.s32 %s363_s30, 4  ;;  %s365_s7 = int_to_ptr.vmem [resolvable:$true] %s364_s7  ;;  %s3285_s17 = int_to_ptr.hbm [resolvable:$true] %s3284_s17 }
 0x13d   :  { %s3286_s0 = scalar_lea.hbm %s3285_s17, 1  ;;  %s3288_s9 = scalar_lea.hbm %s3626_s13, 1 }
 0x13e   :  { %p3287_p2 = scmp.ne.s32.totalorder %s3285_s17, %s3286_s0  ;;  %p3289_p3 = scmp.lt.s32.totalorder %s3285_s17, %s3626_s13 }
 0x13f   :  { %p3290_p4 = scmp.lt.s32.totalorder %s3288_s9, %s3286_s0 }
 0x141   :  { %p3291_p5 = por %p3290_p4, %p3289_p3 }
 0x143   :  { %p3292_p6 = pnand %p3291_p5, %p3287_p2 }
 0x145   :  { %3295 = shalt.err (!%p3292_p6)
}
 0x146   :  { %367 = dma.hbm_to_vmem [thread:$0]  %s363_s30, 16, %s365_s7, [#allocation33]  }
 0x147   :  { %s3444_s10 = smov [#allocation35]   ;;  %s3308_s3 = sshra.s32 %s3757_s21, 4  ;;  %s3309_s3 = int_to_ptr.hbm [resolvable:$true] %s3308_s3 }
 0x148   :  { %s374_s8 = sshll.u32 %s3444_s10, 4  ;;  %s3310_s15 = scalar_lea.hbm %s3309_s3, 128  ;;  %s375_s8 = int_to_ptr.vmem [resolvable:$true] %s374_s8 }
 0x149   :  { %p3311_p7 = scmp.ne.s32.totalorder %s3309_s3, %s3310_s15  ;;  %s3312_s20 = scalar_lea.hbm %s3631_s25, 128 }
 0x14a   :  { %p3313_p8 = scmp.lt.s32.totalorder %s3309_s3, %s3631_s25  ;;  %p3314_p9 = scmp.lt.s32.totalorder %s3312_s20, %s3310_s15 }
 0x14c   :  { %p3315_p10 = por %p3314_p9, %p3313_p8 }
 0x14e   :  { %p3316_p11 = pnand %p3315_p10, %p3311_p7 }
 0x150   :  { %3319 = shalt.err (!%p3316_p11)
}
 0x151   :  { %380 = dma.hbm_to_vmem [thread:$0]  %s3757_s21, 2048, %s375_s8, [#allocation36], %s3427_s18, %s3427_s18, %s3428_s22  }
 0x152   :  { %3356 = dma.done.wait [#allocation3], 128  }
 0x153   :  { %3357 = vsyncadd [#allocation3], 4294967168 }
 0x154   :  { %3358 = dma.done.wait [#allocation6], 144  }
 0x155   :  { %3359 = vsyncadd [#allocation6], 4294967152 }
 0x156   :  { %3360 = dma.done.wait [#allocation9], 32  }
 0x157   :  { %3361 = vsyncadd [#allocation9], 4294967264 }
 0x158   :  { %3362 = dma.done.wait [#allocation12], 4112  }
 0x159   :  { %3363 = vsyncadd [#allocation12], 4294963184 }
 0x15a   :  { %3364 = dma.done.wait [#allocation15], 4160  }
 0x15b   :  { %3365 = vsyncadd [#allocation15], 4294963136 }
 0x15c   :  { %3366 = dma.done.wait [#allocation18], 4160  }
 0x15d   :  { %3367 = vsyncadd [#allocation18], 4294963136 }
 0x15e   :  { %3368 = dma.done.wait [#allocation21], 12288  }
 0x15f   :  { %3369 = vsyncadd [#allocation21], 4294955008 }
 0x160   :  { %3370 = dma.done.wait [#allocation24], 4160  }
 0x161   :  { %3371 = vsyncadd [#allocation24], 4294963136 }
 0x162   :  { %3372 = dma.done.wait [#allocation27], 8256  }
 0x163   :  { %3373 = vsyncadd [#allocation27], 4294959040 }
 0x164   :  { %3374 = dma.done.wait [#allocation30], 144  }
 0x165   :  { %3375 = vsyncadd [#allocation30], 4294967152 }
 0x166   :  { %3376 = dma.done.wait [#allocation33], 2064  }
 0x167   :  { %3377 = vsyncadd [#allocation33], 4294965232 }
 0x168   :  { %3378 = dma.done.wait [#allocation36], 2048  }
 0x169   :  { %3379 = vsyncadd [#allocation36], 4294965248  ;;  %s4141_s13 = sld [smem:[#allocation52_spill]]  ;;  %v471_v8 = vld [vmem:[#allocation2] sm:$0xff]  ;;  %vm484_vm0 = vcmask 523264   ;;  %vm518_vm1 = vcmask 261120  }
 0x16a   :  { %s4142_s25 = sld [smem:[#allocation53_spill]]  ;;  %v2793_v17 = vld [vmem:[#allocation7] ss:$0 sm:$0xff]  ;;  %v2794_v24 = vld [vmem:[#allocation8] ss:$0 sm:$0xff]  ;;  %vm576_vm2 = vcmask 130048  }
 0x16b   :  { %s4143_s18 = sld [smem:[#allocation54_spill]]  ;;  %v2795_v27 = vld [vmem:[#allocation10] ss:$0 sm:$0xff]  ;;  %s3445_s14 = smov 16   ;;  %v627_v30 = vld [vmem:[#allocation13 + $0xc8] sm:$0xff]  ;;  %v626_v31 = vld [vmem:[#allocation13 + $0xc0] sm:$0xff] }
 0x16c   :  { %s4144_s22 = sld [smem:[#allocation55_spill]]  ;;  %v619_v32 = vld [vmem:[#allocation13 + $0x88] sm:$0xff]  ;;  %v618_v33 = vld [vmem:[#allocation13 + $0x80] sm:$0xff]  ;;  %v628_v36 = vld [vmem:[#allocation13 + $0xd0] sm:$0xff]  ;;  %vm2576_vm3 = vcmask 261248   ;;  %vm824_vm4 = vcmask 72704  }
 0x16d   :  { %v611_v34 = vld [vmem:[#allocation13 + $0x48] sm:$0xff]  ;;  %v610_v35 = vld [vmem:[#allocation13 + $0x40] sm:$0xff]  ;;  %v620_v42 = vld [vmem:[#allocation13 + $0x90] sm:$0xff]  ;;  %s4145_s24 = sld [smem:[#allocation51_spill]]  ;;  %vm1947_vm6 = vcmask 1041409   ;;  %vm1949_vm7 = vcmask 1042434  }
 0x16e   :  { %v603_v37 = vld [vmem:[#allocation13 + $0x8] sm:$0xff]  ;;  %v602_v39 = vld [vmem:[#allocation13] sm:$0xff]  ;;  %v629_v43 = vld [vmem:[#allocation13 + $0xd8] sm:$0xff]  ;;  %vm1951_vm8 = vcmask 1043459   ;;  %vm1953_vm9 = vcmask 1044484   ;;  %s4146_s16 = sld [smem:[#allocation63_spill]] }
 0x16f   :  { %v479_v0 = vld [vmem:[%s4141_s13 + $0x38] sm:$0xff]  ;;  %v478_v1 = vld [vmem:[%s4141_s13 + $0x30] sm:$0xff]  ;;  %v477_v2 = vld [vmem:[%s4141_s13 + $0x28] sm:$0xff]  ;;  %s4147_s29 = sld [smem:[#allocation65_spill]]  ;;  %vm1955_vm10 = vcmask 1045509   ;;  %vm1963_vm11 = vcmask 1040384  }
 0x170   :  { %496 = vmatpush.msra.mxu0 %v479_v0  ;;  %v476_v3 = vld [vmem:[%s4141_s13 + $0x20] sm:$0xff]  ;;  %v475_v4 = vld [vmem:[%s4141_s13 + $0x18] sm:$0xff]  ;;  %v474_v5 = vld [vmem:[%s4141_s13 + $0x10] sm:$0xff]  ;;  %vm1957_vm12 = vcmask 1046534   ;;  %vm1959_vm13 = vcmask 1047559   ;;  %s4148_s11 = sld [smem:[#allocation68_spill]] }
 0x171   :  { %v473_v6 = vld [vmem:[%s4141_s13 + $0x8] sm:$0xff]  ;;  %v472_v7 = vld [vmem:[%s4141_s13] sm:$0xff]  ;;  %v513_v9 = vld [vmem:[%s4142_s25 + $0x18] sm:$0xff]  ;;  %s4149_s28 = sld [smem:[#allocation70_spill]]  ;;  %s2585_s4 = sshll.u32 %s3641_s12, 4  ;;  %s2586_s4 = int_to_ptr.hbm [resolvable:$true] %s2585_s4 }
 0x172   :  { %497 = vmatpush.msra.mxu0 %v478_v1  ;;  %v545_v10 = vld [vmem:[%s4143_s18 + $0x18] sm:$0xff]  ;;  %534 = vmatpush.msra.mxu1 %v513_v9  ;;  %v512_v11 = vld [vmem:[%s4142_s25 + $0x10] sm:$0xff]  ;;  %v511_v13 = vld [vmem:[%s4142_s25 + $0x8] sm:$0xff]  ;;  %s4150_s5 = sld [smem:[#allocation64_spill]]  ;;  %s3344_s2 = sshra.s32 %s2586_s4, 4  ;;  %s3345_s2 = int_to_ptr.hbm [resolvable:$true] %s3344_s2 }
 0x173   :  { %562 = vmatpush.msra.mxu2 %v545_v10  ;;  %v544_v12 = vld [vmem:[%s4143_s18 + $0x10] sm:$0xff]  ;;  %v543_v14 = vld [vmem:[%s4143_s18 + $0x8] sm:$0xff]  ;;  %v510_v15 = vld [vmem:[%s4142_s25] sm:$0xff]  ;;  %s4151_s1 = sld [smem:[#allocation56_spill]]  ;;  %s3346_s21 = scalar_lea.hbm %s3345_s2, 72 }
 0x174   :  { %498 = vmatpush.msra.mxu0 %v477_v2  ;;  %535 = vmatpush.msra.mxu1 %v512_v11  ;;  %v542_v16 = vld [vmem:[%s4143_s18] sm:$0xff]  ;;  %v571_v22 = vld [vmem:[%s4144_s22 + $0x8] sm:$0xff]  ;;  %v630_v40 = vld [vmem:[#allocation13 + $0xe0] sm:$0xff]  ;;  %s4152_s19 = sld [smem:[#allocation59_spill]]  ;;  %p3347_p12 = scmp.ne.s32.totalorder %s3345_s2, %s3346_s21 }
 0x175   :  { %563 = vmatpush.msra.mxu2 %v544_v12  ;;  %594 = vmatpush.msra.mxu3 %v571_v22  ;;  %v570_v23 = vld [vmem:[%s4144_s22] sm:$0xff]  ;;  %v622_v44 = vld [vmem:[#allocation13 + $0xa0] sm:$0xff]  ;;  %v612_v46 = vld [vmem:[#allocation13 + $0x50] sm:$0xff]  ;;  %s4153_s26 = sld [smem:[#allocation69_spill]]  ;;  %s3348_s6 = scalar_lea.hbm %s3641_s12, 72 }
 0x176   :  { %499 = vmatpush.msra.mxu0 %v476_v3  ;;  %536 = vmatpush.msra.mxu1 %v511_v13  ;;  %v631_v41 = vld [vmem:[#allocation13 + $0xe8] sm:$0xff]  ;;  %v621_v47 = vld [vmem:[#allocation13 + $0x98] sm:$0xff]  ;;  %v614_v48 = vld [vmem:[#allocation13 + $0x60] sm:$0xff]  ;;  %s4154_s30 = sld [smem:[#allocation67_spill]]  ;;  %p3349_p13 = scmp.lt.s32.totalorder %s3345_s2, %s3641_s12 }
 0x177   :  { %564 = vmatpush.msra.mxu2 %v543_v14  ;;  %595 = vmatpush.msra.mxu3 %v570_v23  ;;  %v623_v45 = vld [vmem:[#allocation13 + $0xa8] sm:$0xff]  ;;  %v604_v50 = vld [vmem:[#allocation13 + $0x10] sm:$0xff]  ;;  %v613_v51 = vld [vmem:[#allocation13 + $0x58] sm:$0xff]  ;;  %p3350_p0 = scmp.lt.s32.totalorder %s3348_s6, %s3346_s21 }
 0x178   :  { %500 = vmatpush.msra.mxu0 %v475_v4  ;;  %537 = vmatpush.msra.mxu1 %v510_v15  ;;  %v615_v49 = vld [vmem:[#allocation13 + $0x68] sm:$0xff]  ;;  %v606_v52 = vld [vmem:[#allocation13 + $0x20] sm:$0xff]  ;;  %v632_v54 = vld [vmem:[#allocation13 + $0xf0] sm:$0xff] }
 0x179   :  { %565 = vmatpush.msra.mxu2 %v542_v16  ;;  %667 = vmatpush.msrb.mxu3 %v626_v31  ;;  %v607_v53 = vld [vmem:[#allocation13 + $0x28] sm:$0xff]  ;;  %v605_v55 = vld [vmem:[#allocation13 + $0x18] sm:$0xff]  ;;  %v924_v56 = vld [vmem:[#allocation14 + $0xe0] sm:$0xff]  ;;  %p3351_p1 = por %p3350_p0, %p3349_p13 }
 0x17a   :  { %501 = vmatpush.msra.mxu0 %v474_v5  ;;  %687 = vmatpush.msrb.mxu1 %v627_v30  ;;  %v624_v57 = vld [vmem:[#allocation13 + $0xb0] sm:$0xff]  ;;  %v920_v58 = vld [vmem:[#allocation14 + $0xc0] sm:$0xff]  ;;  %v2796_v3 = vld [vmem:[#allocation11] ss:$0 sm:$0xff] }
 0x17b   :  { %668 = vmatpush.msrb.mxu3 %v618_v33  ;;  %707 = vmatpush.msrb.mxu2 %v628_v36  ;;  %v616_v59 = vld [vmem:[#allocation13 + $0x70] sm:$0xff]  ;;  %v916_v60 = vld [vmem:[#allocation14 + $0xa0] sm:$0xff]  ;;  %v633_v9 = vld [vmem:[#allocation13 + $0xf8] sm:$0xff]  ;;  %p3352_p2 = pnand %p3351_p1, %p3347_p12 }
 0x17c   :  { %502 = vmatpush.msra.mxu0 %v473_v6  ;;  %688 = vmatpush.msrb.mxu1 %v619_v32  ;;  %v608_v61 = vld [vmem:[#allocation13 + $0x30] sm:$0xff]  ;;  %v912_v62 = vld [vmem:[#allocation14 + $0x80] sm:$0xff]  ;;  %v921_v12 = vld [vmem:[#allocation14 + $0xc8] sm:$0xff] }
 0x17d   :  { %669 = vmatpush.msrb.mxu3 %v610_v35  ;;  %708 = vmatpush.msrb.mxu2 %v620_v42  ;;  %v908_v63 = vld [vmem:[#allocation14 + $0x60] sm:$0xff]  ;;  %v926_v10 = vld [vmem:[#allocation14 + $0xf0] sm:$0xff]  ;;  %v625_v13 = vld [vmem:[#allocation13 + $0xb8] sm:$0xff] }
 0x17e   :  { %503 = vmatpush.msra.mxu0 %v472_v7  ;;  %689 = vmatpush.msrb.mxu1 %v611_v34  ;;  %v904_v0 = vld [vmem:[#allocation14 + $0x40] sm:$0xff]  ;;  %v922_v14 = vld [vmem:[#allocation14 + $0xd0] sm:$0xff]  ;;  %v917_v16 = vld [vmem:[#allocation14 + $0xa8] sm:$0xff] }
 0x17f   :  { %2643 = vmatmul.msk.f32.vlgmr.msra.gmra.mxu0 %vm484_vm0, %v471_v8  ;;  %670 = vmatpush.msrb.mxu3 %v602_v39  ;;  %v900_v1 = vld [vmem:[#allocation14 + $0x20] sm:$0xff]  ;;  %v925_v8 = vld [vmem:[#allocation14 + $0xe8] sm:$0xff]  ;;  %v927_v23 = vld [vmem:[#allocation14 + $0xf8] sm:$0xff] }
 0x180   :  { %690 = vmatpush.msrb.mxu1 %v603_v37  ;;  %747 = vmatpush.msrb.mxu0 %v630_v40  ;;  %v896_v2 = vld [vmem:[#allocation14] sm:$0xff]  ;;  %v909_v22 = vld [vmem:[#allocation14 + $0x68] sm:$0xff]  ;;  %v919_v31 = vld [vmem:[#allocation14 + $0xb8] sm:$0xff] }
 0x181   :  { %709 = vmatpush.msrb.mxu2 %v612_v46  ;;  %v1049_v11 = vld [vmem:[#allocation17 + $0xe0] sm:$0xff]  ;;  %v906_v32 = vld [vmem:[#allocation14 + $0x50] sm:$0xff]  ;;  %v915_v35 = vld [vmem:[#allocation14 + $0x98] sm:$0xff] }
 0x182   :  { %748 = vmatpush.msrb.mxu0 %v622_v44  ;;  %v1045_v15 = vld [vmem:[#allocation17 + $0xc0] sm:$0xff]  ;;  %v1050_v36 = vld [vmem:[#allocation17 + $0xe8] sm:$0xff]  ;;  %v907_v42 = vld [vmem:[#allocation14 + $0x58] sm:$0xff] }
 0x183   :  { %710 = vmatpush.msrb.mxu2 %v604_v50  ;;  %v1033_v30 = vld [vmem:[#allocation17 + $0x60] sm:$0xff]  ;;  %v902_v37 = vld [vmem:[#allocation14 + $0x30] sm:$0xff]  ;;  %v903_v46 = vld [vmem:[#allocation14 + $0x38] sm:$0xff] }
 0x184   :  { %749 = vmatpush.msrb.mxu0 %v614_v48  ;;  %v897_v33 = vld [vmem:[#allocation14 + $0x8] sm:$0xff]  ;;  %v898_v40 = vld [vmem:[#allocation14 + $0x10] sm:$0xff] }
 0x185   :  { %v1029_v34 = vld [vmem:[#allocation17 + $0x40] sm:$0xff]  ;;  %v1046_v39 = vld [vmem:[#allocation17 + $0xc8] sm:$0xff]  ;;  %v1051_v44 = vld [vmem:[#allocation17 + $0xf0] sm:$0xff] }
 0x186   :  { %750 = vmatpush.msrb.mxu0 %v606_v52  ;;  %v1047_v48 = vld [vmem:[#allocation17 + $0xd0] sm:$0xff]  ;;  %v1034_v50 = vld [vmem:[#allocation17 + $0x68] sm:$0xff] }
 0x187   :  { %v1043_v52 = vld [vmem:[#allocation17 + $0xb0] sm:$0xff] }
 0x188   :  { %949 = vmatpush.msra.mxu0 %v924_v56  ;;  %v1039_v56 = vld [vmem:[#allocation17 + $0x90] sm:$0xff] }
 0x18a   :  { %950 = vmatpush.msra.mxu0 %v920_v58  ;;  %v1044_v58 = vld [vmem:[#allocation17 + $0xb8] sm:$0xff] }
 0x18c   :  { %951 = vmatpush.msra.mxu0 %v916_v60  ;;  %v1022_v60 = vld [vmem:[#allocation17 + $0x8] sm:$0xff] }
 0x18e   :  { %952 = vmatpush.msra.mxu0 %v912_v62  ;;  %v1040_v62 = vld [vmem:[#allocation17 + $0x98] sm:$0xff] }
 0x190   :  { %953 = vmatpush.msra.mxu0 %v908_v63  ;;  %v1200_v63 = vld [vmem:[#allocation20 + $0x1c8] sm:$0xff] }
 0x192   :  { %954 = vmatpush.msra.mxu0 %v904_v0  ;;  %v1031_v0 = vld [vmem:[#allocation17 + $0x50] sm:$0xff] }
 0x194   :  { %955 = vmatpush.msra.mxu0 %v900_v1  ;;  %v1036_v1 = vld [vmem:[#allocation17 + $0x78] sm:$0xff] }
 0x196   :  { %956 = vmatpush.msra.mxu0 %v896_v2  ;;  %v1191_v2 = vld [vmem:[#allocation20 + $0x180] sm:$0xff] }
 0x1fc   :  { %v505_v18 = vpop.f32.mrf.mxu0 }
 0x1fd   :  { %v506_v19 = vadd.f32 %v2793_v17, %v505_v18  ;;  %v617_v17 = vld [vmem:[#allocation13 + $0x78] sm:$0xff]  ;;  %v918_v18 = vld [vmem:[#allocation14 + $0xb0] sm:$0xff] }
 0x1ff   :  { %v508_v20 = vmax.f32 %v506_v19, 0.0  ;;  %v1041_v19 = vld [vmem:[#allocation17 + $0xa0] sm:$0xff] }
 0x201   :  { %v509_v21 = vmul.f32 0.999995, %v508_v20  ;;  %v913_v20 = vld [vmem:[#allocation14 + $0x88] sm:$0xff] }
 0x203   :  { %2644 = vmatmul.msk.f32.vlgmr.msra.gmra.mxu1 %vm518_vm1, %v509_v21  ;;  %2645 = vmatmul.msk.f32.vlgmr.msra.gmra.mxu2 %vm518_vm1, %v509_v21  ;;  %v609_v21 = vld [vmem:[#allocation13 + $0x38] sm:$0xff] }
 0x204   :  { %767 = vmatpush.msra.mxu1 %v631_v41  ;;  %787 = vmatpush.msra.mxu2 %v632_v54  ;;  %v1025_v41 = vld [vmem:[#allocation17 + $0x20] sm:$0xff]  ;;  %v1030_v54 = vld [vmem:[#allocation17 + $0x48] sm:$0xff] }
 0x206   :  { %768 = vmatpush.msra.mxu1 %v623_v45  ;;  %788 = vmatpush.msra.mxu2 %v624_v57  ;;  %v1021_v45 = vld [vmem:[#allocation17] sm:$0xff]  ;;  %v1026_v57 = vld [vmem:[#allocation17 + $0x28] sm:$0xff] }
 0x208   :  { %769 = vmatpush.msra.mxu1 %v615_v49  ;;  %789 = vmatpush.msra.mxu2 %v616_v59  ;;  %v899_v49 = vld [vmem:[#allocation14 + $0x18] sm:$0xff] }
 0x209   :  { %v1035_v59 = vld [vmem:[#allocation17 + $0x70] sm:$0xff] }
 0x20a   :  { %770 = vmatpush.msra.mxu1 %v607_v53  ;;  %790 = vmatpush.msra.mxu2 %v608_v61  ;;  %v3807_v53 = vld [vmem:[#allocation5] sm:$0xff]  ;;  %v1199_v61 = vld [vmem:[#allocation20 + $0x1c0] sm:$0xff] }
 0x280   :  { %v539_v25 = vpop.f32.mrf.mxu1 }
 0x281   :  { %v540_v26 = vadd.f32 %v2794_v24, %v539_v25  ;;  %v914_v24 = vld [vmem:[#allocation14 + $0x90] sm:$0xff]  ;;  %v905_v25 = vld [vmem:[#allocation14 + $0x48] sm:$0xff] }
 0x283   :  { %2646 = vmatmul.msk.f32.vlgmr.msra.gmra.mxu3 %vm576_vm2, %v540_v26  ;;  %2571 = vst.msk [vmem:[#allocation37 + $0x40] sm:$0xff] %vm576_vm2, %v540_v26  ;;  %v1037_v26 = vld [vmem:[#allocation17 + $0x80] sm:$0xff] }
 0x284   :  { %727 = vmatpush.msra.mxu3 %v629_v43  ;;  %v1042_v43 = vld [vmem:[#allocation17 + $0xa8] sm:$0xff] }
 0x286   :  { %v567_v28 = vpop.f32.mrf.mxu2  ;;  %728 = vmatpush.msra.mxu3 %v621_v47  ;;  %v1038_v47 = vld [vmem:[#allocation17 + $0x88] sm:$0xff] }
 0x287   :  { %v568_v29 = vadd.f32 %v2795_v27, %v567_v28  ;;  %v923_v27 = vld [vmem:[#allocation14 + $0xd8] sm:$0xff]  ;;  %v910_v28 = vld [vmem:[#allocation14 + $0x70] sm:$0xff] }
 0x288   :  { %729 = vmatpush.msra.mxu3 %v613_v51  ;;  %v1052_v51 = vld [vmem:[#allocation17 + $0xf8] sm:$0xff] }
 0x289   :  { %2573 = vrot.lane.b32.xlu2 %v568_v29, %s3445_s14  ;;  %v901_v29 = vld [vmem:[#allocation14 + $0x28] sm:$0xff] }
 0x28a   :  { %730 = vmatpush.msra.mxu3 %v605_v55  ;;  %v1048_v55 = vld [vmem:[#allocation17 + $0xd8] sm:$0xff] }
 0x2e3   :  { %v2574_v38 = vpop.permute.xlu2 %2573 }
 0x2e4   :  { %2577 = vst.msk [vmem:[#allocation37 + $0x40] sm:$0xff] %vm2576_vm3, %v2574_v38  ;;  %v911_v38 = vld [vmem:[#allocation14 + $0x78] sm:$0xff] }
 0x306   :  { %v597_v4 = vpop.f32.mrf.mxu3 }
 0x307   :  { %v598_v5 = vadd.f32 %v2796_v3, %v597_v4  ;;  %v1192_v3 = vld [vmem:[#allocation20 + $0x188] sm:$0xff] }
 0x308   :  { %v1027_v4 = vld [vmem:[#allocation17 + $0x30] sm:$0xff] }
 0x309   :  { %v600_v6 = vmax.f32 %v598_v5, 0.0  ;;  %v1032_v5 = vld [vmem:[#allocation17 + $0x58] sm:$0xff] }
 0x30b   :  { %v3789_v7 = vmul.f32 0.999995, %v600_v6  ;;  %v1183_v6 = vld [vmem:[#allocation20 + $0x140] sm:$0xff] }
 0x30d   :  { %2647 = vmatmul.msk.f32.vlgmr.msrb.gmra.mxu3 %vm518_vm1, %v3789_v7  ;;  %2648 = vmatmul.msk.f32.vlgmr.msrb.gmra.mxu1 %vm518_vm1, %v3789_v7 }
 0x30e   :  { %2649 = vmatmul.msk.f32.vlgmr.msrb.gmra.mxu2 %vm518_vm1, %v3789_v7  ;;  %2651 = vmatmul.msk.f32.vlgmr.msrb.gmra.mxu0 %vm518_vm1, %v3789_v7 }
 0x30f   :  { %969 = vmatpush.msrb.mxu1 %v925_v8  ;;  %807 = vmatpush.msrb.mxu3 %v633_v9  ;;  %v1023_v8 = vld [vmem:[#allocation17 + $0x10] sm:$0xff]  ;;  %v1028_v9 = vld [vmem:[#allocation17 + $0x38] sm:$0xff] }
 0x310   :  { %989 = vmatpush.msrb.mxu2 %v926_v10  ;;  %1071 = vmatpush.msrb.mxu0 %v1049_v11  ;;  %v1175_v10 = vld [vmem:[#allocation20 + $0x100] sm:$0xff]  ;;  %v1176_v11 = vld [vmem:[#allocation20 + $0x108] sm:$0xff] }
 0x311   :  { %970 = vmatpush.msrb.mxu1 %v921_v12  ;;  %808 = vmatpush.msrb.mxu3 %v625_v13  ;;  %v1201_v12 = vld [vmem:[#allocation20 + $0x1d0] sm:$0xff] }
 0x312   :  { %990 = vmatpush.msrb.mxu2 %v922_v14  ;;  %1072 = vmatpush.msrb.mxu0 %v1045_v15  ;;  %v1024_v13 = vld [vmem:[#allocation17 + $0x18] sm:$0xff]  ;;  %v1167_v14 = vld [vmem:[#allocation20 + $0xc0] sm:$0xff]  ;;  %v1168_v15 = vld [vmem:[#allocation20 + $0xc8] sm:$0xff] }
 0x313   :  { %971 = vmatpush.msrb.mxu1 %v917_v16  ;;  %809 = vmatpush.msrb.mxu3 %v617_v17  ;;  %v1193_v16 = vld [vmem:[#allocation20 + $0x190] sm:$0xff]  ;;  %v1202_v17 = vld [vmem:[#allocation20 + $0x1d8] sm:$0xff] }
 0x314   :  { %991 = vmatpush.msrb.mxu2 %v918_v18  ;;  %1073 = vmatpush.msrb.mxu0 %v1041_v19  ;;  %v1159_v18 = vld [vmem:[#allocation20 + $0x80] sm:$0xff]  ;;  %v1160_v19 = vld [vmem:[#allocation20 + $0x88] sm:$0xff] }
 0x315   :  { %972 = vmatpush.msrb.mxu1 %v913_v20  ;;  %810 = vmatpush.msrb.mxu3 %v609_v21  ;;  %v1185_v20 = vld [vmem:[#allocation20 + $0x150] sm:$0xff]  ;;  %v1194_v21 = vld [vmem:[#allocation20 + $0x198] sm:$0xff] }
 0x316   :  { %2650 = vmatmul.msk.f32.vlgmr.msra.gmra.mxu3 %vm518_vm1, %v3789_v7  ;;  %2652 = vmatmul.msk.f32.vlgmr.msra.gmra.mxu1 %vm518_vm1, %v3789_v7 }
 0x317   :  { %2653 = vmatmul.msk.f32.vlgmr.msra.gmra.mxu2 %vm518_vm1, %v3789_v7  ;;  %973 = vmatpush.msrb.mxu1 %v909_v22  ;;  %v1151_v22 = vld [vmem:[#allocation20 + $0x40] sm:$0xff] }
 0x318   :  { %1009 = vmatpush.msra.mxu3 %v927_v23  ;;  %992 = vmatpush.msrb.mxu2 %v914_v24  ;;  %v1152_v23 = vld [vmem:[#allocation20 + $0x48] sm:$0xff]  ;;  %v1177_v24 = vld [vmem:[#allocation20 + $0x110] sm:$0xff] }
 0x319   :  { %974 = vmatpush.msrb.mxu1 %v905_v25  ;;  %1074 = vmatpush.msrb.mxu0 %v1037_v26  ;;  %v1186_v25 = vld [vmem:[#allocation20 + $0x158] sm:$0xff]  ;;  %v1143_v26 = vld [vmem:[#allocation20] sm:$0xff] }
 0x31a   :  { %1010 = vmatpush.msra.mxu3 %v923_v27  ;;  %993 = vmatpush.msrb.mxu2 %v910_v28  ;;  %v1144_v27 = vld [vmem:[#allocation20 + $0x8] sm:$0xff]  ;;  %v1169_v28 = vld [vmem:[#allocation20 + $0xd0] sm:$0xff] }
 0x31b   :  { %975 = vmatpush.msrb.mxu1 %v901_v29  ;;  %1075 = vmatpush.msrb.mxu0 %v1033_v30  ;;  %v1178_v29 = vld [vmem:[#allocation20 + $0x118] sm:$0xff]  ;;  %v1203_v30 = vld [vmem:[#allocation20 + $0x1e0] sm:$0xff] }
 0x31c   :  { %1011 = vmatpush.msra.mxu3 %v919_v31  ;;  %994 = vmatpush.msrb.mxu2 %v906_v32  ;;  %v1204_v31 = vld [vmem:[#allocation20 + $0x1e8] sm:$0xff]  ;;  %v1161_v32 = vld [vmem:[#allocation20 + $0x90] sm:$0xff] }
 0x31d   :  { %976 = vmatpush.msrb.mxu1 %v897_v33  ;;  %1076 = vmatpush.msrb.mxu0 %v1029_v34  ;;  %v1170_v33 = vld [vmem:[#allocation20 + $0xd8] sm:$0xff]  ;;  %v1195_v34 = vld [vmem:[#allocation20 + $0x1a0] sm:$0xff] }
 0x31e   :  { %1012 = vmatpush.msra.mxu3 %v915_v35  ;;  %995 = vmatpush.msrb.mxu2 %v902_v37  ;;  %v1196_v35 = vld [vmem:[#allocation20 + $0x1a8] sm:$0xff]  ;;  %v1162_v37 = vld [vmem:[#allocation20 + $0x98] sm:$0xff] }
 0x31f   :  { %1091 = vmatpush.msra.mxu1 %v1050_v36  ;;  %2654 = vmatmul.msk.f32.vlgmr.msrb.gmra.mxu3 %vm518_vm1, %v3789_v7  ;;  %v1184_v7 = vld [vmem:[#allocation20 + $0x148] sm:$0xff]  ;;  %v1153_v36 = vld [vmem:[#allocation20 + $0x50] sm:$0xff] }
 0x320   :  { %1013 = vmatpush.msra.mxu3 %v911_v38  ;;  %996 = vmatpush.msrb.mxu2 %v898_v40  ;;  %v1187_v38 = vld [vmem:[#allocation20 + $0x160] sm:$0xff]  ;;  %v1145_v40 = vld [vmem:[#allocation20 + $0x10] sm:$0xff] }
 0x321   :  { %1092 = vmatpush.msra.mxu1 %v1046_v39  ;;  %1077 = vmatpush.msrb.mxu0 %v1025_v41  ;;  %v1188_v39 = vld [vmem:[#allocation20 + $0x168] sm:$0xff]  ;;  %v1154_v41 = vld [vmem:[#allocation20 + $0x58] sm:$0xff] }
 0x322   :  { %1014 = vmatpush.msra.mxu3 %v907_v42  ;;  %1111 = vmatpush.msra.mxu2 %v1051_v44  ;;  %v1179_v42 = vld [vmem:[#allocation20 + $0x120] sm:$0xff]  ;;  %v1205_v44 = vld [vmem:[#allocation20 + $0x1f0] sm:$0xff] }
 0x323   :  { %1093 = vmatpush.msra.mxu1 %v1042_v43  ;;  %1078 = vmatpush.msrb.mxu0 %v1021_v45  ;;  %v1180_v43 = vld [vmem:[#allocation20 + $0x128] sm:$0xff]  ;;  %v1146_v45 = vld [vmem:[#allocation20 + $0x18] sm:$0xff] }
 0x324   :  { %1015 = vmatpush.msra.mxu3 %v903_v46  ;;  %1112 = vmatpush.msra.mxu2 %v1047_v48  ;;  %v1171_v46 = vld [vmem:[#allocation20 + $0xe0] sm:$0xff]  ;;  %v1197_v48 = vld [vmem:[#allocation20 + $0x1b0] sm:$0xff] }
 0x325   :  { %1094 = vmatpush.msra.mxu1 %v1038_v47  ;;  %2655 = vmatmul.msk.f32.vlgmr.msra.gmra.mxu0 %vm484_vm0, %v3807_v53  ;;  %v1172_v47 = vld [vmem:[#allocation20 + $0xe8] sm:$0xff] }
 0x326   :  { %1016 = vmatpush.msra.mxu3 %v899_v49  ;;  %1113 = vmatpush.msra.mxu2 %v1043_v52  ;;  %v1206_v49 = vld [vmem:[#allocation20 + $0x1f8] sm:$0xff]  ;;  %v1189_v52 = vld [vmem:[#allocation20 + $0x170] sm:$0xff] }
 0x327   :  { %1095 = vmatpush.msra.mxu1 %v1034_v50  ;;  %2657 = vmatmul.msk.f32.vlgmr.msrb.gmra.mxu2 %vm484_vm0, %v3807_v53  ;;  %v1163_v50 = vld [vmem:[#allocation20 + $0xa0] sm:$0xff] }
 0x328   :  { %1131 = vmatpush.msrb.mxu3 %v1052_v51  ;;  %1114 = vmatpush.msra.mxu2 %v1039_v56  ;;  %v1164_v51 = vld [vmem:[#allocation20 + $0xa8] sm:$0xff] }
 0x329   :  { %1096 = vmatpush.msra.mxu1 %v1030_v54  ;;  %2658 = vmatmul.msk.f32.vlgmr.msra.gmra.mxu3 %vm484_vm0, %v3807_v53  ;;  %v1198_v54 = vld [vmem:[#allocation20 + $0x1b8] sm:$0xff]  ;;  %v1156_v56 = vld [vmem:[#allocation20 + $0x68] sm:$0xff] }
 0x32a   :  { %1132 = vmatpush.msrb.mxu3 %v1048_v55  ;;  %1115 = vmatpush.msra.mxu2 %v1035_v59  ;;  %v1155_v55 = vld [vmem:[#allocation20 + $0x60] sm:$0xff] }
 0x32b   :  { %1097 = vmatpush.msra.mxu1 %v1026_v57  ;;  %1233 = vmatpush.msra.mxu0 %v1199_v61  ;;  %v1181_v57 = vld [vmem:[#allocation20 + $0x130] sm:$0xff]  ;;  %v1147_v59 = vld [vmem:[#allocation20 + $0x20] sm:$0xff] }
 0x32c   :  { %1133 = vmatpush.msrb.mxu3 %v1044_v58  ;;  %2656 = vmatmul.msk.f32.vlgmr.msrb.gmra.mxu1 %vm484_vm0, %v3807_v53  ;;  %v1190_v58 = vld [vmem:[#allocation20 + $0x178] sm:$0xff]  ;;  %v1173_v61 = vld [vmem:[#allocation20 + $0xf0] sm:$0xff] }
 0x32d   :  { %1098 = vmatpush.msra.mxu1 %v1022_v60  ;;  %1116 = vmatpush.msra.mxu2 %v1031_v0  ;;  %v1148_v60 = vld [vmem:[#allocation20 + $0x28] sm:$0xff] }
 0x32e   :  { %1134 = vmatpush.msrb.mxu3 %v1040_v62  ;;  %1234 = vmatpush.msra.mxu0 %v1191_v2  ;;  %v1182_v62 = vld [vmem:[#allocation20 + $0x138] sm:$0xff]  ;;  %v1445_v0 = vld [vmem:[#allocation22 + $0xe8] sm:$0xff] }
 0x32f   :  { %1253 = vmatpush.msrb.mxu1 %v1200_v63  ;;  %1117 = vmatpush.msra.mxu2 %v1027_v4  ;;  %v1444_v63 = vld [vmem:[#allocation22 + $0xe0] sm:$0xff]  ;;  %v1174_v2 = vld [vmem:[#allocation20 + $0xf8] sm:$0xff]  ;;  %v1441_v4 = vld [vmem:[#allocation22 + $0xc8] sm:$0xff] }
 0x330   :  { %1135 = vmatpush.msrb.mxu3 %v1036_v1  ;;  %1235 = vmatpush.msra.mxu0 %v1183_v6  ;;  %v1165_v1 = vld [vmem:[#allocation20 + $0xb0] sm:$0xff]  ;;  %v1166_v6 = vld [vmem:[#allocation20 + $0xb8] sm:$0xff] }
 0x331   :  { %1254 = vmatpush.msrb.mxu1 %v1192_v3  ;;  %1118 = vmatpush.msra.mxu2 %v1023_v8  ;;  %v1440_v3 = vld [vmem:[#allocation22 + $0xc0] sm:$0xff]  ;;  %v1437_v8 = vld [vmem:[#allocation22 + $0xa8] sm:$0xff] }
 0x332   :  { %1136 = vmatpush.msrb.mxu3 %v1032_v5  ;;  %2661 = vmatmul.msk.f32.vlgmr.msra.gmra.mxu2 %vm484_vm0, %v3807_v53  ;;  %v1157_v5 = vld [vmem:[#allocation20 + $0x70] sm:$0xff] }
 0x333   :  { %1255 = vmatpush.msrb.mxu1 %v1184_v7  ;;  %1236 = vmatpush.msra.mxu0 %v1175_v10  ;;  %v1436_v7 = vld [vmem:[#allocation22 + $0xa0] sm:$0xff]  ;;  %v1158_v10 = vld [vmem:[#allocation20 + $0x78] sm:$0xff] }
 0x334   :  { %1137 = vmatpush.msrb.mxu3 %v1028_v9  ;;  %1273 = vmatpush.msrb.mxu2 %v1201_v12  ;;  %v1149_v9 = vld [vmem:[#allocation20 + $0x30] sm:$0xff]  ;;  %v1433_v12 = vld [vmem:[#allocation22 + $0x88] sm:$0xff] }
 0x335   :  { %1256 = vmatpush.msrb.mxu1 %v1176_v11  ;;  %1237 = vmatpush.msra.mxu0 %v1167_v14  ;;  %v1432_v11 = vld [vmem:[#allocation22 + $0x80] sm:$0xff]  ;;  %v1150_v14 = vld [vmem:[#allocation20 + $0x38] sm:$0xff] }
 0x336   :  { %1138 = vmatpush.msrb.mxu3 %v1024_v13  ;;  %1274 = vmatpush.msrb.mxu2 %v1193_v16  ;;  %v1446_v13 = vld [vmem:[#allocation22 + $0xf0] sm:$0xff]  ;;  %v1429_v16 = vld [vmem:[#allocation22 + $0x68] sm:$0xff] }
 0x337   :  { %2662 = vmatmul.msk.f32.vlgmr.msrb.gmra.mxu3 %vm484_vm0, %v3807_v53  ;;  %1257 = vmatpush.msrb.mxu1 %v1168_v15  ;;  %v1428_v15 = vld [vmem:[#allocation22 + $0x60] sm:$0xff] }
 0x338   :  { %1293 = vmatpush.msra.mxu3 %v1202_v17  ;;  %2659 = vmatmul.msk.f32.vlgmr.msrb.gmra.mxu0 %vm484_vm0, %v3807_v53  ;;  %v1442_v17 = vld [vmem:[#allocation22 + $0xd0] sm:$0xff] }
 0x339   :  { %2660 = vmatmul.msk.f32.vlgmr.msra.gmra.mxu1 %vm484_vm0, %v3807_v53  ;;  %1238 = vmatpush.msra.mxu0 %v1159_v18  ;;  %v1447_v18 = vld [vmem:[#allocation22 + $0xf8] sm:$0xff] }
 0x33a   :  { %1258 = vmatpush.msrb.mxu1 %v1160_v19  ;;  %1275 = vmatpush.msrb.mxu2 %v1185_v20  ;;  %v1424_v19 = vld [vmem:[#allocation22 + $0x40] sm:$0xff]  ;;  %v1425_v20 = vld [vmem:[#allocation22 + $0x48] sm:$0xff] }
 0x33b   :  { %1294 = vmatpush.msra.mxu3 %v1194_v21  ;;  %1239 = vmatpush.msra.mxu0 %v1151_v22  ;;  %v1438_v21 = vld [vmem:[#allocation22 + $0xb0] sm:$0xff]  ;;  %v1443_v22 = vld [vmem:[#allocation22 + $0xd8] sm:$0xff] }
 0x33c   :  { %1259 = vmatpush.msrb.mxu1 %v1152_v23  ;;  %1276 = vmatpush.msrb.mxu2 %v1177_v24  ;;  %v1420_v23 = vld [vmem:[#allocation22 + $0x20] sm:$0xff]  ;;  %v1421_v24 = vld [vmem:[#allocation22 + $0x28] sm:$0xff] }
 0x33d   :  { %1295 = vmatpush.msra.mxu3 %v1186_v25  ;;  %1240 = vmatpush.msra.mxu0 %v1143_v26  ;;  %v1434_v25 = vld [vmem:[#allocation22 + $0x90] sm:$0xff]  ;;  %v1439_v26 = vld [vmem:[#allocation22 + $0xb8] sm:$0xff] }
 0x33e   :  { %1260 = vmatpush.msrb.mxu1 %v1144_v27  ;;  %1277 = vmatpush.msrb.mxu2 %v1169_v28  ;;  %v1416_v27 = vld [vmem:[#allocation22] sm:$0xff]  ;;  %v1417_v28 = vld [vmem:[#allocation22 + $0x8] sm:$0xff] }
 0x33f   :  { %1296 = vmatpush.msra.mxu3 %v1178_v29  ;;  %1313 = vmatpush.msrb.mxu0 %v1203_v30  ;;  %v1430_v29 = vld [vmem:[#allocation22 + $0x70] sm:$0xff]  ;;  %v1435_v30 = vld [vmem:[#allocation22 + $0x98] sm:$0xff] }
 0x340   :  { %1333 = vmatpush.msra.mxu1 %v1204_v31  ;;  %1278 = vmatpush.msrb.mxu2 %v1161_v32  ;;  %v1566_v31 = vld [vmem:[#allocation25 + $0xe0] sm:$0xff]  ;;  %v1567_v32 = vld [vmem:[#allocation25 + $0xe8] sm:$0xff] }
 0x341   :  { %1297 = vmatpush.msra.mxu3 %v1170_v33  ;;  %1314 = vmatpush.msrb.mxu0 %v1195_v34  ;;  %v1426_v33 = vld [vmem:[#allocation22 + $0x50] sm:$0xff]  ;;  %v1431_v34 = vld [vmem:[#allocation22 + $0x78] sm:$0xff] }
 0x342   :  { %1334 = vmatpush.msra.mxu1 %v1196_v35  ;;  %1279 = vmatpush.msrb.mxu2 %v1153_v36  ;;  %v1562_v35 = vld [vmem:[#allocation25 + $0xc0] sm:$0xff]  ;;  %v1563_v36 = vld [vmem:[#allocation25 + $0xc8] sm:$0xff] }
 0x343   :  { %1298 = vmatpush.msra.mxu3 %v1162_v37  ;;  %1315 = vmatpush.msrb.mxu0 %v1187_v38  ;;  %v1422_v37 = vld [vmem:[#allocation22 + $0x30] sm:$0xff]  ;;  %v1427_v38 = vld [vmem:[#allocation22 + $0x58] sm:$0xff] }
 0x344   :  { %1335 = vmatpush.msra.mxu1 %v1188_v39  ;;  %1280 = vmatpush.msrb.mxu2 %v1145_v40  ;;  %v1558_v39 = vld [vmem:[#allocation25 + $0xa0] sm:$0xff]  ;;  %v1559_v40 = vld [vmem:[#allocation25 + $0xa8] sm:$0xff] }
 0x345   :  { %1299 = vmatpush.msra.mxu3 %v1154_v41  ;;  %1316 = vmatpush.msrb.mxu0 %v1179_v42  ;;  %v1418_v41 = vld [vmem:[#allocation22 + $0x10] sm:$0xff]  ;;  %v1423_v42 = vld [vmem:[#allocation22 + $0x38] sm:$0xff] }
 0x346   :  { %1336 = vmatpush.msra.mxu1 %v1180_v43  ;;  %1353 = vmatpush.msra.mxu2 %v1205_v44  ;;  %v1554_v43 = vld [vmem:[#allocation25 + $0x80] sm:$0xff]  ;;  %v1555_v44 = vld [vmem:[#allocation25 + $0x88] sm:$0xff] }
 0x347   :  { %1300 = vmatpush.msra.mxu3 %v1146_v45  ;;  %1317 = vmatpush.msrb.mxu0 %v1171_v46  ;;  %v1568_v45 = vld [vmem:[#allocation25 + $0xf0] sm:$0xff] }
 0x348   :  { %1337 = vmatpush.msra.mxu1 %v1172_v47  ;;  %1354 = vmatpush.msra.mxu2 %v1197_v48  ;;  %v1419_v46 = vld [vmem:[#allocation22 + $0x18] sm:$0xff]  ;;  %v1550_v47 = vld [vmem:[#allocation25 + $0x60] sm:$0xff]  ;;  %v1551_v48 = vld [vmem:[#allocation25 + $0x68] sm:$0xff] }
 0x349   :  { %1373 = vmatpush.msrb.mxu3 %v1206_v49  ;;  %1318 = vmatpush.msrb.mxu0 %v1163_v50  ;;  %v1564_v49 = vld [vmem:[#allocation25 + $0xd0] sm:$0xff]  ;;  %v1569_v50 = vld [vmem:[#allocation25 + $0xf8] sm:$0xff] }
 0x34a   :  { %1338 = vmatpush.msra.mxu1 %v1164_v51  ;;  %1355 = vmatpush.msra.mxu2 %v1189_v52  ;;  %v1546_v51 = vld [vmem:[#allocation25 + $0x40] sm:$0xff]  ;;  %v1547_v52 = vld [vmem:[#allocation25 + $0x48] sm:$0xff] }
 0x34b   :  { %1374 = vmatpush.msrb.mxu3 %v1198_v54  ;;  %1319 = vmatpush.msrb.mxu0 %v1155_v55  ;;  %v1560_v54 = vld [vmem:[#allocation25 + $0xb0] sm:$0xff]  ;;  %v816_v55 = vld [vmem:[%s4145_s24] sm:$0xff] }
 0x34c   :  { %1339 = vmatpush.msra.mxu1 %v1156_v56  ;;  %1356 = vmatpush.msra.mxu2 %v1181_v57  ;;  %v817_v56 = vld [vmem:[%s4145_s24 + $0x8] sm:$0xff]  ;;  %v1565_v57 = vld [vmem:[#allocation25 + $0xd8] sm:$0xff] }
 0x34d   :  { %1375 = vmatpush.msrb.mxu3 %v1190_v58  ;;  %1320 = vmatpush.msrb.mxu0 %v1147_v59  ;;  %v1542_v58 = vld [vmem:[#allocation25 + $0x20] sm:$0xff]  ;;  %v1543_v59 = vld [vmem:[#allocation25 + $0x28] sm:$0xff] }
 0x34e   :  { %1340 = vmatpush.msra.mxu1 %v1148_v60  ;;  %1357 = vmatpush.msra.mxu2 %v1173_v61  ;;  %v1556_v60 = vld [vmem:[#allocation25 + $0x90] sm:$0xff]  ;;  %v3446_v61 = vmov 8.0  }
 0x34f   :  { %1376 = vmatpush.msrb.mxu3 %v1182_v62  ;;  %2663 = vmatmul.msk.f32.vlgmr.msra.gmra.mxu0 %vm484_vm0, %v3807_v53  ;;  %2801 = vrcp.f32 %v3446_v61  ;;  %v1561_v62 = vld [vmem:[#allocation25 + $0xb8] sm:$0xff]  ;;  %v1668_v61 = vld [vmem:[#allocation28 + $0x40] sm:$0xff] }
 0x350   :  { %2664 = vmatmul.msk.f32.vlgmr.msrb.gmra.mxu1 %vm484_vm0, %v3807_v53  ;;  %1466 = vmatpush.msra.mxu0 %v1444_v63  ;;  %v818_v63 = vld [vmem:[%s4145_s24 + $0x10] sm:$0xff] }
 0x351   :  { %1486 = vmatpush.msrb.mxu1 %v1445_v0  ;;  %1358 = vmatpush.msra.mxu2 %v1165_v1  ;;  %v825_v0 = vsel %vm824_vm4, %v816_v55, 0.0  ;;  %v832_v1 = vsel %vm824_vm4, %v817_v56, 0.0  ;;  %v1677_v55 = vld [vmem:[#allocation28 + $0x88] sm:$0xff] }
 0x352   :  { %1377 = vmatpush.msrb.mxu3 %v1174_v2  ;;  %1467 = vmatpush.msra.mxu0 %v1440_v3  ;;  %v1538_v2 = vld [vmem:[#allocation25] sm:$0xff]  ;;  %v1539_v3 = vld [vmem:[#allocation25 + $0x8] sm:$0xff] }
 0x353   :  { %1487 = vmatpush.msrb.mxu1 %v1441_v4  ;;  %1359 = vmatpush.msra.mxu2 %v1157_v5  ;;  %v1552_v4 = vld [vmem:[#allocation25 + $0x70] sm:$0xff]  ;;  %v1557_v5 = vld [vmem:[#allocation25 + $0x98] sm:$0xff] }
 0x354   :  { %1378 = vmatpush.msrb.mxu3 %v1166_v6  ;;  %1468 = vmatpush.msra.mxu0 %v1436_v7  ;;  %v819_v6 = vld [vmem:[%s4145_s24 + $0x18] sm:$0xff]  ;;  %v826_v7 = vrot.slane %v825_v0, 4 }
 0x355   :  { %1488 = vmatpush.msrb.mxu1 %v1437_v8  ;;  %1360 = vmatpush.msra.mxu2 %v1149_v9  ;;  %v833_v8 = vrot.slane %v832_v1, 4  ;;  %v839_v9 = vsel %vm824_vm4, %v818_v63, 0.0 }
 0x356   :  { %1379 = vmatpush.msrb.mxu3 %v1158_v10  ;;  %2665 = vmatmul.msk.f32.vlgmr.msrb.gmra.mxu2 %vm484_vm0, %v3807_v53  ;;  %v1716_v10 = vld [vmem:[#allocation28 + $0x1c0] sm:$0xff] }
 0x357   :  { %1469 = vmatpush.msra.mxu0 %v1432_v11  ;;  %1489 = vmatpush.msrb.mxu1 %v1433_v12  ;;  %v3850_v11 = vpop.eup %2801  ;;  %v1717_v12 = vld [vmem:[#allocation28 + $0x1c8] sm:$0xff] }
 0x358   :  { %1506 = vmatpush.msrb.mxu2 %v1446_v13  ;;  %1380 = vmatpush.msrb.mxu3 %v1150_v14  ;;  %v1548_v13 = vld [vmem:[#allocation25 + $0x50] sm:$0xff]  ;;  %v1553_v14 = vld [vmem:[#allocation25 + $0x78] sm:$0xff]  ;;  %vm886_vm5 = vweird.f32 %v3850_v11 }
 0x359   :  { %2666 = vmatmul.msk.f32.vlgmr.msra.gmra.mxu3 %vm484_vm0, %v3807_v53  ;;  %1470 = vmatpush.msra.mxu0 %v1428_v15  ;;  %v1708_v15 = vld [vmem:[#allocation28 + $0x180] sm:$0xff] }
 0x35a   :  { %1490 = vmatpush.msrb.mxu1 %v1429_v16  ;;  %1507 = vmatpush.msrb.mxu2 %v1442_v17  ;;  %v820_v16 = vld [vmem:[%s4145_s24 + $0x20] sm:$0xff]  ;;  %v840_v17 = vrot.slane %v839_v9, 4 }
 0x35b   :  { %1526 = vmatpush.msra.mxu3 %v1447_v18  ;;  %1471 = vmatpush.msra.mxu0 %v1424_v19  ;;  %v846_v18 = vsel %vm824_vm4, %v819_v6, 0.0  ;;  %v1709_v19 = vld [vmem:[#allocation28 + $0x188] sm:$0xff] }
 0x35c   :  { %1491 = vmatpush.msrb.mxu1 %v1425_v20  ;;  %1508 = vmatpush.msrb.mxu2 %v1438_v21  ;;  %v1544_v20 = vld [vmem:[#allocation25 + $0x30] sm:$0xff]  ;;  %v827_v21 = vadd.f32 %v826_v7, %v825_v0  ;;  %v1660_v7 = vld [vmem:[#allocation28] sm:$0xff] }
 0x35d   :  { %1527 = vmatpush.msra.mxu3 %v1443_v22  ;;  %1472 = vmatpush.msra.mxu0 %v1420_v23  ;;  %v834_v22 = vadd.f32 %v833_v8, %v832_v1  ;;  %v1549_v23 = vld [vmem:[#allocation25 + $0x58] sm:$0xff]  ;;  %v1661_v8 = vld [vmem:[#allocation28 + $0x8] sm:$0xff] }
 0x35e   :  { %1492 = vmatpush.msrb.mxu1 %v1421_v24  ;;  %1509 = vmatpush.msrb.mxu2 %v1434_v25  ;;  %v1700_v24 = vld [vmem:[#allocation28 + $0x140] sm:$0xff]  ;;  %v882_v25 = vmul.f32 8.0, %v3850_v11 }
 0x35f   :  { %1528 = vmatpush.msra.mxu3 %v1439_v26  ;;  %1473 = vmatpush.msra.mxu0 %v1416_v27  ;;  %v1701_v26 = vld [vmem:[#allocation28 + $0x148] sm:$0xff] }
 0x360   :  { %1493 = vmatpush.msrb.mxu1 %v1417_v28  ;;  %1510 = vmatpush.msrb.mxu2 %v1430_v29  ;;  %v1540_v27 = vld [vmem:[#allocation25 + $0x10] sm:$0xff]  ;;  %v821_v28 = vld [vmem:[%s4145_s24 + $0x28] sm:$0xff]  ;;  %v847_v29 = vrot.slane %v846_v18, 4 }
 0x361   :  { %1529 = vmatpush.msra.mxu3 %v1435_v30  ;;  %2667 = vmatmul.msk.f32.vlgmr.msrb.gmra.mxu0 %vm484_vm0, %v3807_v53  ;;  %v853_v30 = vsel %vm824_vm4, %v820_v16, 0.0  ;;  %v1720_v16 = vld [vmem:[#allocation28 + $0x1e0] sm:$0xff] }
 0x362   :  { %2668 = vmatmul.msk.f32.vlgmr.msra.gmra.mxu1 %vm484_vm0, %v3807_v53  ;;  %1588 = vmatpush.msrb.mxu0 %v1566_v31  ;;  %v1545_v31 = vld [vmem:[#allocation25 + $0x38] sm:$0xff] }
 0x363   :  { %1608 = vmatpush.msra.mxu1 %v1567_v32  ;;  %1511 = vmatpush.msrb.mxu2 %v1426_v33  ;;  %v841_v32 = vadd.f32 %v840_v17, %v839_v9  ;;  %v1692_v33 = vld [vmem:[#allocation28 + $0x100] sm:$0xff]  ;;  %v1721_v17 = vld [vmem:[#allocation28 + $0x1e8] sm:$0xff] }
 0x364   :  { %1530 = vmatpush.msra.mxu3 %v1431_v34  ;;  %1589 = vmatpush.msrb.mxu0 %v1562_v35  ;;  %v1693_v34 = vld [vmem:[#allocation28 + $0x108] sm:$0xff]  ;;  %v828_v35 = vrot.slane %v827_v21, 2 }
 0x365   :  { %1609 = vmatpush.msra.mxu1 %v1563_v36  ;;  %1512 = vmatpush.msrb.mxu2 %v1422_v37  ;;  %v835_v36 = vrot.slane %v834_v22, 2  ;;  %v1541_v37 = vld [vmem:[#allocation25 + $0x18] sm:$0xff] }
 0x366   :  { %1531 = vmatpush.msra.mxu3 %v1427_v38  ;;  %1590 = vmatpush.msrb.mxu0 %v1558_v39  ;;  %v1718_v38 = vld [vmem:[#allocation28 + $0x1d0] sm:$0xff]  ;;  %v822_v39 = vld [vmem:[%s4145_s24 + $0x30] sm:$0xff] }
 0x367   :  { %1610 = vmatpush.msra.mxu1 %v1559_v40  ;;  %2669 = vmatmul.msk.f32.vlgmr.msra.gmra.mxu2 %vm484_vm0, %v3807_v53  ;;  %v854_v40 = vrot.slane %v853_v30, 4 }
 0x368   :  { %1513 = vmatpush.msrb.mxu2 %v1418_v41  ;;  %1532 = vmatpush.msra.mxu3 %v1423_v42  ;;  %v860_v41 = vsel %vm824_vm4, %v821_v28, 0.0  ;;  %v883_v42 = vsub.f32 1.0, %v882_v25  ;;  %v1712_v25 = vld [vmem:[#allocation28 + $0x1a0] sm:$0xff] }
 0x369   :  { %1591 = vmatpush.msrb.mxu0 %v1554_v43  ;;  %1611 = vmatpush.msra.mxu1 %v1555_v44  ;;  %v1684_v43 = vld [vmem:[#allocation28 + $0xc0] sm:$0xff]  ;;  %v848_v44 = vadd.f32 %v847_v29, %v846_v18  ;;  %v855_v56 = vadd.f32 %v854_v40, %v853_v30  ;;  %v1678_v29 = vld [vmem:[#allocation28 + $0x90] sm:$0xff]  ;;  %v1679_v30 = vld [vmem:[#allocation28 + $0x98] sm:$0xff] }
 0x36a   :  { %1628 = vmatpush.msra.mxu2 %v1568_v45  ;;  %2670 = vmatmul.msk.f32.vlgmr.msrb.gmra.mxu3 %vm484_vm0, %v3807_v53  ;;  %v1685_v45 = vld [vmem:[#allocation28 + $0xc8] sm:$0xff] }
 0x36b   :  { %1533 = vmatpush.msra.mxu3 %v1419_v46  ;;  %1592 = vmatpush.msrb.mxu0 %v1550_v47  ;;  %v1719_v46 = vld [vmem:[#allocation28 + $0x1d8] sm:$0xff]  ;;  %v842_v47 = vrot.slane %v841_v32, 2  ;;  %v856_v9 = vrot.slane %v855_v56, 2 }
 0x36c   :  { %1612 = vmatpush.msra.mxu1 %v1551_v48  ;;  %1629 = vmatpush.msra.mxu2 %v1564_v49  ;;  %v823_v48 = vld [vmem:[%s4145_s24 + $0x38] sm:$0xff]  ;;  %v829_v49 = vadd.f32 %v828_v35, %v827_v21  ;;  %v1687_v21 = vld [vmem:[#allocation28 + $0xd8] sm:$0xff] }
 0x36d   :  { %1648 = vmatpush.msrb.mxu3 %v1569_v50  ;;  %1593 = vmatpush.msrb.mxu0 %v1546_v51  ;;  %v836_v50 = vadd.f32 %v835_v36, %v834_v22  ;;  %v861_v51 = vrot.slane %v860_v41, 4  ;;  %v843_v63 = vadd.f32 %v842_v47, %v841_v32  ;;  %v874_v1 = vsel %vm824_vm4, %v823_v48, 0.0  ;;  %v1663_v47 = vld [vmem:[#allocation28 + $0x18] sm:$0xff] }
 0x36e   :  { %1613 = vmatpush.msra.mxu1 %v1547_v52  ;;  %1630 = vmatpush.msra.mxu2 %v1560_v54  ;;  %v867_v52 = vsel %vm824_vm4, %v822_v39, 0.0  ;;  %v1676_v54 = vld [vmem:[#allocation28 + $0x80] sm:$0xff] }
 0x36f   :  { %1649 = vmatpush.msrb.mxu3 %v1565_v57  ;;  %1594 = vmatpush.msrb.mxu0 %v1542_v58  ;;  %v884_v57 = vmul.f32 %v3850_v11, %v883_v42  ;;  %v1710_v58 = vld [vmem:[#allocation28 + $0x190] sm:$0xff]  ;;  %v868_v0 = vrot.slane %v867_v52, 4  ;;  %v862_v6 = vadd.f32 %v861_v51, %v860_v41  ;;  %v844_v18 = vrot.slane %v843_v63, 1  ;;  %v1696_v41 = vld [vmem:[#allocation28 + $0x120] sm:$0xff]  ;;  %v1697_v42 = vld [vmem:[#allocation28 + $0x128] sm:$0xff] }
 0x370   :  { %1614 = vmatpush.msra.mxu1 %v1543_v59  ;;  %1631 = vmatpush.msra.mxu2 %v1556_v60  ;;  %v1711_v59 = vld [vmem:[#allocation28 + $0x198] sm:$0xff]  ;;  %v849_v60 = vrot.slane %v848_v44, 2  ;;  %v1689_v51 = vld [vmem:[#allocation28 + $0xe8] sm:$0xff] }
 0x371   :  { %1650 = vmatpush.msrb.mxu3 %v1561_v62  ;;  %2673 = vmatmul.msk.f32.vlgmr.msrb.gmra.mxu2 %vm484_vm0, %v3807_v53  ;;  %v1669_v62 = vld [vmem:[#allocation28 + $0x48] sm:$0xff]  ;;  %v845_v35 = vadd.f32 %v844_v18, %v843_v63  ;;  %v1715_v63 = vld [vmem:[#allocation28 + $0x1b8] sm:$0xff]  ;;  %v1690_v18 = vld [vmem:[#allocation28 + $0xf0] sm:$0xff] }
 0x372   :  { %1595 = vmatpush.msrb.mxu0 %v1538_v2  ;;  %1615 = vmatpush.msra.mxu1 %v1539_v3  ;;  %v1702_v2 = vld [vmem:[#allocation28 + $0x150] sm:$0xff]  ;;  %v1703_v3 = vld [vmem:[#allocation28 + $0x158] sm:$0xff] }
 0x373   :  { %1632 = vmatpush.msra.mxu2 %v1552_v4  ;;  %1651 = vmatpush.msrb.mxu3 %v1557_v5  ;;  %v830_v4 = vrot.slane %v829_v49, 1  ;;  %v837_v5 = vrot.slane %v836_v50, 1 }
 0x374   :  { %2671 = vmatmul.msk.f32.vlgmr.msra.gmra.mxu0 %vm484_vm0, %v3807_v53  ;;  %2672 = vmatmul.msk.f32.vlgmr.msrb.gmra.mxu1 %vm484_vm0, %v3807_v53 }
 0x375   :  { %2674 = vmatmul.msk.f32.vlgmr.msra.gmra.mxu3 %vm484_vm0, %v3807_v53  ;;  %1750 = vmatpush.msra.mxu0 %v1716_v10  ;;  %v885_v10 = vadd.f32 %v3850_v11, %v884_v57  ;;  %v831_v22 = vadd.f32 %v830_v4, %v829_v49  ;;  %v1706_v4 = vld [vmem:[#allocation28 + $0x170] sm:$0xff] }
 0x376   :  { %1770 = vmatpush.msrb.mxu1 %v1717_v12  ;;  %1633 = vmatpush.msra.mxu2 %v1548_v13  ;;  %v1694_v12 = vld [vmem:[#allocation28 + $0x110] sm:$0xff]  ;;  %v1695_v13 = vld [vmem:[#allocation28 + $0x118] sm:$0xff] }
 0x377   :  { %1652 = vmatpush.msrb.mxu3 %v1553_v14  ;;  %1751 = vmatpush.msra.mxu0 %v1708_v15  ;;  %v850_v14 = vadd.f32 %v849_v60, %v848_v44  ;;  %v875_v15 = vrot.slane %v874_v1, 4  ;;  %v3882_v28 = vsel %vm886_vm5, %v3850_v11, %v885_v10 }
 0x378   :  { %1771 = vmatpush.msrb.mxu1 %v1709_v19  ;;  %1634 = vmatpush.msra.mxu2 %v1544_v20  ;;  %v869_v19 = vadd.f32 %v868_v0, %v867_v52  ;;  %v1686_v20 = vld [vmem:[#allocation28 + $0xd0] sm:$0xff]  ;;  %v888_v11 = vmul.f32 %v3882_v28, %v831_v22  ;;  %v890_v49 = vmul.f32 %v3882_v28, %v845_v35  ;;  %v1934_v22 = vld [vmem:[%s4146_s16 + $0x8] sm:$0x1] }
 0x379   :  { %1653 = vmatpush.msrb.mxu3 %v1549_v23  ;;  %1752 = vmatpush.msra.mxu0 %v1700_v24  ;;  %v838_v23 = vadd.f32 %v837_v5, %v836_v50  ;;  %v863_v24 = vrot.slane %v862_v6, 2  ;;  %v876_v32 = vadd.f32 %v875_v15, %v874_v1  ;;  %v1688_v50 = vld [vmem:[#allocation28 + $0xe0] sm:$0xff]  ;;  %v1707_v5 = vld [vmem:[#allocation28 + $0x178] sm:$0xff] }
 0x37a   :  { %1772 = vmatpush.msrb.mxu1 %v1701_v26  ;;  %1635 = vmatpush.msra.mxu2 %v1540_v27  ;;  %v1713_v26 = vld [vmem:[#allocation28 + $0x1a8] sm:$0xff]  ;;  %v857_v27 = vadd.f32 %v856_v9, %v855_v56  ;;  %v870_v36 = vrot.slane %v869_v19, 2  ;;  %v1723_v56 = vld [vmem:[#allocation28 + $0x1f8] sm:$0xff] }
 0x37b   :  { %1654 = vmatpush.msrb.mxu3 %v1545_v31  ;;  %2677 = vmatmul.msk.f32.vlgmr.msra.gmra.mxu2 %vm484_vm0, %v3807_v53  ;;  %v851_v31 = vrot.slane %v850_v14, 1  ;;  %v864_v39 = vadd.f32 %v863_v24, %v862_v6  ;;  %v889_v40 = vmul.f32 %v3882_v28, %v838_v23  ;;  %v1988_v23 = vld [vmem:[%s4147_s29 + $0x8] sm:$0x1] }
 0x37c   :  { %1753 = vmatpush.msra.mxu0 %v1692_v33  ;;  %1773 = vmatpush.msrb.mxu1 %v1693_v34  ;;  %v1704_v33 = vld [vmem:[#allocation28 + $0x160] sm:$0xff]  ;;  %v1705_v34 = vld [vmem:[#allocation28 + $0x168] sm:$0xff]  ;;  %v871_v48 = vadd.f32 %v870_v36, %v869_v19  ;;  %v1691_v19 = vld [vmem:[#allocation28 + $0xf8] sm:$0xff] }
 0x37d   :  { %1655 = vmatpush.msrb.mxu3 %v1541_v37  ;;  %1790 = vmatpush.msrb.mxu2 %v1718_v38  ;;  %v1670_v37 = vld [vmem:[#allocation28 + $0x50] sm:$0xff]  ;;  %v1671_v38 = vld [vmem:[#allocation28 + $0x58] sm:$0xff]  ;;  %v852_v44 = vadd.f32 %v851_v31, %v850_v14  ;;  %v865_v52 = vrot.slane %v864_v39, 1 }
 0x37e   :  { %2678 = vmatmul.msk.f32.vlgmr.msrb.gmra.mxu3 %vm484_vm0, %v3807_v53  ;;  %1754 = vmatpush.msra.mxu0 %v1684_v43  ;;  %v858_v43 = vrot.slane %v857_v27, 1  ;;  %v872_v0 = vrot.slane %v871_v48, 1  ;;  %v1699_v14 = vld [vmem:[#allocation28 + $0x138] sm:$0xff] }
 0x37f   :  { %1774 = vmatpush.msrb.mxu1 %v1685_v45  ;;  %1810 = vmatpush.msra.mxu3 %v1719_v46  ;;  %v877_v45 = vrot.slane %v876_v32, 2  ;;  %v1662_v46 = vld [vmem:[#allocation28 + $0x10] sm:$0xff]  ;;  %v1987_v31 = vld [vmem:[%s4147_s29] sm:$0xff] }
 0x380   :  { %2675 = vmatmul.msk.f32.vlgmr.msrb.gmra.mxu0 %vm484_vm0, %v3807_v53  ;;  %2676 = vmatmul.msk.f32.vlgmr.msra.gmra.mxu1 %vm484_vm0, %v3807_v53  ;;  %v859_v57 = vadd.f32 %v858_v43, %v857_v27  ;;  %v873_v15 = vadd.f32 %v872_v0, %v871_v48  ;;  %v2020_v48 = vld [vmem:[#allocation32 + $0x20] sm:$0xff] }
 0x381   :  { %1755 = vmatpush.msra.mxu0 %v1676_v54  ;;  %1775 = vmatpush.msrb.mxu1 %v1677_v55  ;;  %v1948_v54 = vsel %vm1947_vm6, %v889_v40, %v888_v11  ;;  %v1722_v55 = vld [vmem:[#allocation28 + $0x1f0] sm:$0xff]  ;;  %v878_v60 = vadd.f32 %v877_v45, %v876_v32  ;;  %v2024_v40 = vld [vmem:[#allocation32 + $0x40] sm:$0x1]  ;;  %vm2569_vm6 = vcmask 1014784  }
 0x382   :  { %1791 = vmatpush.msrb.mxu2 %v1710_v58  ;;  %1811 = vmatpush.msra.mxu3 %v1711_v59  ;;  %v1680_v58 = vld [vmem:[#allocation28 + $0xa0] sm:$0xff]  ;;  %v1681_v59 = vld [vmem:[#allocation28 + $0xa8] sm:$0xff]  ;;  %v1950_v1 = vsel %vm1949_vm7, %v890_v49, %v1948_v54  ;;  %v892_v6 = vmul.f32 %v3882_v28, %v859_v57  ;;  %v894_v24 = vmul.f32 %v3882_v28, %v873_v15  ;;  %v2029_v45 = vld [vmem:[#allocation32 + $0x68] sm:$0x1] }
 0x383   :  { %1756 = vmatpush.msra.mxu0 %v1668_v61  ;;  %1776 = vmatpush.msrb.mxu1 %v1669_v62  ;;  %v891_v61 = vmul.f32 %v3882_v28, %v852_v44  ;;  %v1714_v62 = vld [vmem:[#allocation28 + $0x1b0] sm:$0xff]  ;;  %v879_v9 = vrot.slane %v878_v60, 1  ;;  %v2028_v44 = vld [vmem:[#allocation32 + $0x60] sm:$0x1]  ;;  %v2260_v54 = vld [vmem:[%s4148_s11] sm:$0xff] }
 0x384   :  { %1792 = vmatpush.msrb.mxu2 %v1702_v2  ;;  %1812 = vmatpush.msra.mxu3 %v1703_v3  ;;  %v1673_v2 = vld [vmem:[#allocation28 + $0x68] sm:$0xff]  ;;  %v866_v3 = vadd.f32 %v865_v52, %v864_v39  ;;  %v2021_v49 = vld [vmem:[#allocation32 + $0x28] sm:$0xff] }
 0x385   :  { %1757 = vmatpush.msra.mxu0 %v1660_v7  ;;  %1777 = vmatpush.msrb.mxu1 %v1661_v8  ;;  %v1664_v7 = vld [vmem:[#allocation28 + $0x20] sm:$0xff]  ;;  %v1665_v8 = vld [vmem:[#allocation28 + $0x28] sm:$0xff]  ;;  %v1952_v10 = vsel %vm1951_vm8, %v891_v61, %v1950_v1  ;;  %v1053_v61 = vld [vmem:[#allocation19] sm:$0xf] }
 0x386   :  { %1793 = vmatpush.msrb.mxu2 %v1694_v12  ;;  %1813 = vmatpush.msra.mxu3 %v1695_v13  ;;  %v1698_v13 = vld [vmem:[#allocation28 + $0x130] sm:$0xff]  ;;  %v1055_v1 = vperm.slane %v1053_v61, 0 }
 0x387   :  { %1830 = vmatpush.msrb.mxu0 %v1720_v16  ;;  %1850 = vmatpush.msra.mxu1 %v1721_v17  ;;  %v893_v16 = vmul.f32 %v3882_v28, %v866_v3  ;;  %v1954_v17 = vsel %vm1953_vm9, %v892_v6, %v1952_v10 }
 0x388   :  { %1794 = vmatpush.msrb.mxu2 %v1686_v20  ;;  %1814 = vmatpush.msra.mxu3 %v1687_v21  ;;  %v880_v20 = vadd.f32 %v879_v9, %v878_v60  ;;  %v2803_v21 = vld [vmem:[#allocation5] sm:$0xff] }
 0x389   :  { %1831 = vmatpush.msrb.mxu0 %v1712_v25  ;;  %1851 = vmatpush.msra.mxu1 %v1713_v26  ;;  %v1682_v25 = vld [vmem:[#allocation28 + $0xb0] sm:$0xff]  ;;  %v1683_v26 = vld [vmem:[#allocation28 + $0xb8] sm:$0xff]  ;;  %v1956_v27 = vsel %vm1955_vm10, %v893_v16, %v1954_v17 }
 0x38a   :  { %1795 = vmatpush.msrb.mxu2 %v1678_v29  ;;  %1815 = vmatpush.msra.mxu3 %v1679_v30  ;;  %v3907_v29 = vpop.f32.mrf.mxu1  ;;  %v1933_v30 = vld [vmem:[%s4146_s16] sm:$0xff]  ;;  %v895_v35 = vmul.f32 %v3882_v28, %v880_v20  ;;  %v1958_v36 = vsel %vm1957_vm12, %v894_v24, %v1956_v27  ;;  %v2016_v28 = vld [vmem:[#allocation32] sm:$0xff] }
 0x38b   :  { %1832 = vmatpush.msrb.mxu0 %v1704_v33  ;;  %1852 = vmatpush.msra.mxu1 %v1705_v34  ;;  %v1674_v33 = vld [vmem:[#allocation28 + $0x70] sm:$0xff]  ;;  %v1675_v34 = vld [vmem:[#allocation28 + $0x78] sm:$0xff]  ;;  %v3926_v43 = vpop.f32.mrf.mxu0 }
 0x38c   :  { %1796 = vmatpush.msrb.mxu2 %v1670_v37  ;;  %1816 = vmatpush.msra.mxu3 %v1671_v38  ;;  %v1666_v37 = vld [vmem:[#allocation28 + $0x30] sm:$0xff]  ;;  %v1667_v38 = vld [vmem:[#allocation28 + $0x38] sm:$0xff]  ;;  %v3918_v11 = vsel %vm1959_vm13, %v895_v35, %v1958_v36 }
 0x38d   :  { %1833 = vmatpush.msrb.mxu0 %v1696_v41  ;;  %1853 = vmatpush.msra.mxu1 %v1697_v42  ;;  %v2025_v41 = vld [vmem:[#allocation32 + $0x48] sm:$0x1]  ;;  %v2026_v36 = vld [vmem:[#allocation32 + $0x50] sm:$0x1] }
 0x38e   :  { %2679 = vmatmul.msk.f32.vlgmr.msra.gmra.mxu0 %vm484_vm0, %v3807_v53  ;;  %2680 = vmatmul.msk.f32.vlgmr.msrb.gmra.mxu1 %vm484_vm0, %v3807_v53  ;;  %v1672_v53 = vld [vmem:[#allocation28 + $0x60] sm:$0xff]  ;;  %v2017_v42 = vld [vmem:[#allocation32 + $0x8] sm:$0xff] }
 0x38f   :  { %1797 = vmatpush.msrb.mxu2 %v1662_v46  ;;  %1817 = vmatpush.msra.mxu3 %v1663_v47 }
 0x390   :  { %1834 = vmatpush.msrb.mxu0 %v1688_v50  ;;  %1854 = vmatpush.msra.mxu1 %v1689_v51  ;;  %v3896_v12 = vpop.f32.mrf.mxu3  ;;  %v2261_v50 = vld [vmem:[%s4148_s11 + $0x8] sm:$0x1] }
 0x391   :  { %1870 = vmatpush.msra.mxu2 %v1722_v55  ;;  %1890 = vmatpush.msrb.mxu3 %v1723_v56  ;;  %v3911_v32 = vpop.f32.mrf.mxu2  ;;  %v2290_v51 = vld [vmem:[%s4149_s28 + $0x8] sm:$0x1]  ;;  %v2289_v55 = vld [vmem:[%s4149_s28] sm:$0xff] }
 0x392   :  { %1835 = vmatpush.msrb.mxu0 %v1680_v58  ;;  %1855 = vmatpush.msra.mxu1 %v1681_v59  ;;  %v928_v59 = vld [vmem:[#allocation16] sm:$0xf] }
 0x393   :  { %1871 = vmatpush.msra.mxu2 %v1714_v62  ;;  %1891 = vmatpush.msrb.mxu3 %v1715_v63  ;;  %v3930_v46 = vpop.f32.mrf.mxu1  ;;  %v930_v62 = vperm.slane %v928_v59, 0  ;;  %v931_v63 = vperm.slane %v928_v59, 1  ;;  %v932_v0 = vperm.slane %v928_v59, 2 }
 0x394   :  { %1836 = vmatpush.msrb.mxu0 %v1672_v53  ;;  %1856 = vmatpush.msra.mxu1 %v1673_v2  ;;  %v1056_v53 = vperm.slane %v1053_v61, 1  ;;  %v1057_v2 = vperm.slane %v1053_v61, 2 }
 0x395   :  { %1872 = vmatpush.msra.mxu2 %v1706_v4  ;;  %1892 = vmatpush.msrb.mxu3 %v1707_v5  ;;  %v933_v4 = vperm.slane %v928_v59, 3 }
 0x396   :  { %1837 = vmatpush.msrb.mxu0 %v1664_v7  ;;  %1857 = vmatpush.msra.mxu1 %v1665_v8 }
 0x397   :  { %1873 = vmatpush.msra.mxu2 %v1698_v13  ;;  %1893 = vmatpush.msrb.mxu3 %v1699_v14  ;;  %v1058_v13 = vperm.slane %v1053_v61, 3  ;;  %v2030_v61 = vld [vmem:[#allocation32 + $0x70] sm:$0x1] }
 0x398   :  { %2681 = vmatmul.msk.f32.vlgmr.msrb.gmra.mxu2 %vm484_vm0, %v2803_v21  ;;  %2682 = vmatmul.msk.f32.vlgmr.msra.gmra.mxu3 %vm484_vm0, %v2803_v21 }
 0x399   :  { %2683 = vmatmul.msk.f32.vlgmr.msrb.gmra.mxu0 %vm484_vm0, %v2803_v21  ;;  %2684 = vmatmul.msk.f32.vlgmr.msra.gmra.mxu1 %vm484_vm0, %v2803_v21  ;;  %v3916_v39 = vpop.f32.mrf.mxu3 }
 0x39a   :  { %1874 = vmatpush.msra.mxu2 %v1690_v18  ;;  %1894 = vmatpush.msrb.mxu3 %v1691_v19  ;;  %v3932_v47 = vpop.f32.mrf.mxu2 }
 0x39b   :  { %2687 = vmatpush.msk.msra.mxu0 %vm1963_vm11, %v1934_v22  ;;  %2689 = vmatpush.msk.msrb.mxu1 %vm1963_vm11, %v1988_v23 }
 0x39c   :  { %1875 = vmatpush.msra.mxu2 %v1682_v25  ;;  %1895 = vmatpush.msrb.mxu3 %v1683_v26 }
 0x39d   :  { %1982 = vmatpush.msra.mxu0 %v1933_v30  ;;  %2011 = vmatpush.msrb.mxu1 %v1987_v31 }
 0x39e   :  { %1876 = vmatpush.msra.mxu2 %v1674_v33  ;;  %1896 = vmatpush.msrb.mxu3 %v1675_v34 }
 0x39f   :  { %2695 = vmatpush.msk.msrb.mxu0 %vm1963_vm11, %v2026_v36  ;;  %v2326_v36 = vld [vmem:[#allocation35 + $0x40] sm:$0x1] }
 0x3a0   :  { %1877 = vmatpush.msra.mxu2 %v1666_v37  ;;  %1897 = vmatpush.msrb.mxu3 %v1667_v38  ;;  %v2027_v37 = vld [vmem:[#allocation32 + $0x58] sm:$0x1] }
 0x3a1   :  { %2685 = vmatmul.msk.f32.vlgmr.msra.gmra.mxu2 %vm484_vm0, %v2803_v21  ;;  %2686 = vmatmul.msk.f32.vlgmr.msrb.gmra.mxu3 %vm484_vm0, %v2803_v21 }
 0x3a2   :  { %2688 = vmatmul.msk.f32.vlgmr.msra.gmra.mxu0 %vm824_vm4, %v3918_v11  ;;  %2690 = vmatmul.msk.f32.vlgmr.msrb.gmra.mxu1 %vm824_vm4, %v3918_v11  ;;  %v3938_v52 = vpop.f32.mrf.mxu3  ;;  %v958_v56 = vpop.f32.mrf.mxu0 }
 0x3a3   :  { %2691 = vmatpush.msk.msrb.mxu2 %vm1963_vm11, %v2024_v40  ;;  %2693 = vmatpush.msk.msra.mxu3 %vm1963_vm11, %v2025_v41  ;;  %v959_v3 = vadd.f32 %v958_v56, %v930_v62  ;;  %v2031_v62 = vld [vmem:[#allocation32 + $0x78] sm:$0x1] }
 0x3a4   :  { %2697 = vmatpush.msk.msra.mxu1 %vm1963_vm11, %v2027_v37  ;;  %v2327_v37 = vld [vmem:[#allocation35 + $0x48] sm:$0x1] }
 0x3a5   :  { %2089 = vmatpush.msrb.mxu2 %v2016_v28  ;;  %2109 = vmatpush.msra.mxu3 %v2017_v42  ;;  %v1448_v42 = vld [vmem:[#allocation23] sm:$0xf] }
 0x3a7   :  { %2699 = vmatpush.msk.msra.mxu2 %vm1963_vm11, %v2028_v44  ;;  %2701 = vmatpush.msk.msrb.mxu3 %vm1963_vm11, %v2029_v45  ;;  %v1570_v44 = vld [vmem:[#allocation26] sm:$0xf] }
 0x3a8   :  { %v2018_v45 = vld [vmem:[#allocation32 + $0x10] sm:$0xff]  ;;  %v1573_v56 = vperm.slane %v1570_v44, 1 }
 0x3a9   :  { %2169 = vmatpush.msra.mxu2 %v2020_v48  ;;  %2189 = vmatpush.msrb.mxu3 %v2021_v49  ;;  %v978_v57 = vpop.f32.mrf.mxu1  ;;  %v2019_v48 = vld [vmem:[#allocation32 + $0x18] sm:$0xff]  ;;  %v1450_v49 = vperm.slane %v1448_v42, 0 }
 0x3aa   :  { %2692 = vmatmul.msk.f32.vlgmr.msrb.gmra.mxu2 %vm824_vm4, %v3918_v11  ;;  %2694 = vmatmul.msk.f32.vlgmr.msra.gmra.mxu3 %vm824_vm4, %v3918_v11  ;;  %v998_v58 = vpop.f32.mrf.mxu2  ;;  %v979_v5 = vadd.f32 %v978_v57, %v931_v63  ;;  %v1574_v57 = vperm.slane %v1570_v44, 2 }
 0x3ab   :  { %2707 = vmatpush.msk.msrb.mxu2 %vm1963_vm11, %v2261_v50  ;;  %2709 = vmatpush.msk.msra.mxu3 %vm1963_vm11, %v2290_v51  ;;  %v999_v6 = vadd.f32 %v998_v58, %v932_v0  ;;  %v1451_v50 = vperm.slane %v1448_v42, 1 }
 0x3ac   :  { %v1018_v60 = vpop.f32.mrf.mxu3  ;;  %2129 = vmatpush.msrb.mxu0 %v2018_v45  ;;  %2149 = vmatpush.msra.mxu1 %v2019_v48  ;;  %v2325_v45 = vld [vmem:[#allocation35 + $0x38] sm:$0xff]  ;;  %v2330_v48 = vld [vmem:[#allocation35 + $0x60] sm:$0x1] }
 0x3ad   :  { %2284 = vmatpush.msrb.mxu2 %v2260_v54  ;;  %2313 = vmatpush.msra.mxu3 %v2289_v55  ;;  %v1019_v16 = vadd.f32 %v1018_v60, %v933_v4  ;;  %v1452_v54 = vperm.slane %v1448_v42, 2  ;;  %v1572_v55 = vperm.slane %v1570_v44, 0  ;;  %v1453_v60 = vperm.slane %v1448_v42, 3  ;;  %v2319_v42 = vld [vmem:[#allocation35 + $0x8] sm:$0xff] }
 0x3ae   :  { %2696 = vmatmul.msk.f32.vlgmr.msrb.gmra.mxu0 %vm824_vm4, %v3918_v11  ;;  %2698 = vmatmul.msk.f32.vlgmr.msra.gmra.mxu1 %vm824_vm4, %v3918_v11  ;;  %v1575_v4 = vperm.slane %v1570_v44, 3  ;;  %v2324_v44 = vld [vmem:[#allocation35 + $0x30] sm:$0xff] }
 0x3af   :  { %2703 = vmatpush.msk.msra.mxu0 %vm1963_vm11, %v2030_v61  ;;  %2705 = vmatpush.msk.msrb.mxu1 %vm1963_vm11, %v2031_v62 }
 0x3b2   :  { %2700 = vmatmul.msk.f32.vlgmr.msra.gmra.mxu2 %vm824_vm4, %v3918_v11  ;;  %2702 = vmatmul.msk.f32.vlgmr.msrb.gmra.mxu3 %vm824_vm4, %v3918_v11 }
 0x3b5   :  { %v1080_v7 = vpop.f32.mrf.mxu0  ;;  %v1120_v10 = vpop.f32.mrf.mxu2 }
 0x3b6   :  { %v1081_v8 = vadd.f32 %v1080_v7, %v1055_v1  ;;  %v1100_v9 = vpop.f32.mrf.mxu1  ;;  %v1121_v15 = vadd.f32 %v1120_v10, %v1057_v2  ;;  %v2023_v7 = vld [vmem:[#allocation32 + $0x38] sm:$0xff] }
 0x3b7   :  { %v1101_v14 = vadd.f32 %v1100_v9, %v1056_v53  ;;  %2229 = vmatpush.msrb.mxu1 %v2023_v7 }
 0x3b8   :  { %v1385_v17 = vmul.f32 %v1081_v8, %v959_v3  ;;  %v1387_v19 = vmul.f32 %v1121_v15, %v999_v6  ;;  %v2022_v6 = vld [vmem:[#allocation32 + $0x30] sm:$0xff]  ;;  %2706 = vmatmul.msk.f32.vlgmr.msrb.gmra.mxu1 %vm824_vm4, %v3918_v11 }
 0x3b9   :  { %v1386_v18 = vmul.f32 %v1101_v14, %v979_v5  ;;  %2209 = vmatpush.msra.mxu0 %v2022_v6  ;;  %2713 = vmatpush.msk.msra.mxu1 %vm1963_vm11, %v2327_v37 }
 0x3ba   :  { %2708 = vmatmul.msk.f32.vlgmr.msrb.gmra.mxu2 %vm824_vm4, %v3918_v11  ;;  %2710 = vmatmul.msk.f32.vlgmr.msra.gmra.mxu3 %vm824_vm4, %v3918_v11  ;;  %v1140_v20 = vpop.f32.mrf.mxu3 }
 0x3bb   :  { %v1141_v21 = vadd.f32 %v1140_v20, %v1058_v13  ;;  %v1389_v22 = vadd.f32 %v1386_v18, %v1385_v17  ;;  %2704 = vmatmul.msk.f32.vlgmr.msra.gmra.mxu0 %vm824_vm4, %v3918_v11  ;;  %v2329_v20 = vld [vmem:[#allocation35 + $0x58] sm:$0x1]  ;;  %2411 = vmatpush.msra.mxu1 %v2319_v42 }
 0x3bc   :  { %2717 = vmatpush.msk.msrb.mxu3 %vm1963_vm11, %v2329_v20  ;;  %2711 = vmatpush.msk.msrb.mxu0 %vm1963_vm11, %v2326_v36 }
 0x3bd   :  { %v1388_v23 = vmul.f32 %v1141_v21, %v1019_v16  ;;  %v1390_v24 = vadd.f32 %v1389_v22, %v1387_v19  ;;  %v2328_v19 = vld [vmem:[#allocation35 + $0x50] sm:$0x1] }
 0x3be   :  { %2715 = vmatpush.msk.msra.mxu2 %vm1963_vm11, %v2328_v19 }
 0x3bf   :  { %v1391_v25 = vadd.f32 %v1390_v24, %v1388_v23  ;;  %v2320_v24 = vld [vmem:[#allocation35 + $0x10] sm:$0xff] }
 0x3c0   :  { %2431 = vmatpush.msra.mxu2 %v2320_v24  ;;  %2714 = vmatmul.msk.f32.vlgmr.msra.gmra.mxu1 %vm824_vm4, %v3918_v11 }
 0x3c1   :  { %1392 = vadd.xlane.f32.xlu0 %v1391_v25  ;;  %v2321_v25 = vld [vmem:[#allocation35 + $0x18] sm:$0xff] }
 0x3c2   :  { %2451 = vmatpush.msrb.mxu3 %v2321_v25  ;;  %2716 = vmatmul.msk.f32.vlgmr.msra.gmra.mxu2 %vm824_vm4, %v3918_v11 }
 0x3c3   :  { %2718 = vmatmul.msk.f32.vlgmr.msrb.gmra.mxu3 %vm824_vm4, %v3918_v11 }
 0x3cc   :  { %v3956_v26 = vpop.f32.mrf.mxu0 }
 0x3cd   :  { %v3958_v27 = vpop.f32.mrf.mxu1 }
 0x3d9   :  { %v3960_v30 = vpop.f32.mrf.mxu2 }
 0x3dc   :  { %v3962_v31 = vpop.f32.mrf.mxu3 }
 0x3de   :  { %v3964_v33 = vpop.f32.mrf.mxu0 }
 0x3df   :  { %v3966_v34 = vpop.f32.mrf.mxu1 }
 0x3ea   :  { %v3968_v35 = vpop.f32.mrf.mxu2 }
 0x3ed   :  { %v3972_v38 = vpop.f32.mrf.mxu3 }
 0x3f1   :  { %v1475_v40 = vpop.f32.mrf.mxu0  ;;  %v1495_v41 = vpop.f32.mrf.mxu1 }
 0x3f2   :  { %v1476_v58 = vadd.f32 %v1475_v40, %v1450_v49  ;;  %v1496_v59 = vadd.f32 %v1495_v41, %v1451_v50  ;;  %v2332_v40 = vld [vmem:[#allocation35 + $0x70] sm:$0x1]  ;;  %v2333_v41 = vld [vmem:[#allocation35 + $0x78] sm:$0x1] }
 0x3f3   :  { %2723 = vmatpush.msk.msrb.mxu2 %vm1963_vm11, %v2332_v40  ;;  %2725 = vmatpush.msk.msra.mxu3 %vm1963_vm11, %v2333_v41 }
 0x3f4   :  { %v1515_v28 = vpop.f32.mrf.mxu2 }
 0x3f5   :  { %v1516_v63 = vadd.f32 %v1515_v28, %v1452_v54  ;;  %v2318_v28 = vld [vmem:[#allocation35] sm:$0xff]  ;;  %2511 = vmatpush.msrb.mxu2 %v2324_v44  ;;  %2531 = vmatpush.msra.mxu3 %v2325_v45 }
 0x3f6   :  { %2391 = vmatpush.msrb.mxu0 %v2318_v28  ;;  %v2322_v54 = vld [vmem:[#allocation35 + $0x20] sm:$0xff]  ;;  %2724 = vmatmul.msk.f32.vlgmr.msrb.gmra.mxu2 %vm824_vm4, %v3918_v11 }
 0x3f7   :  { %2712 = vmatmul.msk.f32.vlgmr.msrb.gmra.mxu0 %vm824_vm4, %v3918_v11  ;;  %2726 = vmatmul.msk.f32.vlgmr.msra.gmra.mxu3 %vm824_vm4, %v3918_v11 }
 0x3f8   :  { %v1535_v51 = vpop.f32.mrf.mxu3  ;;  %2719 = vmatpush.msk.msra.mxu0 %vm1963_vm11, %v2330_v48 }
 0x3f9   :  { %v1536_v8 = vadd.f32 %v1535_v51, %v1453_v60  ;;  %v2331_v51 = vld [vmem:[#allocation35 + $0x68] sm:$0x1] }
 0x3fa   :  { %2721 = vmatpush.msk.msrb.mxu1 %vm1963_vm11, %v2331_v51  ;;  %2471 = vmatpush.msra.mxu0 %v2322_v54  ;;  %v2799_v51 = vld [vmem:[%s4153_s26] ss:$0 sm:$0xff]  ;;  %v2800_v54 = vld [vmem:[#allocation34] ss:$0 sm:$0xff] }
 0x3fd   :  { %v1597_v0 = vpop.f32.mrf.mxu0  ;;  %v1617_v1 = vpop.f32.mrf.mxu1 }
 0x3fe   :  { %v1598_v53 = vadd.f32 %v1597_v0, %v1572_v55  ;;  %v1618_v2 = vadd.f32 %v1617_v1, %v1573_v56  ;;  %v1637_v3 = vpop.f32.mrf.mxu2  ;;  %v2323_v55 = vld [vmem:[#allocation35 + $0x28] sm:$0xff] }
 0x3ff   :  { %v1638_v5 = vadd.f32 %v1637_v3, %v1574_v57  ;;  %2491 = vmatpush.msrb.mxu1 %v2323_v55  ;;  %2720 = vmatmul.msk.f32.vlgmr.msra.gmra.mxu0 %vm824_vm4, %v3918_v11 }
 0x400   :  { %v1902_v9 = vmul.f32 %v1598_v53, %v1476_v58  ;;  %v1903_v10 = vmul.f32 %v1618_v2, %v1496_v59  ;;  %2722 = vmatmul.msk.f32.vlgmr.msrb.gmra.mxu1 %vm824_vm4, %v3918_v11  ;;  %v2797_v58 = vld [vmem:[%s4150_s5] ss:$0 sm:$0xff]  ;;  %v2798_v59 = vld [vmem:[#allocation31] ss:$0 sm:$0xff] }
 0x401   :  { %v1904_v13 = vmul.f32 %v1638_v5, %v1516_v63  ;;  %v1657_v14 = vpop.f32.mrf.mxu3  ;;  %v4031_v11 = vld [vmem:[%s4151_s1] sm:$0xff] }
 0x402   :  { %v1906_v15 = vadd.f32 %v1903_v10, %v1902_v9  ;;  %v1658_v16 = vadd.f32 %v1657_v14, %v1575_v4  ;;  %v637_v5 = vperm.slane %v4031_v11, 1  ;;  %v640_v6 = vperm.slane %v4031_v11, 4 }
 0x403   :  { %v636_v7 = vperm.slane %v4031_v11, 0  ;;  %v641_v14 = vperm.slane %v4031_v11, 5  ;;  %v643_v19 = vperm.slane %v4031_v11, 7 }
 0x404   :  { %v1905_v17 = vmul.f32 %v1658_v16, %v1536_v8  ;;  %v1907_v18 = vadd.f32 %v1906_v15, %v1904_v13  ;;  %v1207_v8 = vld [vmem:[%s4152_s19] sm:$0xff]  ;;  %v638_v13 = vperm.slane %v4031_v11, 2  ;;  %v639_v15 = vperm.slane %v4031_v11, 3 }
 0x405   :  { %v642_v16 = vperm.slane %v4031_v11, 6  ;;  %v1209_v20 = vperm.slane %v1207_v8, 0  ;;  %v753_v24 = vadd.f32 %v3926_v43, %v640_v6  ;;  %v1211_v25 = vperm.slane %v1207_v8, 2 }
 0x406   :  { %v1908_v21 = vadd.f32 %v1907_v18, %v1905_v17  ;;  %v693_v18 = vadd.f32 %v3907_v29, %v637_v5  ;;  %v1212_v36 = vperm.slane %v1207_v8, 3  ;;  %v1210_v37 = vperm.slane %v1207_v8, 1 }
 0x407   :  { %v1213_v40 = vperm.slane %v1207_v8, 4  ;;  %v1214_v41 = vperm.slane %v1207_v8, 5  ;;  %v1215_v28 = vperm.slane %v1207_v8, 6  ;;  %v673_v44 = vadd.f32 %v3896_v12, %v636_v7 }
 0x408   :  { %1909 = vadd.xlane.f32.xlu0 %v1908_v21  ;;  %v713_v45 = vadd.f32 %v3911_v32, %v638_v13  ;;  %v733_v29 = vadd.f32 %v3916_v39, %v639_v15  ;;  %v1216_v48 = vperm.slane %v1207_v8, 7  ;;  %v793_v55 = vadd.f32 %v3932_v47, %v642_v16 }
 0x409   :  { %v813_v43 = vadd.f32 %v3938_v52, %v643_v19  ;;  %v1263_v12 = vadd.f32 %v3958_v27, %v1210_v37  ;;  %v1323_v32 = vadd.f32 %v3964_v33, %v1213_v40  ;;  %v1343_v39 = vadd.f32 %v3966_v34, %v1214_v41 }
 0x40a   :  { %v1383_v52 = vadd.f32 %v3972_v38, %v1216_v48  ;;  %v773_v19 = vadd.f32 %v3930_v46, %v641_v14 }
 0x40b   :  { %v3986_v22 = vpop.f32.mrf.mxu0  ;;  %v3988_v23 = vpop.f32.mrf.mxu1 }
 0x416   :  { %v4002_v49 = vpop.f32.mrf.mxu0  ;;  %v4004_v50 = vpop.f32.mrf.mxu1 }
 0x41b   :  { %v4012_v56 = vpop.f32.mrf.mxu2  ;;  %v4014_v57 = vpop.f32.mrf.mxu3 }
 0x41f   :  { %v1984_v60 = vpop.f32.mrf.mxu0  ;;  %v2013_v61 = vpop.f32.mrf.mxu1 }
 0x420   :  { %v1985_v62 = vadd.f32 %v2797_v58, %v1984_v60  ;;  %v2014_v63 = vadd.f32 %v2798_v59, %v2013_v61  ;;  %v1243_v58 = vadd.f32 %v3956_v26, %v1209_v20  ;;  %v1283_v59 = vadd.f32 %v3960_v30, %v1211_v25  ;;  %v1724_v25 = vld [vmem:[#allocation29] sm:$0xff] }
 0x421   :  { %v1303_v60 = vadd.f32 %v3962_v31, %v1212_v36  ;;  %v1726_v40 = vperm.slane %v1724_v25, 0  ;;  %v1727_v41 = vperm.slane %v1724_v25, 1  ;;  %v1730_v48 = vperm.slane %v1724_v25, 4 }
 0x422   :  { %v2234_v0 = vmul.f32 %v2014_v63, %v1985_v62  ;;  %v1363_v62 = vadd.f32 %v3968_v35, %v1215_v28  ;;  %v1728_v28 = vperm.slane %v1724_v25, 2 }
 0x423   :  { %v1780_v46 = vadd.f32 %v3988_v23, %v1727_v41 }
 0x424   :  { %v4021_v1 = vpop.f32.mrf.mxu2  ;;  %v2235_v53 = vsel %vm484_vm0, %v2234_v0, 0.0  ;;  %v4024_v2 = vpop.f32.mrf.mxu3  ;;  %v1800_v14 = vadd.f32 %v4012_v56, %v1728_v28 }
 0x425   :  { %2236 = vadd.xlane.f32.xlu1 %v2235_v53 }
 0x42d   :  { %v4026_v3 = vpop.f32.mrf.mxu2  ;;  %v4028_v4 = vpop.f32.mrf.mxu3 }
 0x434   :  { %v1393_v17 = vpop.xlane.xlu0 %1392 }
 0x435   :  { %v4037_v9 = vpop.f32.mrf.mxu2  ;;  %v4039_v10 = vpop.f32.mrf.mxu3  ;;  %v1394_v21 = vmul.f32 0.044194173, %v1393_v17 }
 0x437   :  { %v1395_v42 = vand.u32 2147483647, %v1394_v21 }
 0x439   :  { %vm1396_vm14 = vcmp.eq.f32.partialorder %v1395_v42, inf  ;;  %v1729_v42 = vperm.slane %v1724_v25, 3 }
 0x43a   :  { %v1397_v61 = vsel %vm1396_vm14, 0.0, %v1394_v21 }
 0x43b   :  { %vm1398_vm15 = vcmp.ne.f32.partialorder %v1397_v61, %v1397_v61 }
 0x43c   :  { %v1399_v53 = vsel %vm1398_vm15, %v1397_v61, 1.0  ;;  %v1840_v61 = vadd.f32 %v4002_v49, %v1730_v48 }
 0x43d   :  { %v2286_v63 = vpop.f32.mrf.mxu2  ;;  %v2315_v47 = vpop.f32.mrf.mxu3  ;;  %v1400_v30 = vmul.f32 %v1399_v53, %v1243_v58  ;;  %v1401_v11 = vmul.f32 %v1399_v53, %v1263_v12  ;;  %v1402_v31 = vmul.f32 %v1399_v53, %v1283_v59  ;;  %v1403_v5 = vmul.f32 %v1399_v53, %v1303_v60 }
 0x43e   :  { %v2287_v26 = vadd.f32 %v2799_v51, %v2286_v63  ;;  %v2316_v0 = vadd.f32 %v2800_v54, %v2315_v47  ;;  %v1406_v6 = vmul.f32 %v1399_v53, %v1363_v62  ;;  %v1407_v7 = vmul.f32 %v1399_v53, %v1383_v52 }
 0x43f   :  { %v1404_v33 = vmul.f32 %v1399_v53, %v1323_v32  ;;  %v1408_v8 = vadd.f32 %v1400_v30, %v673_v44  ;;  %v1409_v34 = vadd.f32 %v1401_v11, %v693_v18  ;;  %v1410_v13 = vadd.f32 %v1402_v31, %v713_v45 }
 0x440   :  { %v2536_v27 = vmul.f32 %v2316_v0, %v2287_v26  ;;  %v1411_v35 = vadd.f32 %v1403_v5, %v733_v29  ;;  %v1414_v16 = vadd.f32 %v1406_v6, %v793_v55  ;;  %v1415_v17 = vadd.f32 %v1407_v7, %v813_v43  ;;  %v2131_v6 = vpop.f32.mrf.mxu0  ;;  %v2151_v7 = vpop.f32.mrf.mxu1 }
 0x441   :  { %v1412_v38 = vadd.f32 %v1404_v33, %v753_v24  ;;  %v1405_v20 = vmul.f32 %v1399_v53, %v1343_v39  ;;  %v1732_v44 = vperm.slane %v1724_v25, 6  ;;  %v1733_v45 = vperm.slane %v1724_v25, 7  ;;  %v2032_v53 = vld [vmem:[%s4154_s30] sm:$0xff] }
 0x442   :  { %v2537_v15 = vsel %vm484_vm0, %v2536_v27, 0.0  ;;  %v1760_v29 = vadd.f32 %v3986_v22, %v1726_v40  ;;  %v1731_v24 = vperm.slane %v1724_v25, 5  ;;  %v1820_v54 = vadd.f32 %v4014_v57, %v1729_v42  ;;  %v2334_v42 = vld [vmem:[%s3636_s27] sm:$0xff]  ;;  %s3447_s27 = smov [#allocation37]  }
 0x443   :  { %2538 = vadd.xlane.f32.xlu1 %v2537_v15  ;;  %v1413_v21 = vadd.f32 %v1405_v20, %v773_v19  ;;  %v1880_v55 = vadd.f32 %v4021_v1, %v1732_v44  ;;  %v1900_v43 = vadd.f32 %v4024_v2, %v1733_v45  ;;  %v2035_v11 = vperm.slane %v2032_v53, 1  ;;  %s2583_s23 = sshll.u32 %s3447_s27, 4  ;;  %s2584_s23 = int_to_ptr.vmem [resolvable:$true] %s2583_s23 }
 0x444   :  { %v1860_v32 = vadd.f32 %v4004_v50, %v1731_v24  ;;  %v2034_v50 = vperm.slane %v2032_v53, 0  ;;  %v2038_v5 = vperm.slane %v2032_v53, 4  ;;  %v2039_v27 = vperm.slane %v2032_v53, 5 }
 0x445   :  { %v2433_v41 = vpop.f32.mrf.mxu2  ;;  %v2036_v28 = vperm.slane %v2032_v53, 2  ;;  %v2040_v44 = vperm.slane %v2032_v53, 6  ;;  %v2336_v48 = vperm.slane %v2334_v42, 0  ;;  %v2337_v24 = vperm.slane %v2334_v42, 1 }
 0x47b   :  { %v1910_v36 = vpop.xlane.xlu0 %1909 }
 0x47c   :  { %v1911_v37 = vmul.f32 0.044194173, %v1910_v36 }
 0x47e   :  { %v1912_v18 = vand.u32 2147483647, %v1911_v37 }
 0x480   :  { %vm1913_vm1 = vcmp.eq.f32.partialorder %v1912_v18, inf  ;;  %v2132_v18 = vadd.f32 %v2131_v6, %v2036_v28 }
 0x481   :  { %v1914_v51 = vsel %vm1913_vm1, 0.0, %v1911_v37  ;;  %v2231_v37 = vpop.f32.mrf.mxu1 }
 0x482   :  { %vm1915_vm0 = vcmp.ne.f32.partialorder %v1914_v51, %v1914_v51 }
 0x483   :  { %v1916_v58 = vsel %vm1915_vm0, %v1914_v51, 1.0 }
 0x484   :  { %v1917_v59 = vmul.f32 %v1916_v58, %v1760_v29  ;;  %v1918_v60 = vmul.f32 %v1916_v58, %v1780_v46  ;;  %v1919_v12 = vmul.f32 %v1916_v58, %v1800_v14  ;;  %v1920_v22 = vmul.f32 %v1916_v58, %v1820_v54 }
 0x485   :  { %v1923_v23 = vmul.f32 %v1916_v58, %v1880_v55  ;;  %v1924_v39 = vmul.f32 %v1916_v58, %v1900_v43  ;;  %v1921_v47 = vmul.f32 %v1916_v58, %v1840_v61  ;;  %v1922_v52 = vmul.f32 %v1916_v58, %v1860_v32  ;;  %v2513_v32 = vpop.f32.mrf.mxu2 }
 0x486   :  { %v1925_v56 = vadd.f32 %v1917_v59, %v1408_v8  ;;  %v1926_v62 = vadd.f32 %v1918_v60, %v1409_v34  ;;  %v4072_v57 = vadd.f32 %v1919_v12, %v1410_v13  ;;  %v4074_v63 = vadd.f32 %v1920_v22, %v1411_v35 }
 0x487   :  { %v4076_v1 = vadd.f32 %v1923_v23, %v1414_v16  ;;  %v4078_v2 = vadd.f32 %v1924_v39, %v1415_v17  ;;  %v1929_v26 = vadd.f32 %v1921_v47, %v1412_v38  ;;  %v1930_v0 = vadd.f32 %v1922_v52, %v1413_v21 }
 0x488   :  { %v2092_v8 = vadd.f32 %v4026_v3, %v2034_v50  ;;  %v2112_v34 = vadd.f32 %v4028_v4, %v2035_v11  ;;  %v2172_v13 = vadd.f32 %v4037_v9, %v2038_v5  ;;  %v2192_v35 = vadd.f32 %v4039_v10, %v2039_v27  ;;  %v2211_v3 = vpop.f32.mrf.mxu0  ;;  %v2453_v9 = vpop.f32.mrf.mxu3 }
 0x489   :  { %v2413_v40 = vpop.f32.mrf.mxu1  ;;  %v2037_v10 = vperm.slane %v2032_v53, 3  ;;  %v2041_v29 = vperm.slane %v2032_v53, 7  ;;  %v2340_v14 = vperm.slane %v2334_v42, 4  ;;  %v2341_v54 = vperm.slane %v2334_v42, 5 }
 0x48a   :  { %v2338_v55 = vperm.slane %v2334_v42, 2  ;;  %v2339_v43 = vperm.slane %v2334_v42, 3  ;;  %v2342_v12 = vperm.slane %v2334_v42, 6  ;;  %v2212_v61 = vadd.f32 %v2211_v3, %v2040_v44 }
 0x48b   :  { %v2152_v46 = vadd.f32 %v2151_v7, %v2037_v10  ;;  %v2343_v23 = vperm.slane %v2334_v42, 7  ;;  %v2232_v39 = vadd.f32 %v2231_v37, %v2041_v29 }
 0x48c   :  { %v2514_v50 = vadd.f32 %v2513_v32, %v2342_v12 }
 0x490   :  { %v2393_v4 = vpop.f32.mrf.mxu0  ;;  %v2533_v47 = vpop.f32.mrf.mxu3 }
 0x491   :  { %v2493_v60 = vpop.f32.mrf.mxu1  ;;  %v2534_v27 = vadd.f32 %v2533_v47, %v2343_v23 }
 0x492   :  { %v2494_v53 = vadd.f32 %v2493_v60, %v2341_v54 }
 0x498   :  { %v2237_v49 = vpop.xlane.xlu1 %2236  ;;  %v2473_v59 = vpop.f32.mrf.mxu0 }
 0x499   :  { %v2238_v30 = vmul.f32 0.125, %v2237_v49  ;;  %v2434_v49 = vadd.f32 %v2433_v41, %v2338_v55 }
 0x49b   :  { %v2239_v31 = vand.u32 2147483647, %v2238_v30 }
 0x49d   :  { %vm2240_vm2 = vcmp.eq.f32.partialorder %v2239_v31, inf }
 0x49e   :  { %v2241_v33 = vsel %vm2240_vm2, 0.0, %v2238_v30  ;;  %v2454_v30 = vadd.f32 %v2453_v9, %v2339_v43 }
 0x49f   :  { %vm2242_vm3 = vcmp.ne.f32.partialorder %v2241_v33, %v2241_v33 }
 0x4a0   :  { %v2243_v15 = vsel %vm2242_vm3, %v2241_v33, 1.0 }
 0x4a1   :  { %v2244_v16 = vmul.f32 %v2243_v15, %v2092_v8  ;;  %v2245_v17 = vmul.f32 %v2243_v15, %v2112_v34  ;;  %v2248_v38 = vmul.f32 %v2243_v15, %v2172_v13  ;;  %v2249_v19 = vmul.f32 %v2243_v15, %v2192_v35 }
 0x4a2   :  { %v2246_v22 = vmul.f32 %v2243_v15, %v2132_v18  ;;  %v2247_v52 = vmul.f32 %v2243_v15, %v2152_v46  ;;  %v2250_v31 = vmul.f32 %v2243_v15, %v2212_v61  ;;  %v2251_v13 = vmul.f32 %v2243_v15, %v2232_v39 }
 0x4a3   :  { %v2252_v20 = vadd.f32 %v2244_v16, %v1925_v56  ;;  %v2253_v21 = vadd.f32 %v2245_v17, %v1926_v62  ;;  %v4085_v25 = vadd.f32 %v2248_v38, %v1929_v26  ;;  %v4087_v36 = vadd.f32 %v2249_v19, %v1930_v0 }
 0x4a4   :  { %v2394_v56 = vadd.f32 %v2393_v4, %v2336_v48  ;;  %v2414_v62 = vadd.f32 %v2413_v40, %v2337_v24  ;;  %v2474_v0 = vadd.f32 %v2473_v59, %v2340_v14  ;;  %v2254_v11 = vadd.f32 %v2246_v22, %v4072_v57 }
 0x4a5   :  { %v2255_v34 = vadd.f32 %v2247_v52, %v4074_v63  ;;  %v2258_v57 = vadd.f32 %v2250_v31, %v4076_v1  ;;  %v2259_v41 = vadd.f32 %v2251_v13, %v4078_v2 }
 0x4b6   :  { %v2539_v45 = vpop.xlane.xlu1 %2538 }
 0x4b7   :  { %v2540_v51 = vmul.f32 0.125, %v2539_v45 }
 0x4b9   :  { %v2541_v58 = vand.u32 2147483647, %v2540_v51 }
 0x4bb   :  { %vm2542_vm4 = vcmp.eq.f32.partialorder %v2541_v58, inf }
 0x4bc   :  { %v2543_v26 = vsel %vm2542_vm4, 0.0, %v2540_v51 }
 0x4bd   :  { %vm2544_vm5 = vcmp.ne.f32.partialorder %v2543_v26, %v2543_v26 }
 0x4be   :  { %v2545_v5 = vsel %vm2544_vm5, %v2543_v26, 1.0 }
 0x4bf   :  { %v2546_v6 = vmul.f32 %v2545_v5, %v2394_v56  ;;  %v2547_v7 = vmul.f32 %v2545_v5, %v2414_v62  ;;  %v2548_v33 = vmul.f32 %v2545_v5, %v2434_v49  ;;  %v2549_v8 = vmul.f32 %v2545_v5, %v2454_v30 }
 0x4c0   :  { %v2550_v35 = vmul.f32 %v2545_v5, %v2474_v0  ;;  %v2551_v16 = vmul.f32 %v2545_v5, %v2494_v53  ;;  %v2552_v3 = vmul.f32 %v2545_v5, %v2514_v50  ;;  %v2553_v4 = vmul.f32 %v2545_v5, %v2534_v27 }
 0x4c1   :  { %v2554_v17 = vadd.f32 %v2546_v6, %v2252_v20  ;;  %v2555_v38 = vadd.f32 %v2547_v7, %v2253_v21  ;;  %v2556_v19 = vadd.f32 %v2548_v33, %v2254_v11  ;;  %v2557_v37 = vadd.f32 %v2549_v8, %v2255_v34 }
 0x4c2   :  { %v2558_v40 = vadd.f32 %v2550_v35, %v4085_v25  ;;  %v2559_v63 = vadd.f32 %v2551_v16, %v4087_v36  ;;  %v2560_v15 = vadd.f32 %v2552_v3, %v2258_v57  ;;  %v2561_v20 = vadd.f32 %v2553_v4, %v2259_v41 }
 0x4c3   :  { %2562 = vst [vmem:[#allocation37] sm:$0xff] %v2554_v17 }
 0x4c4   :  { %2563 = vst [vmem:[#allocation37 + $0x8] sm:$0xff] %v2555_v38 }
 0x4c5   :  { %2564 = vst [vmem:[#allocation37 + $0x10] sm:$0xff] %v2556_v19 }
 0x4c6   :  { %2565 = vst [vmem:[#allocation37 + $0x18] sm:$0xff] %v2557_v37 }
 0x4c7   :  { %2566 = vst [vmem:[#allocation37 + $0x20] sm:$0xff] %v2558_v40 }
 0x4c8   :  { %2567 = vst [vmem:[#allocation37 + $0x28] sm:$0xff] %v2559_v63 }
 0x4c9   :  { %2568 = vst [vmem:[#allocation37 + $0x30] sm:$0xff] %v2560_v15 }
 0x4ca   :  { %2570 = vst.msk [vmem:[#allocation37 + $0x38] sm:$0xff] %vm2569_vm6, %v2561_v20 }
 0x4cb   :  { %3355 = shalt.err (!%p3352_p2)
}
 0x4cc   :  { %2588 = dma.vmem_to_hbm [thread:$0]  %s2584_s23, 1152, %s2586_s4, [#allocation4]  }
 0x4cd   :  { %3380 = dma.done.wait [#allocation4], 1152  }
 0x4ce   :  { %3381 = vsyncadd [#allocation4], 4294966144 }
 0x4cf   :  { %2593 = vsyncpa [#allocation3], 1 }
 0x4d0   :  { %2594 = vsyncpa [#allocation6], 1 }
 0x4d1   :  { %2595 = vsyncpa [#allocation9], 1 }
 0x4d2   :  { %2596 = vsyncpa [#allocation12], 1 }
 0x4d3   :  { %2597 = vsyncpa [#allocation15], 1 }
 0x4d4   :  { %2598 = vsyncpa [#allocation18], 1 }
 0x4d5   :  { %2599 = vsyncpa [#allocation21], 1 }
 0x4d6   :  { %2600 = vsyncpa [#allocation24], 1 }
 0x4d7   :  { %2601 = vsyncpa [#allocation27], 1 }
 0x4d8   :  { %2602 = vsyncpa [#allocation30], 1 }
 0x4d9   :  { %2603 = vsyncpa [#allocation33], 1 }
 0x4da   :  { %2604 = vsyncpa [#allocation36], 1 }
 0x4db   :  { %2605 = vsyncpa [#allocation4], 1 }

</bundles_post_ra>
